<compile_context>
chip_gen: v6e
topology: v6e:2x2x1
jax: 0.10.0
libtpu: 0.0.40
codegen_flags: <defaults>
</compile_context>

<pallas_src>
import functools

import jax
import jax.numpy as jnp
from jax.experimental import pallas as pl
from jax.experimental.pallas import tpu as pltpu

_VMEM = pl.BlockSpec(memory_space=pltpu.MemorySpace.VMEM)
_BN_EPS = 1e-5


# --------------------------------------------------------------------------
# Fused Pallas kernel: MaxPool2d(2) -> (dwconv3x3 + pwconv1x1 + BN + ReLU) * 2
# --------------------------------------------------------------------------

def _dsconv_bn_relu(x, pad_ref, dw, pw, gamma, beta, eps):
    """Depthwise 3x3 (zero pad=1, no bias) + pointwise 1x1 (no bias)
    + BatchNorm2d (training-mode batch stats) + ReLU, fully inside VMEM."""
    B, H, W, C = x.shape
    Co = pw.shape[1]

    # Zero-pad into VMEM scratch (no HBM round trip, no XLA pad op).
    pad_ref[...] = jnp.zeros(pad_ref.shape, jnp.float32)
    pad_ref[:, 1:H + 1, 1:W + 1, :] = x
    xp = pad_ref[...]

    # 9-tap depthwise conv; per-tap per-channel weights broadcast along the lane axis.
    acc = jnp.zeros((B, H, W, C), jnp.float32)
    for ky in range(3):
        for kx in range(3):
            acc = acc + xp[:, ky:ky + H, kx:kx + W, :] * dw[ky, kx, :]

    # Pointwise 1x1 conv as a single MXU matmul with f32 accumulation.
    y = jnp.dot(acc.reshape(B * H * W, C), pw, preferred_element_type=jnp.float32)

    # BatchNorm2d, training mode (biased batch stats over N*H*W), folded to one scale/shift.
    n = y.shape[0]
    mean = jnp.sum(y, axis=0, keepdims=True) * (1.0 / n)
    msq = jnp.sum(y * y, axis=0, keepdims=True) * (1.0 / n)
    var = msq - mean * mean
    s = gamma * jax.lax.rsqrt(var + eps)
    t = beta - mean * s
    y = jnp.maximum(y * s + t, 0.0)          # fused scale/shift + ReLU, one VPU pass
    return y.reshape(B, H, W, Co)


def _down_kernel(eps,
                 x00_ref, x01_ref, x10_ref, x11_ref,
                 dw1_ref, pw1_ref, g1_ref, b1_ref,
                 dw2_ref, pw2_ref, g2_ref, b2_ref,
                 o_ref, p1_ref, p2_ref):
    # --- MaxPool2d(kernel=2, stride=2): elementwise max of the four window elements ---
    pooled = jnp.maximum(jnp.maximum(x00_ref[...], x01_ref[...]),
                         jnp.maximum(x10_ref[...], x11_ref[...]))

    # --- DoubleConv, entirely resident in VMEM ---
    h = _dsconv_bn_relu(pooled, p1_ref, dw1_ref[...], pw1_ref[...],
                        g1_ref[...], b1_ref[...], eps)
    o_ref[...] = _dsconv_bn_relu(h, p2_ref, dw2_ref[...], pw2_ref[...],
                                 g2_ref[...], b2_ref[...], eps)


# --------------------------------------------------------------------------
# Wrapper
# --------------------------------------------------------------------------

def down_forward(x_nchw, params):
    """Down(in_channels, out_channels): MaxPool2d(2) -> DoubleConv.  NCHW in / NCHW out."""
    x = jnp.transpose(x_nchw, (0, 2, 3, 1)).astype(jnp.float32)   # NCHW -> NHWC
    B, H, W, Cin = x.shape
    Hh, Wh = H // 2, W // 2
    Cmid = params['pw1'].shape[1]
    Cout = params['pw2'].shape[1]

    # The four 2x2-window elements as quarter-size strided slices (XLA fuses them with the
    # transpose above into one cheap copy); the max reduction happens inside the kernel.
    x00 = x[:, 0::2, 0::2, :]
    x01 = x[:, 0::2, 1::2, :]
    x10 = x[:, 1::2, 0::2, :]
    x11 = x[:, 1::2, 1::2, :]

    kern = functools.partial(_down_kernel, _BN_EPS)

    # NOTE: at realistic resolutions this would need a spatial grid (tile over B*H, blocks
    # multiple of (8,128)), a two-pass BN (global stats kernel + normalize kernel) and
    # dimension_semantics=("parallel", ...) to use both v7x TensorCores / stay under its
    # 64 MiB VMEM.  At this size the whole working set is < 1 MiB, so a single un-gridded
    # call with everything resident in VMEM is both correct (exact batch stats) and fastest.
    out = pl.pallas_call(
        kern,
        out_shape=jax.ShapeDtypeStruct((B, Hh, Wh, Cout), jnp.float32),
        in_specs=[_VMEM] * 12,
        out_specs=_VMEM,
        scratch_shapes=[
            pltpu.VMEM((B, Hh + 2, Wh + 2, Cin), jnp.float32),    # padded pooled input
            pltpu.VMEM((B, Hh + 2, Wh + 2, Cmid), jnp.float32),   # padded conv1 output
        ],
    )(x00, x01, x10, x11,
      params['dw1'], params['pw1'], params['g1'], params['b1'],
      params['dw2'], params['pw2'], params['g2'], params['b2'])

    return jnp.transpose(out, (0, 3, 1, 2))                       # NHWC -> NCHW


down = jax.jit(down_forward)


# --------------------------------------------------------------------------
# Deterministic parameter initialization
# --------------------------------------------------------------------------

def _init_dsconv(key, cin, cout, k=3):
    k1, k2 = jax.random.split(key)
    dw = jax.random.normal(k1, (k, k, cin), jnp.float32) * (1.0 / (k * k))
    pw = jax.random.normal(k2, (cin, cout), jnp.float32) * (cin ** -0.5)
    return dw, pw


def init_down_params(key, cin, cout, cmid=None):
    cmid = cmid or cout
    k1, k2 = jax.random.split(key)
    dw1, pw1 = _init_dsconv(k1, cin, cmid)
    dw2, pw2 = _init_dsconv(k2, cmid, cout)
    return {
        'dw1': dw1, 'pw1': pw1,
        'g1': jnp.ones((1, cmid), jnp.float32), 'b1': jnp.zeros((1, cmid), jnp.float32),
        'dw2': dw2, 'pw2': pw2,
        'g2': jnp.ones((1, cout), jnp.float32), 'b2': jnp.zeros((1, cout), jnp.float32),
    }


# --------------------------------------------------------------------------
# Entry point
# --------------------------------------------------------------------------

if __name__ == "__main__":
    key = jax.random.PRNGKey(0)
    kx, kp = jax.random.split(key)

    B, Cin, H, W = 2, 32, 16, 16
    Cout = 64                                  # Down(32, 64)

    x = jax.random.normal(kx, (B, Cin, H, W), jnp.float32)
    params = init_down_params(kp, Cin, Cout)

    out = down(x, params)
    jax.block_until_ready(out)

    assert out.shape == (B, Cout, H // 2, W // 2), out.shape
    assert out.dtype == jnp.float32
    assert bool(jnp.all(jnp.isfinite(out)))
    print("KERNEL_OK")
</pallas_src>

<mosaic_0001>
module attributes {stable_mosaic.version = 11 : i64} {
  func.func @_down_kernel(%arg0: memref<2x8x8x32xf32, #tpu.memory_space<vmem>>, %arg1: memref<2x8x8x32xf32, #tpu.memory_space<vmem>>, %arg2: memref<2x8x8x32xf32, #tpu.memory_space<vmem>>, %arg3: memref<2x8x8x32xf32, #tpu.memory_space<vmem>>, %arg4: memref<3x3x32xf32, #tpu.memory_space<vmem>>, %arg5: memref<32x64xf32, #tpu.memory_space<vmem>>, %arg6: memref<1x64xf32, #tpu.memory_space<vmem>>, %arg7: memref<1x64xf32, #tpu.memory_space<vmem>>, %arg8: memref<3x3x64xf32, #tpu.memory_space<vmem>>, %arg9: memref<64x64xf32, #tpu.memory_space<vmem>>, %arg10: memref<1x64xf32, #tpu.memory_space<vmem>>, %arg11: memref<1x64xf32, #tpu.memory_space<vmem>>, %arg12: memref<2x8x8x64xf32, #tpu.memory_space<vmem>>, %arg13: memref<2x10x10x32xf32, #tpu.memory_space<vmem>>, %arg14: memref<2x10x10x64xf32, #tpu.memory_space<vmem>>) attributes {dimension_semantics = [], scalar_prefetch = 0 : i64, scratch_operands = 2 : i64, tpu.core_type = #tpu.core_type<tc>} {
    %c0 = arith.constant 0 : index
    %c0_0 = arith.constant 0 : index
    %c0_1 = arith.constant 0 : index
    %c0_2 = arith.constant 0 : index
    %0 = vector.load %arg0[%c0, %c0_0, %c0_1, %c0_2] : memref<2x8x8x32xf32, #tpu.memory_space<vmem>>, vector<2x8x8x32xf32>
    %c0_3 = arith.constant 0 : index
    %c0_4 = arith.constant 0 : index
    %c0_5 = arith.constant 0 : index
    %c0_6 = arith.constant 0 : index
    %1 = vector.load %arg1[%c0_3, %c0_4, %c0_5, %c0_6] : memref<2x8x8x32xf32, #tpu.memory_space<vmem>>, vector<2x8x8x32xf32>
    %2 = arith.maximumf %0, %1 : vector<2x8x8x32xf32>
    %c0_7 = arith.constant 0 : index
    %c0_8 = arith.constant 0 : index
    %c0_9 = arith.constant 0 : index
    %c0_10 = arith.constant 0 : index
    %3 = vector.load %arg2[%c0_7, %c0_8, %c0_9, %c0_10] : memref<2x8x8x32xf32, #tpu.memory_space<vmem>>, vector<2x8x8x32xf32>
    %c0_11 = arith.constant 0 : index
    %c0_12 = arith.constant 0 : index
    %c0_13 = arith.constant 0 : index
    %c0_14 = arith.constant 0 : index
    %4 = vector.load %arg3[%c0_11, %c0_12, %c0_13, %c0_14] : memref<2x8x8x32xf32, #tpu.memory_space<vmem>>, vector<2x8x8x32xf32>
    %5 = arith.maximumf %3, %4 : vector<2x8x8x32xf32>
    %6 = arith.maximumf %2, %5 : vector<2x8x8x32xf32>
    %c0_15 = arith.constant 0 : index
    %c0_16 = arith.constant 0 : index
    %c0_17 = arith.constant 0 : index
    %7 = vector.load %arg4[%c0_15, %c0_16, %c0_17] : memref<3x3x32xf32, #tpu.memory_space<vmem>>, vector<3x3x32xf32>
    %c0_18 = arith.constant 0 : index
    %c0_19 = arith.constant 0 : index
    %8 = vector.load %arg5[%c0_18, %c0_19] : memref<32x64xf32, #tpu.memory_space<vmem>>, vector<32x64xf32>
    %c0_20 = arith.constant 0 : index
    %c0_21 = arith.constant 0 : index
    %9 = vector.load %arg6[%c0_20, %c0_21] : memref<1x64xf32, #tpu.memory_space<vmem>>, vector<1x64xf32>
    %c0_22 = arith.constant 0 : index
    %c0_23 = arith.constant 0 : index
    %10 = vector.load %arg7[%c0_22, %c0_23] : memref<1x64xf32, #tpu.memory_space<vmem>>, vector<1x64xf32>
    %cst = arith.constant 0.000000e+00 : f32
    %11 = vector.broadcast %cst : f32 to vector<2x10x10x32xf32>
    %c0_24 = arith.constant 0 : index
    %c0_25 = arith.constant 0 : index
    %c0_26 = arith.constant 0 : index
    %c0_27 = arith.constant 0 : index
    %12 = vector.load %arg13[%c0_24, %c0_25, %c0_26, %c0_27] : memref<2x10x10x32xf32, #tpu.memory_space<vmem>>, vector<2x10x10x32xf32>
    tpu.vector_store %arg13[%c0_24, %c0_25, %c0_26, %c0_27], %11 {strides = array<i32>} : memref<2x10x10x32xf32, #tpu.memory_space<vmem>>, vector<2x10x10x32xf32>,
    %c0_28 = arith.constant 0 : index
    %c1 = arith.constant 1 : index
    %c1_29 = arith.constant 1 : index
    %c0_30 = arith.constant 0 : index
    %13 = vector.load %arg13[%c0_28, %c1, %c1_29, %c0_30] : memref<2x10x10x32xf32, #tpu.memory_space<vmem>>, vector<2x8x8x32xf32>
    tpu.vector_store %arg13[%c0_28, %c1, %c1_29, %c0_30], %6 {strides = array<i32>} : memref<2x10x10x32xf32, #tpu.memory_space<vmem>>, vector<2x8x8x32xf32>,
    %c0_31 = arith.constant 0 : index
    %c0_32 = arith.constant 0 : index
    %c0_33 = arith.constant 0 : index
    %c0_34 = arith.constant 0 : index
    %14 = vector.load %arg13[%c0_31, %c0_32, %c0_33, %c0_34] : memref<2x10x10x32xf32, #tpu.memory_space<vmem>>, vector<2x10x10x32xf32>
    %cst_35 = arith.constant 0.000000e+00 : f32
    %15 = vector.broadcast %cst_35 : f32 to vector<2x8x8x32xf32>
    %16 = vector.extract_strided_slice %14 {offsets = [0, 0, 0, 0], sizes = [2, 8, 8, 32], strides = [1, 1, 1, 1]} : vector<2x10x10x32xf32> to vector<2x8x8x32xf32>
    %17 = vector.extract_strided_slice %7 {offsets = [0, 0, 0], sizes = [1, 1, 32], strides = [1, 1, 1]} : vector<3x3x32xf32> to vector<1x1x32xf32>
    %18 = vector.shape_cast %17 : vector<1x1x32xf32> to vector<32xf32>
    %19 = vector.shape_cast %18 : vector<32xf32> to vector<1x1x1x32xf32>
    %20 = vector.broadcast %19 : vector<1x1x1x32xf32> to vector<2x8x8x32xf32>
    %21 = arith.mulf %16, %20 : vector<2x8x8x32xf32>
    %22 = arith.addf %15, %21 : vector<2x8x8x32xf32>
    %23 = vector.extract_strided_slice %14 {offsets = [0, 0, 1, 0], sizes = [2, 8, 8, 32], strides = [1, 1, 1, 1]} : vector<2x10x10x32xf32> to vector<2x8x8x32xf32>
    %24 = vector.extract_strided_slice %7 {offsets = [0, 1, 0], sizes = [1, 1, 32], strides = [1, 1, 1]} : vector<3x3x32xf32> to vector<1x1x32xf32>
    %25 = vector.shape_cast %24 : vector<1x1x32xf32> to vector<32xf32>
    %26 = vector.shape_cast %25 : vector<32xf32> to vector<1x1x1x32xf32>
    %27 = vector.broadcast %26 : vector<1x1x1x32xf32> to vector<2x8x8x32xf32>
    %28 = arith.mulf %23, %27 : vector<2x8x8x32xf32>
    %29 = arith.addf %22, %28 : vector<2x8x8x32xf32>
    %30 = vector.extract_strided_slice %14 {offsets = [0, 0, 2, 0], sizes = [2, 8, 8, 32], strides = [1, 1, 1, 1]} : vector<2x10x10x32xf32> to vector<2x8x8x32xf32>
    %31 = vector.extract_strided_slice %7 {offsets = [0, 2, 0], sizes = [1, 1, 32], strides = [1, 1, 1]} : vector<3x3x32xf32> to vector<1x1x32xf32>
    %32 = vector.shape_cast %31 : vector<1x1x32xf32> to vector<32xf32>
    %33 = vector.shape_cast %32 : vector<32xf32> to vector<1x1x1x32xf32>
    %34 = vector.broadcast %33 : vector<1x1x1x32xf32> to vector<2x8x8x32xf32>
    %35 = arith.mulf %30, %34 : vector<2x8x8x32xf32>
    %36 = arith.addf %29, %35 : vector<2x8x8x32xf32>
    %37 = vector.extract_strided_slice %14 {offsets = [0, 1, 0, 0], sizes = [2, 8, 8, 32], strides = [1, 1, 1, 1]} : vector<2x10x10x32xf32> to vector<2x8x8x32xf32>
    %38 = vector.extract_strided_slice %7 {offsets = [1, 0, 0], sizes = [1, 1, 32], strides = [1, 1, 1]} : vector<3x3x32xf32> to vector<1x1x32xf32>
    %39 = vector.shape_cast %38 : vector<1x1x32xf32> to vector<32xf32>
    %40 = vector.shape_cast %39 : vector<32xf32> to vector<1x1x1x32xf32>
    %41 = vector.broadcast %40 : vector<1x1x1x32xf32> to vector<2x8x8x32xf32>
    %42 = arith.mulf %37, %41 : vector<2x8x8x32xf32>
    %43 = arith.addf %36, %42 : vector<2x8x8x32xf32>
    %44 = vector.extract_strided_slice %14 {offsets = [0, 1, 1, 0], sizes = [2, 8, 8, 32], strides = [1, 1, 1, 1]} : vector<2x10x10x32xf32> to vector<2x8x8x32xf32>
    %45 = vector.extract_strided_slice %7 {offsets = [1, 1, 0], sizes = [1, 1, 32], strides = [1, 1, 1]} : vector<3x3x32xf32> to vector<1x1x32xf32>
    %46 = vector.shape_cast %45 : vector<1x1x32xf32> to vector<32xf32>
    %47 = vector.shape_cast %46 : vector<32xf32> to vector<1x1x1x32xf32>
    %48 = vector.broadcast %47 : vector<1x1x1x32xf32> to vector<2x8x8x32xf32>
    %49 = arith.mulf %44, %48 : vector<2x8x8x32xf32>
    %50 = arith.addf %43, %49 : vector<2x8x8x32xf32>
    %51 = vector.extract_strided_slice %14 {offsets = [0, 1, 2, 0], sizes = [2, 8, 8, 32], strides = [1, 1, 1, 1]} : vector<2x10x10x32xf32> to vector<2x8x8x32xf32>
    %52 = vector.extract_strided_slice %7 {offsets = [1, 2, 0], sizes = [1, 1, 32], strides = [1, 1, 1]} : vector<3x3x32xf32> to vector<1x1x32xf32>
    %53 = vector.shape_cast %52 : vector<1x1x32xf32> to vector<32xf32>
    %54 = vector.shape_cast %53 : vector<32xf32> to vector<1x1x1x32xf32>
    %55 = vector.broadcast %54 : vector<1x1x1x32xf32> to vector<2x8x8x32xf32>
    %56 = arith.mulf %51, %55 : vector<2x8x8x32xf32>
    %57 = arith.addf %50, %56 : vector<2x8x8x32xf32>
    %58 = vector.extract_strided_slice %14 {offsets = [0, 2, 0, 0], sizes = [2, 8, 8, 32], strides = [1, 1, 1, 1]} : vector<2x10x10x32xf32> to vector<2x8x8x32xf32>
    %59 = vector.extract_strided_slice %7 {offsets = [2, 0, 0], sizes = [1, 1, 32], strides = [1, 1, 1]} : vector<3x3x32xf32> to vector<1x1x32xf32>
    %60 = vector.shape_cast %59 : vector<1x1x32xf32> to vector<32xf32>
    %61 = vector.shape_cast %60 : vector<32xf32> to vector<1x1x1x32xf32>
    %62 = vector.broadcast %61 : vector<1x1x1x32xf32> to vector<2x8x8x32xf32>
    %63 = arith.mulf %58, %62 : vector<2x8x8x32xf32>
    %64 = arith.addf %57, %63 : vector<2x8x8x32xf32>
    %65 = vector.extract_strided_slice %14 {offsets = [0, 2, 1, 0], sizes = [2, 8, 8, 32], strides = [1, 1, 1, 1]} : vector<2x10x10x32xf32> to vector<2x8x8x32xf32>
    %66 = vector.extract_strided_slice %7 {offsets = [2, 1, 0], sizes = [1, 1, 32], strides = [1, 1, 1]} : vector<3x3x32xf32> to vector<1x1x32xf32>
    %67 = vector.shape_cast %66 : vector<1x1x32xf32> to vector<32xf32>
    %68 = vector.shape_cast %67 : vector<32xf32> to vector<1x1x1x32xf32>
    %69 = vector.broadcast %68 : vector<1x1x1x32xf32> to vector<2x8x8x32xf32>
    %70 = arith.mulf %65, %69 : vector<2x8x8x32xf32>
    %71 = arith.addf %64, %70 : vector<2x8x8x32xf32>
    %72 = vector.extract_strided_slice %14 {offsets = [0, 2, 2, 0], sizes = [2, 8, 8, 32], strides = [1, 1, 1, 1]} : vector<2x10x10x32xf32> to vector<2x8x8x32xf32>
    %73 = vector.extract_strided_slice %7 {offsets = [2, 2, 0], sizes = [1, 1, 32], strides = [1, 1, 1]} : vector<3x3x32xf32> to vector<1x1x32xf32>
    %74 = vector.shape_cast %73 : vector<1x1x32xf32> to vector<32xf32>
    %75 = vector.shape_cast %74 : vector<32xf32> to vector<1x1x1x32xf32>
    %76 = vector.broadcast %75 : vector<1x1x1x32xf32> to vector<2x8x8x32xf32>
    %77 = arith.mulf %72, %76 : vector<2x8x8x32xf32>
    %78 = arith.addf %71, %77 : vector<2x8x8x32xf32>
    %79 = vector.shape_cast %78 : vector<2x8x8x32xf32> to vector<128x32xf32>
    %cst_36 = arith.constant dense<0.000000e+00> : vector<128x64xf32>
    %80 = tpu.matmul %79, %8, %cst_36 {dimension_numbers = #tpu.dot_dimension_numbers<[1], [0], [0], [1], [0, 0, 1, 1], [], []>} : vector<128x32xf32>, vector<32x64xf32>, vector<128x64xf32> -> vector<128x64xf32>
    %cst_37 = arith.constant dense<0.000000e+00> : vector<64xf32>
    %81 = vector.multi_reduction <add>, %80, %cst_37 [0] : vector<128x64xf32> to vector<64xf32>
    %82 = vector.shape_cast %81 : vector<64xf32> to vector<1x64xf32>
    %cst_38 = arith.constant 7.812500e-03 : f32
    %83 = vector.broadcast %cst_38 : f32 to vector<1x64xf32>
    %84 = arith.mulf %82, %83 : vector<1x64xf32>
    %85 = arith.mulf %80, %80 : vector<128x64xf32>
    %cst_39 = arith.constant dense<0.000000e+00> : vector<64xf32>
    %86 = vector.multi_reduction <add>, %85, %cst_39 [0] : vector<128x64xf32> to vector<64xf32>
    %87 = vector.shape_cast %86 : vector<64xf32> to vector<1x64xf32>
    %cst_40 = arith.constant 7.812500e-03 : f32
    %88 = vector.broadcast %cst_40 : f32 to vector<1x64xf32>
    %89 = arith.mulf %87, %88 : vector<1x64xf32>
    %90 = arith.mulf %84, %84 : vector<1x64xf32>
    %91 = arith.subf %89, %90 : vector<1x64xf32>
    %cst_41 = arith.constant 9.99999974E-6 : f32
    %92 = vector.broadcast %cst_41 : f32 to vector<1x64xf32>
    %93 = arith.addf %91, %92 : vector<1x64xf32>
    %94 = math.rsqrt %93 : vector<1x64xf32>
    %95 = arith.mulf %9, %94 : vector<1x64xf32>
    %96 = arith.mulf %84, %95 : vector<1x64xf32>
    %97 = arith.subf %10, %96 : vector<1x64xf32>
    %98 = vector.broadcast %95 : vector<1x64xf32> to vector<128x64xf32>
    %99 = arith.mulf %80, %98 : vector<128x64xf32>
    %100 = vector.broadcast %97 : vector<1x64xf32> to vector<128x64xf32>
    %101 = arith.addf %99, %100 : vector<128x64xf32>
    %cst_42 = arith.constant 0.000000e+00 : f32
    %102 = vector.broadcast %cst_42 : f32 to vector<128x64xf32>
    %103 = arith.maximumf %101, %102 : vector<128x64xf32>
    %104 = vector.shape_cast %103 : vector<128x64xf32> to vector<2x8x8x64xf32>
    %c0_43 = arith.constant 0 : index
    %c0_44 = arith.constant 0 : index
    %c0_45 = arith.constant 0 : index
    %105 = vector.load %arg8[%c0_43, %c0_44, %c0_45] : memref<3x3x64xf32, #tpu.memory_space<vmem>>, vector<3x3x64xf32>
    %c0_46 = arith.constant 0 : index
    %c0_47 = arith.constant 0 : index
    %106 = vector.load %arg9[%c0_46, %c0_47] : memref<64x64xf32, #tpu.memory_space<vmem>>, vector<64x64xf32>
    %c0_48 = arith.constant 0 : index
    %c0_49 = arith.constant 0 : index
    %107 = vector.load %arg10[%c0_48, %c0_49] : memref<1x64xf32, #tpu.memory_space<vmem>>, vector<1x64xf32>
    %c0_50 = arith.constant 0 : index
    %c0_51 = arith.constant 0 : index
    %108 = vector.load %arg11[%c0_50, %c0_51] : memref<1x64xf32, #tpu.memory_space<vmem>>, vector<1x64xf32>
    %cst_52 = arith.constant 0.000000e+00 : f32
    %109 = vector.broadcast %cst_52 : f32 to vector<2x10x10x64xf32>
    %c0_53 = arith.constant 0 : index
    %c0_54 = arith.constant 0 : index
    %c0_55 = arith.constant 0 : index
    %c0_56 = arith.constant 0 : index
    %110 = vector.load %arg14[%c0_53, %c0_54, %c0_55, %c0_56] : memref<2x10x10x64xf32, #tpu.memory_space<vmem>>, vector<2x10x10x64xf32>
    tpu.vector_store %arg14[%c0_53, %c0_54, %c0_55, %c0_56], %109 {strides = array<i32>} : memref<2x10x10x64xf32, #tpu.memory_space<vmem>>, vector<2x10x10x64xf32>,
    %c0_57 = arith.constant 0 : index
    %c1_58 = arith.constant 1 : index
    %c1_59 = arith.constant 1 : index
    %c0_60 = arith.constant 0 : index
    %111 = vector.load %arg14[%c0_57, %c1_58, %c1_59, %c0_60] : memref<2x10x10x64xf32, #tpu.memory_space<vmem>>, vector<2x8x8x64xf32>
    tpu.vector_store %arg14[%c0_57, %c1_58, %c1_59, %c0_60], %104 {strides = array<i32>} : memref<2x10x10x64xf32, #tpu.memory_space<vmem>>, vector<2x8x8x64xf32>,
    %c0_61 = arith.constant 0 : index
    %c0_62 = arith.constant 0 : index
    %c0_63 = arith.constant 0 : index
    %c0_64 = arith.constant 0 : index
    %112 = vector.load %arg14[%c0_61, %c0_62, %c0_63, %c0_64] : memref<2x10x10x64xf32, #tpu.memory_space<vmem>>, vector<2x10x10x64xf32>
    %cst_65 = arith.constant 0.000000e+00 : f32
    %113 = vector.broadcast %cst_65 : f32 to vector<2x8x8x64xf32>
    %114 = vector.extract_strided_slice %112 {offsets = [0, 0, 0, 0], sizes = [2, 8, 8, 64], strides = [1, 1, 1, 1]} : vector<2x10x10x64xf32> to vector<2x8x8x64xf32>
    %115 = vector.extract_strided_slice %105 {offsets = [0, 0, 0], sizes = [1, 1, 64], strides = [1, 1, 1]} : vector<3x3x64xf32> to vector<1x1x64xf32>
    %116 = vector.shape_cast %115 : vector<1x1x64xf32> to vector<64xf32>
    %117 = vector.shape_cast %116 : vector<64xf32> to vector<1x1x1x64xf32>
    %118 = vector.broadcast %117 : vector<1x1x1x64xf32> to vector<2x8x8x64xf32>
    %119 = arith.mulf %114, %118 : vector<2x8x8x64xf32>
    %120 = arith.addf %113, %119 : vector<2x8x8x64xf32>
    %121 = vector.extract_strided_slice %112 {offsets = [0, 0, 1, 0], sizes = [2, 8, 8, 64], strides = [1, 1, 1, 1]} : vector<2x10x10x64xf32> to vector<2x8x8x64xf32>
    %122 = vector.extract_strided_slice %105 {offsets = [0, 1, 0], sizes = [1, 1, 64], strides = [1, 1, 1]} : vector<3x3x64xf32> to vector<1x1x64xf32>
    %123 = vector.shape_cast %122 : vector<1x1x64xf32> to vector<64xf32>
    %124 = vector.shape_cast %123 : vector<64xf32> to vector<1x1x1x64xf32>
    %125 = vector.broadcast %124 : vector<1x1x1x64xf32> to vector<2x8x8x64xf32>
    %126 = arith.mulf %121, %125 : vector<2x8x8x64xf32>
    %127 = arith.addf %120, %126 : vector<2x8x8x64xf32>
    %128 = vector.extract_strided_slice %112 {offsets = [0, 0, 2, 0], sizes = [2, 8, 8, 64], strides = [1, 1, 1, 1]} : vector<2x10x10x64xf32> to vector<2x8x8x64xf32>
    %129 = vector.extract_strided_slice %105 {offsets = [0, 2, 0], sizes = [1, 1, 64], strides = [1, 1, 1]} : vector<3x3x64xf32> to vector<1x1x64xf32>
    %130 = vector.shape_cast %129 : vector<1x1x64xf32> to vector<64xf32>
    %131 = vector.shape_cast %130 : vector<64xf32> to vector<1x1x1x64xf32>
    %132 = vector.broadcast %131 : vector<1x1x1x64xf32> to vector<2x8x8x64xf32>
    %133 = arith.mulf %128, %132 : vector<2x8x8x64xf32>
    %134 = arith.addf %127, %133 : vector<2x8x8x64xf32>
    %135 = vector.extract_strided_slice %112 {offsets = [0, 1, 0, 0], sizes = [2, 8, 8, 64], strides = [1, 1, 1, 1]} : vector<2x10x10x64xf32> to vector<2x8x8x64xf32>
    %136 = vector.extract_strided_slice %105 {offsets = [1, 0, 0], sizes = [1, 1, 64], strides = [1, 1, 1]} : vector<3x3x64xf32> to vector<1x1x64xf32>
    %137 = vector.shape_cast %136 : vector<1x1x64xf32> to vector<64xf32>
    %138 = vector.shape_cast %137 : vector<64xf32> to vector<1x1x1x64xf32>
    %139 = vector.broadcast %138 : vector<1x1x1x64xf32> to vector<2x8x8x64xf32>
    %140 = arith.mulf %135, %139 : vector<2x8x8x64xf32>
    %141 = arith.addf %134, %140 : vector<2x8x8x64xf32>
    %142 = vector.extract_strided_slice %112 {offsets = [0, 1, 1, 0], sizes = [2, 8, 8, 64], strides = [1, 1, 1, 1]} : vector<2x10x10x64xf32> to vector<2x8x8x64xf32>
    %143 = vector.extract_strided_slice %105 {offsets = [1, 1, 0], sizes = [1, 1, 64], strides = [1, 1, 1]} : vector<3x3x64xf32> to vector<1x1x64xf32>
    %144 = vector.shape_cast %143 : vector<1x1x64xf32> to vector<64xf32>
    %145 = vector.shape_cast %144 : vector<64xf32> to vector<1x1x1x64xf32>
    %146 = vector.broadcast %145 : vector<1x1x1x64xf32> to vector<2x8x8x64xf32>
    %147 = arith.mulf %142, %146 : vector<2x8x8x64xf32>
    %148 = arith.addf %141, %147 : vector<2x8x8x64xf32>
    %149 = vector.extract_strided_slice %112 {offsets = [0, 1, 2, 0], sizes = [2, 8, 8, 64], strides = [1, 1, 1, 1]} : vector<2x10x10x64xf32> to vector<2x8x8x64xf32>
    %150 = vector.extract_strided_slice %105 {offsets = [1, 2, 0], sizes = [1, 1, 64], strides = [1, 1, 1]} : vector<3x3x64xf32> to vector<1x1x64xf32>
    %151 = vector.shape_cast %150 : vector<1x1x64xf32> to vector<64xf32>
    %152 = vector.shape_cast %151 : vector<64xf32> to vector<1x1x1x64xf32>
    %153 = vector.broadcast %152 : vector<1x1x1x64xf32> to vector<2x8x8x64xf32>
    %154 = arith.mulf %149, %153 : vector<2x8x8x64xf32>
    %155 = arith.addf %148, %154 : vector<2x8x8x64xf32>
    %156 = vector.extract_strided_slice %112 {offsets = [0, 2, 0, 0], sizes = [2, 8, 8, 64], strides = [1, 1, 1, 1]} : vector<2x10x10x64xf32> to vector<2x8x8x64xf32>
    %157 = vector.extract_strided_slice %105 {offsets = [2, 0, 0], sizes = [1, 1, 64], strides = [1, 1, 1]} : vector<3x3x64xf32> to vector<1x1x64xf32>
    %158 = vector.shape_cast %157 : vector<1x1x64xf32> to vector<64xf32>
    %159 = vector.shape_cast %158 : vector<64xf32> to vector<1x1x1x64xf32>
    %160 = vector.broadcast %159 : vector<1x1x1x64xf32> to vector<2x8x8x64xf32>
    %161 = arith.mulf %156, %160 : vector<2x8x8x64xf32>
    %162 = arith.addf %155, %161 : vector<2x8x8x64xf32>
    %163 = vector.extract_strided_slice %112 {offsets = [0, 2, 1, 0], sizes = [2, 8, 8, 64], strides = [1, 1, 1, 1]} : vector<2x10x10x64xf32> to vector<2x8x8x64xf32>
    %164 = vector.extract_strided_slice %105 {offsets = [2, 1, 0], sizes = [1, 1, 64], strides = [1, 1, 1]} : vector<3x3x64xf32> to vector<1x1x64xf32>
    %165 = vector.shape_cast %164 : vector<1x1x64xf32> to vector<64xf32>
    %166 = vector.shape_cast %165 : vector<64xf32> to vector<1x1x1x64xf32>
    %167 = vector.broadcast %166 : vector<1x1x1x64xf32> to vector<2x8x8x64xf32>
    %168 = arith.mulf %163, %167 : vector<2x8x8x64xf32>
    %169 = arith.addf %162, %168 : vector<2x8x8x64xf32>
    %170 = vector.extract_strided_slice %112 {offsets = [0, 2, 2, 0], sizes = [2, 8, 8, 64], strides = [1, 1, 1, 1]} : vector<2x10x10x64xf32> to vector<2x8x8x64xf32>
    %171 = vector.extract_strided_slice %105 {offsets = [2, 2, 0], sizes = [1, 1, 64], strides = [1, 1, 1]} : vector<3x3x64xf32> to vector<1x1x64xf32>
    %172 = vector.shape_cast %171 : vector<1x1x64xf32> to vector<64xf32>
    %173 = vector.shape_cast %172 : vector<64xf32> to vector<1x1x1x64xf32>
    %174 = vector.broadcast %173 : vector<1x1x1x64xf32> to vector<2x8x8x64xf32>
    %175 = arith.mulf %170, %174 : vector<2x8x8x64xf32>
    %176 = arith.addf %169, %175 : vector<2x8x8x64xf32>
    %177 = vector.shape_cast %176 : vector<2x8x8x64xf32> to vector<128x64xf32>
    %cst_66 = arith.constant dense<0.000000e+00> : vector<128x64xf32>
    %178 = tpu.matmul %177, %106, %cst_66 {dimension_numbers = #tpu.dot_dimension_numbers<[1], [0], [0], [1], [0, 0, 1, 1], [], []>} : vector<128x64xf32>, vector<64x64xf32>, vector<128x64xf32> -> vector<128x64xf32>
    %cst_67 = arith.constant dense<0.000000e+00> : vector<64xf32>
    %179 = vector.multi_reduction <add>, %178, %cst_67 [0] : vector<128x64xf32> to vector<64xf32>
    %180 = vector.shape_cast %179 : vector<64xf32> to vector<1x64xf32>
    %cst_68 = arith.constant 7.812500e-03 : f32
    %181 = vector.broadcast %cst_68 : f32 to vector<1x64xf32>
    %182 = arith.mulf %180, %181 : vector<1x64xf32>
    %183 = arith.mulf %178, %178 : vector<128x64xf32>
    %cst_69 = arith.constant dense<0.000000e+00> : vector<64xf32>
    %184 = vector.multi_reduction <add>, %183, %cst_69 [0] : vector<128x64xf32> to vector<64xf32>
    %185 = vector.shape_cast %184 : vector<64xf32> to vector<1x64xf32>
    %cst_70 = arith.constant 7.812500e-03 : f32
    %186 = vector.broadcast %cst_70 : f32 to vector<1x64xf32>
    %187 = arith.mulf %185, %186 : vector<1x64xf32>
    %188 = arith.mulf %182, %182 : vector<1x64xf32>
    %189 = arith.subf %187, %188 : vector<1x64xf32>
    %cst_71 = arith.constant 9.99999974E-6 : f32
    %190 = vector.broadcast %cst_71 : f32 to vector<1x64xf32>
    %191 = arith.addf %189, %190 : vector<1x64xf32>
    %192 = math.rsqrt %191 : vector<1x64xf32>
    %193 = arith.mulf %107, %192 : vector<1x64xf32>
    %194 = arith.mulf %182, %193 : vector<1x64xf32>
    %195 = arith.subf %108, %194 : vector<1x64xf32>
    %196 = vector.broadcast %193 : vector<1x64xf32> to vector<128x64xf32>
    %197 = arith.mulf %178, %196 : vector<128x64xf32>
    %198 = vector.broadcast %195 : vector<1x64xf32> to vector<128x64xf32>
    %199 = arith.addf %197, %198 : vector<128x64xf32>
    %cst_72 = arith.constant 0.000000e+00 : f32
    %200 = vector.broadcast %cst_72 : f32 to vector<128x64xf32>
    %201 = arith.maximumf %199, %200 : vector<128x64xf32>
    %202 = vector.shape_cast %201 : vector<128x64xf32> to vector<2x8x8x64xf32>
    %c0_73 = arith.constant 0 : index
    %c0_74 = arith.constant 0 : index
    %c0_75 = arith.constant 0 : index
    %c0_76 = arith.constant 0 : index
    %203 = vector.load %arg12[%c0_73, %c0_74, %c0_75, %c0_76] : memref<2x8x8x64xf32, #tpu.memory_space<vmem>>, vector<2x8x8x64xf32>
    tpu.vector_store %arg12[%c0_73, %c0_74, %c0_75, %c0_76], %202 {strides = array<i32>} : memref<2x8x8x64xf32, #tpu.memory_space<vmem>>, vector<2x8x8x64xf32>,
    return
  }
}

</mosaic_0001>

<bundles_post_ra>
// kernel: down_forward.1
= control target key start
LH: loop header
LB: loop body
LE: loop exit
PB: predicated region body
PF: predicated region fallthrough
CT: control target
= control target key end

     0   :  { %vm163_vm0 = vcmask 261120   ;;  %vm165_vm1 = vcmask 254976   ;;  %v262_v2 = vlaneseq  ;;  %v3298_v6 = vmov 0.0   ;;  %s5399_s0 = inlined_call_operand.vmem [shape: f32[2,8,8,32], index: 0, kind: input, shape index: {}]   ;;  %s5400_s1 = inlined_call_operand.vmem [shape: f32[2,8,8,32], index: 1, kind: input, shape index: {}]   ;;  %s5401_s2 = inlined_call_operand.vmem [shape: f32[2,8,8,32], index: 2, kind: input, shape index: {}]   ;;  %s5402_s3 = inlined_call_operand.vmem [shape: f32[2,8,8,32], index: 3, kind: input, shape index: {}]   ;;  %s5403_s4 = inlined_call_operand.vmem [shape: f32[3,3,32], index: 4, kind: input, shape index: {}]   ;;  %s5404_s5 = inlined_call_operand.vmem [shape: f32[32,64], index: 5, kind: input, shape index: {}]   ;;  %s5405_s6 = inlined_call_operand.vmem [shape: f32[1,64], index: 6, kind: input, shape index: {}]   ;;  %s5406_s7 = inlined_call_operand.vmem [shape: f32[1,64], index: 7, kind: input, shape index: {}]   ;;  %s5407_s8 = inlined_call_operand.vmem [shape: f32[3,3,64], index: 8, kind: input, shape index: {}]   ;;  %s5408_s9 = inlined_call_operand.vmem [shape: f32[64,64], index: 9, kind: input, shape index: {}]   ;;  %s5409_s10 = inlined_call_operand.vmem [shape: f32[1,64], index: 10, kind: input, shape index: {}]   ;;  %s5410_s11 = inlined_call_operand.vmem [shape: f32[1,64], index: 11, kind: input, shape index: {}]   ;;  %s5411_s12 = inlined_call_operand.hbm [shape: f32[2,8,8,64], index: 12, kind: output, shape index: {}]  }
   0x1   :  { %v160_v0 = vld [vmem:[%s5404_s5 + $0x18] sm:$0xff]  ;;  %v159_v1 = vld [vmem:[%s5404_s5 + $0x10] sm:$0xff]  ;;  %v3376_v3 = vld [vmem:[%s5404_s5 + $0x8] sm:$0xff]  ;;  %164 = vst.msk [vmem:[#allocation2] sm:$0xff] %vm163_vm0, %v3298_v6  ;;  %vm366_vm2 = vcmask 1046528   ;;  %vm515_vm3 = vcmask 1045504  }
   0x2   :  { %3180 = vmatprep.subr.mxu0 %v160_v0  ;;  %v3381_v4 = vld [vmem:[%s5399_s0] sm:$0xff]  ;;  %v3386_v5 = vld [vmem:[%s5399_s0 + $0x8] sm:$0xff]  ;;  %166 = vst.msk [vmem:[#allocation2 + $0x8] sm:$0x3] %vm165_vm1, %v3298_v6  ;;  %168 = vst.msk [vmem:[#allocation2 + $0x18] sm:$0x3] %vm165_vm1, %v3298_v6 }
   0x3   :  { %167 = vst.msk [vmem:[#allocation2 + $0x10] sm:$0xff] %vm163_vm0, %v3298_v6  ;;  %169 = vst.msk [vmem:[#allocation2 + $0x20] sm:$0xff] %vm163_vm0, %v3298_v6  ;;  %3181 = vmatpush3.msra.mxu0 %v160_v0  ;;  %v157_v7 = vld [vmem:[%s5404_s5] sm:$0xff]  ;;  %v59_v9 = vld [vmem:[%s5400_s1 + $0x8] sm:$0xff]  ;;  %v263_v11 = vshrl.u32 %v262_v2, 7 }
   0x4   :  { %170 = vst.msk [vmem:[#allocation2 + $0x28] sm:$0x3] %vm165_vm1, %v3298_v6  ;;  %172 = vst.msk [vmem:[#allocation2 + $0x38] sm:$0x3] %vm165_vm1, %v3298_v6  ;;  %v58_v8 = vld [vmem:[%s5400_s1] sm:$0xff]  ;;  %3182 = vmatprep.subr.mxu0 %v159_v1  ;;  %v75_v13 = vmax.f32 %v3386_v5, %v59_v9  ;;  %v91_v14 = vld [vmem:[%s5401_s2 + $0x8] sm:$0xff] }
   0x5   :  { %171 = vst.msk [vmem:[#allocation2 + $0x30] sm:$0xff] %vm163_vm0, %v3298_v6  ;;  %173 = vst.msk [vmem:[#allocation2 + $0x40] sm:$0xff] %vm163_vm0, %v3298_v6  ;;  %v90_v10 = vld [vmem:[%s5401_s2] sm:$0xff]  ;;  %v74_v12 = vmax.f32 %v3381_v4, %v58_v8  ;;  %v107_v16 = vld [vmem:[%s5402_s3 + $0x8] sm:$0xff]  ;;  %3183 = vmatpush3.msra.mxu0 %v159_v1  ;;  %v3501_v22 = vsub.s32 0, %v263_v11  ;;  %v3503_v23 = vsub.s32 1, %v263_v11 }
   0x6   :  { %174 = vst.msk [vmem:[#allocation2 + $0x48] sm:$0x3] %vm165_vm1, %v3298_v6  ;;  %176 = vst.msk [vmem:[#allocation2 + $0x58] sm:$0x3] %vm165_vm1, %v3298_v6  ;;  %v106_v15 = vld [vmem:[%s5402_s3] sm:$0xff]  ;;  %v123_v18 = vmax.f32 %v91_v14, %v107_v16  ;;  %3184 = vmatprep.subr.mxu0 %v3376_v3  ;;  %v3505_v24 = vsub.s32 2, %v263_v11 }
   0x7   :  { %175 = vst.msk [vmem:[#allocation2 + $0x50] sm:$0xff] %vm163_vm0, %v3298_v6  ;;  %177 = vst.msk [vmem:[#allocation2 + $0x60] sm:$0xff] %vm163_vm0, %v3298_v6  ;;  %v122_v17 = vmax.f32 %v90_v10, %v106_v15  ;;  %v154_v19 = vld [vmem:[%s5403_s4] sm:$0x7]  ;;  %v155_v20 = vld [vmem:[%s5403_s4 + $0x4] sm:$0x7]  ;;  %3185 = vmatpush3.msra.mxu0 %v3376_v3 }
   0x8   :  { %178 = vst.msk [vmem:[#allocation2 + $0x68] sm:$0x3] %vm165_vm1, %v3298_v6  ;;  %180 = vst.msk [vmem:[#allocation2 + $0x78] sm:$0x3] %vm165_vm1, %v3298_v6  ;;  %v156_v21 = vld [vmem:[%s5403_s4 + $0x8] sm:$0x7]  ;;  %v139_v29 = vmax.f32 %v75_v13, %v123_v18  ;;  %3186 = vmatprep.subr.mxu0 %v157_v7  ;;  %v3527_v34 = vrot.slane %v154_v19, %v3501_v22  ;;  %v3530_v35 = vrot.slane %v154_v19, %v3503_v23 }
   0x9   :  { %179 = vst.msk [vmem:[#allocation2 + $0x70] sm:$0xff] %vm163_vm0, %v3298_v6  ;;  %181 = vst.msk [vmem:[#allocation2 + $0x80] sm:$0xff] %vm163_vm0, %v3298_v6  ;;  %v44_v25 = vld [vmem:[%s5399_s0 + $0x10] sm:$0xff]  ;;  %v138_v28 = vmax.f32 %v74_v12, %v122_v17  ;;  %v45_v32 = vld [vmem:[%s5399_s0 + $0x18] sm:$0xff]  ;;  %v3533_v36 = vrot.slane %v154_v19, %v3505_v24  ;;  %v3536_v37 = vrot.slane %v155_v20, %v3501_v22  ;;  %3187 = vmatpush3.msra.mxu0 %v157_v7 }
   0xa   :  { %182 = vst.msk [vmem:[#allocation2 + $0x88] sm:$0x3] %vm165_vm1, %v3298_v6  ;;  %184 = vst.msk [vmem:[#allocation2 + $0x98] sm:$0x3] %vm165_vm1, %v3298_v6  ;;  %v60_v26 = vld [vmem:[%s5400_s1 + $0x10] sm:$0xff]  ;;  %v61_v33 = vld [vmem:[%s5400_s1 + $0x18] sm:$0xff]  ;;  %v3550_v43 = vrot.slane %v155_v20, %v3503_v23  ;;  %v3553_v44 = vrot.slane %v155_v20, %v3505_v24  ;;  %v3556_v45 = vrot.slane %v156_v21, %v3501_v22 }
   0xb   :  { %183 = vst.msk [vmem:[#allocation2 + $0x90] sm:$0xff] %vm163_vm0, %v3298_v6  ;;  %185 = vst.msk [vmem:[#allocation2 + $0xa0] sm:$0xff] %vm163_vm0, %v3298_v6  ;;  %v92_v27 = vld [vmem:[%s5401_s2 + $0x10] sm:$0xff]  ;;  %v76_v30 = vmax.f32 %v44_v25, %v60_v26  ;;  %v93_v38 = vld [vmem:[%s5401_s2 + $0x18] sm:$0xff]  ;;  %v3559_v46 = vrot.slane %v156_v21, %v3503_v23  ;;  %v3579_v56 = vrot.slane %v156_v21, %v3505_v24 }
   0xc   :  { %186 = vst.msk [vmem:[#allocation2 + $0xa8] sm:$0x3] %vm165_vm1, %v3298_v6  ;;  %188 = vst.msk [vmem:[#allocation2 + $0xb8] sm:$0x3] %vm165_vm1, %v3298_v6  ;;  %v108_v31 = vld [vmem:[%s5402_s3 + $0x10] sm:$0xff]  ;;  %v109_v39 = vld [vmem:[%s5402_s3 + $0x18] sm:$0xff]  ;;  %v77_v58 = vmax.f32 %v45_v32, %v61_v33 }
   0xd   :  { %187 = vst.msk [vmem:[#allocation2 + $0xb0] sm:$0xff] %vm163_vm0, %v3298_v6  ;;  %189 = vst.msk [vmem:[#allocation2 + $0xc0] sm:$0xff] %vm163_vm0, %v3298_v6  ;;  %v46_v40 = vld [vmem:[%s5399_s0 + $0x20] sm:$0xff]  ;;  %v223_v42 = vld [vmem:[#allocation2 + $0x8] sm:$0x3]  ;;  %v124_v57 = vmax.f32 %v92_v27, %v108_v31  ;;  %v125_v1 = vmax.f32 %v93_v38, %v109_v39 }
   0xe   :  { %190 = vst.msk [vmem:[#allocation2 + $0xc8] sm:$0x3] %vm165_vm1, %v3298_v6  ;;  %192 = vst.msk [vmem:[#allocation2 + $0xd8] sm:$0x3] %vm165_vm1, %v3298_v6  ;;  %v222_v41 = vld [vmem:[#allocation2] sm:$0xff]  ;;  %v303_v50 = vmul.f32 %v3530_v35, %v223_v42  ;;  %v47_v54 = vld [vmem:[%s5399_s0 + $0x28] sm:$0xff]  ;;  %v452_v55 = vmul.f32 %v3533_v36, %v223_v42 }
   0xf   :  { %191 = vst.msk [vmem:[#allocation2 + $0xd0] sm:$0xff] %vm163_vm0, %v3298_v6  ;;  %193 = vst.msk [vmem:[#allocation2 + $0xe0] sm:$0xff] %vm163_vm0, %v3298_v6  ;;  %v62_v47 = vld [vmem:[%s5400_s1 + $0x20] sm:$0xff]  ;;  %v266_v48 = vmul.f32 %v3527_v34, %v222_v41  ;;  %v302_v49 = vmul.f32 %v3530_v35, %v222_v41  ;;  %v451_v51 = vmul.f32 %v3533_v36, %v222_v41  ;;  %v63_v59 = vld [vmem:[%s5400_s1 + $0x28] sm:$0xff] }
  0x10   :  { %194 = vst.msk [vmem:[#allocation2 + $0xe8] sm:$0x3] %vm165_vm1, %v3298_v6  ;;  %196 = vst.msk [vmem:[#allocation2 + $0xf8] sm:$0x3] %vm165_vm1, %v3298_v6  ;;  %v94_v52 = vld [vmem:[%s5401_s2 + $0x20] sm:$0xff]  ;;  %v95_v60 = vld [vmem:[%s5401_s2 + $0x28] sm:$0xff]  ;;  %v140_v7 = vmax.f32 %v76_v30, %v124_v57  ;;  %v78_v8 = vmax.f32 %v46_v40, %v62_v47  ;;  %v141_v14 = vmax.f32 %v77_v58, %v125_v1 }
  0x11   :  { %195 = vst.msk [vmem:[#allocation2 + $0xf0] sm:$0xff] %vm163_vm0, %v3298_v6  ;;  %197 = vst.msk [vmem:[#allocation2 + $0x100] sm:$0xff] %vm163_vm0, %v3298_v6  ;;  %v110_v53 = vld [vmem:[%s5402_s3 + $0x20] sm:$0xff]  ;;  %v111_v61 = vld [vmem:[%s5402_s3 + $0x28] sm:$0xff]  ;;  %v367_v62 = vrot.slane %v302_v49, 1  ;;  %v368_v63 = vrot.slane %v303_v50, 1  ;;  %v79_v15 = vmax.f32 %v47_v54, %v63_v59 }
  0x12   :  { %198 = vst.msk [vmem:[#allocation2 + $0x108] sm:$0x3] %vm165_vm1, %v3298_v6  ;;  %200 = vst.msk [vmem:[#allocation2 + $0x118] sm:$0x3] %vm165_vm1, %v3298_v6  ;;  %v516_v0 = vrot.slane %v451_v51, 2  ;;  %v3593_v2 = vld [vmem:[%s5399_s0 + $0x30] sm:$0xff]  ;;  %v126_v9 = vmax.f32 %v94_v52, %v110_v53  ;;  %v127_v16 = vmax.f32 %v95_v60, %v111_v61 }
  0x13   :  { %199 = vst.msk [vmem:[#allocation2 + $0x110] sm:$0xff] %vm163_vm0, %v3298_v6  ;;  %201 = vst.msk [vmem:[#allocation2 + $0x120] sm:$0xff] %vm163_vm0, %v3298_v6  ;;  %v3598_v3 = vld [vmem:[%s5400_s1 + $0x30] sm:$0xff]  ;;  %v517_v5 = vrot.slane %v452_v55, 2  ;;  %v3613_v11 = vld [vmem:[%s5399_s0 + $0x38] sm:$0xff]  ;;  %v369_v13 = vsel %vm366_vm2, %v367_v62, %v368_v63 }
  0x14   :  { %202 = vst.msk [vmem:[#allocation2 + $0x128] sm:$0x3] %vm165_vm1, %v3298_v6  ;;  %204 = vst.msk [vmem:[#allocation2 + $0x138] sm:$0x3] %vm165_vm1, %v3298_v6  ;;  %v3603_v4 = vld [vmem:[%s5401_s2 + $0x30] sm:$0xff]  ;;  %v3618_v12 = vld [vmem:[%s5400_s1 + $0x38] sm:$0xff]  ;;  %v431_v19 = vadd.f32 %v369_v13, %v266_v48  ;;  %v142_v21 = vmax.f32 %v78_v8, %v126_v9  ;;  %v80_v25 = vmax.f32 %v3593_v2, %v3598_v3 }
  0x15   :  { %203 = vst.msk [vmem:[#allocation2 + $0x130] sm:$0xff] %vm163_vm0, %v3298_v6  ;;  %206 = vst.msk [vmem:[#allocation2 + $0x11] sm:$0xff] %vm163_vm0, %v138_v28  ;;  %v3608_v10 = vld [vmem:[%s5402_s3 + $0x30] sm:$0xff]  ;;  %v3624_v17 = vld [vmem:[%s5401_s2 + $0x38] sm:$0xff]  ;;  %v518_v20 = vsel %vm515_vm3, %v516_v0, %v517_v5  ;;  %v143_v28 = vmax.f32 %v79_v15, %v127_v16  ;;  %v81_v30 = vmax.f32 %v3613_v11, %v3618_v12 }
  0x16   :  { %207 = vst.msk [vmem:[#allocation2 + $0x21] sm:$0xff] %vm163_vm0, %v139_v29  ;;  %v3629_v18 = vld [vmem:[%s5402_s3 + $0x38] sm:$0xff]  ;;  %208 = vst.msk [vmem:[#allocation2 + $0x31] sm:$0xff] %vm163_vm0, %v140_v7  ;;  %v128_v29 = vmax.f32 %v3603_v4, %v3608_v10  ;;  %v580_v39 = vadd.f32 %v518_v20, %v431_v19 }
  0x17   :  { %209 = vst.msk [vmem:[#allocation2 + $0x41] sm:$0xff] %vm163_vm0, %v141_v14  ;;  %v129_v31 = vmax.f32 %v3624_v17, %v3629_v18  ;;  %210 = vst.msk [vmem:[#allocation2 + $0x51] sm:$0xff] %vm163_vm0, %v142_v21 }
  0x18   :  { %211 = vst.msk [vmem:[#allocation2 + $0x61] sm:$0xff] %vm163_vm0, %v143_v28 }
  0x1c   :  { %v224_v26 = vld [vmem:[#allocation2 + $0x10] sm:$0xff]  ;;  %v225_v27 = vld [vmem:[#allocation2 + $0x18] sm:$0x3] }
  0x1d   :  { %v3642_v32 = vld [vmem:[#allocation2 + $0x28] sm:$0x3]  ;;  %v305_v33 = vmul.f32 %v3530_v35, %v225_v27  ;;  %v454_v38 = vmul.f32 %v3533_v36, %v225_v27  ;;  %v600_v40 = vmul.f32 %v3536_v37, %v224_v26  ;;  %v636_v42 = vmul.f32 %v3550_v43, %v224_v26  ;;  %v226_v53 = vld [vmem:[#allocation2 + $0x20] sm:$0xff] }
  0x1e   :  { %v3650_v41 = vmul.f32 %v3530_v35, %v3642_v32  ;;  %v637_v47 = vmul.f32 %v3550_v43, %v225_v27  ;;  %v784_v48 = vmul.f32 %v3553_v44, %v224_v26  ;;  %v785_v52 = vmul.f32 %v3553_v44, %v225_v27 }
  0x1f   :  { %v371_v49 = vrot.slane %v305_v33, 1  ;;  %v520_v50 = vrot.slane %v454_v38, 2  ;;  %v616_v51 = vadd.f32 %v600_v40, %v580_v39  ;;  %v700_v55 = vrot.slane %v636_v42, 1 }
  0x20   :  { %v374_v54 = vrot.slane %v3650_v41, 1  ;;  %v701_v57 = vrot.slane %v637_v47, 1  ;;  %v848_v58 = vrot.slane %v784_v48, 2  ;;  %v849_v59 = vrot.slane %v785_v52, 2  ;;  %v3676_v47 = vld [vmem:[#allocation2 + $0x30] sm:$0xff] }
  0x21   :  { %v932_v60 = vmul.f32 %v3556_v45, %v226_v53  ;;  %v968_v61 = vmul.f32 %v3559_v46, %v226_v53  ;;  %v969_v62 = vmul.f32 %v3559_v46, %v3642_v32  ;;  %v1116_v0 = vmul.f32 %v3579_v56, %v226_v53 }
  0x22   :  { %v702_v63 = vsel %vm366_vm2, %v700_v55, %v701_v57  ;;  %v1117_v1 = vmul.f32 %v3579_v56, %v3642_v32  ;;  %v267_v5 = vmul.f32 %v3527_v34, %v224_v26  ;;  %v850_v8 = vsel %vm515_vm3, %v848_v58, %v849_v59 }
  0x23   :  { %v764_v7 = vadd.f32 %v702_v63, %v616_v51  ;;  %v1032_v9 = vrot.slane %v968_v61, 1  ;;  %v1033_v13 = vrot.slane %v969_v62, 1  ;;  %v1180_v14 = vrot.slane %v1116_v0, 2  ;;  %v3685_v61 = vld [vmem:[#allocation2 + $0x38] sm:$0x3] }
  0x24   :  { %v1181_v15 = vrot.slane %v1117_v1, 2  ;;  %v304_v16 = vmul.f32 %v3530_v35, %v224_v26  ;;  %v453_v19 = vmul.f32 %v3533_v36, %v224_v26  ;;  %v601_v27 = vmul.f32 %v3536_v37, %v226_v53 }
  0x25   :  { %v912_v20 = vadd.f32 %v850_v8, %v764_v7  ;;  %v1034_v21 = vsel %vm366_vm2, %v1032_v9, %v1033_v13  ;;  %v638_v28 = vmul.f32 %v3550_v43, %v226_v53  ;;  %v639_v40 = vmul.f32 %v3550_v43, %v3642_v32 }
  0x26   :  { %v1182_v33 = vsel %vm515_vm3, %v1180_v14, %v1181_v15  ;;  %v370_v38 = vrot.slane %v304_v16, 1  ;;  %v519_v39 = vrot.slane %v453_v19, 2  ;;  %v786_v26 = vmul.f32 %v3553_v44, %v226_v53 }
  0x27   :  { %v948_v42 = vadd.f32 %v932_v60, %v912_v20  ;;  %v703_v48 = vrot.slane %v638_v28, 1  ;;  %v787_v51 = vmul.f32 %v3553_v44, %v3642_v32  ;;  %v704_v57 = vrot.slane %v639_v40, 1 }
  0x28   :  { %v372_v52 = vsel %vm366_vm2, %v370_v38, %v371_v49  ;;  %v521_v55 = vsel %vm515_vm3, %v519_v39, %v520_v50  ;;  %v933_v58 = vmul.f32 %v3556_v45, %v3676_v47  ;;  %v851_v62 = vrot.slane %v786_v26, 2 }
  0x29   :  { %v1096_v59 = vadd.f32 %v1034_v21, %v948_v42  ;;  %v432_v60 = vadd.f32 %v372_v52, %v267_v5  ;;  %v852_v63 = vrot.slane %v787_v51, 2  ;;  %v705_v0 = vsel %vm366_vm2, %v703_v48, %v704_v57 }
  0x2a   :  { %v970_v1 = vmul.f32 %v3559_v46, %v3676_v47  ;;  %v971_v49 = vmul.f32 %v3559_v46, %v3685_v61  ;;  %v1118_v50 = vmul.f32 %v3579_v56, %v3676_v47  ;;  %v1119_v5 = vmul.f32 %v3579_v56, %v3685_v61 }
  0x2b   :  { %v1244_v7 = vadd.f32 %v1182_v33, %v1096_v59  ;;  %v581_v8 = vadd.f32 %v521_v55, %v432_v60  ;;  %v853_v9 = vsel %vm515_vm3, %v851_v62, %v852_v63 }
  0x2c   :  { %17 = vsyncpa [#allocation5], 0  ;;  %v1035_v13 = vrot.slane %v970_v1, 1  ;;  %v1036_v14 = vrot.slane %v971_v49, 1  ;;  %v1183_v15 = vrot.slane %v1118_v50, 2  ;;  %v268_v16 = vmul.f32 %v3527_v34, %v226_v53  ;;  %v3709_v51 = vld [vmem:[#allocation2 + $0x40] sm:$0xff] }
  0x2d   :  { %3188 = vmatprep.mubr.msk.f32.mxu0 %vm163_vm0, %v1244_v7  ;;  %v617_v19 = vadd.f32 %v601_v27, %v581_v8  ;;  %v1184_v20 = vrot.slane %v1119_v5, 2  ;;  %v306_v21 = vmul.f32 %v3530_v35, %v226_v53  ;;  %v455_v28 = vmul.f32 %v3533_v36, %v226_v53  ;;  %v3722_v63 = vld [vmem:[#allocation2 + $0x48] sm:$0x3] }
  0x2e   :  { %v1037_v33 = vsel %vm366_vm2, %v1035_v13, %v1036_v14  ;;  %v456_v38 = vmul.f32 %v3533_v36, %v3642_v32  ;;  %v602_v39 = vmul.f32 %v3536_v37, %v3676_v47  ;;  %v640_v40 = vmul.f32 %v3550_v43, %v3676_v47 }
  0x2f   :  { %v765_v42 = vadd.f32 %v705_v0, %v617_v19  ;;  %v1185_v48 = vsel %vm515_vm3, %v1183_v15, %v1184_v20  ;;  %v373_v27 = vrot.slane %v306_v21, 1  ;;  %v522_v26 = vrot.slane %v455_v28, 2 }
  0x30   :  { %v523_v52 = vrot.slane %v456_v38, 2  ;;  %v641_v53 = vmul.f32 %v3550_v43, %v3685_v61  ;;  %v706_v55 = vrot.slane %v640_v40, 1  ;;  %v788_v32 = vmul.f32 %v3553_v44, %v3676_v47 }
  0x31   :  { %v913_v57 = vadd.f32 %v853_v9, %v765_v42  ;;  %v375_v59 = vsel %vm366_vm2, %v373_v27, %v374_v54  ;;  %v789_v60 = vmul.f32 %v3553_v44, %v3685_v61  ;;  %v934_v62 = vmul.f32 %v3556_v45, %v3709_v51 }
  0x32   :  { %v433_v0 = vadd.f32 %v375_v59, %v268_v16  ;;  %v524_v1 = vsel %vm515_vm3, %v522_v26, %v523_v52  ;;  %v707_v49 = vrot.slane %v641_v53, 1  ;;  %v854_v50 = vrot.slane %v788_v32, 2 }
  0x33   :  { %v949_v7 = vadd.f32 %v933_v58, %v913_v57  ;;  %v855_v8 = vrot.slane %v789_v60, 2  ;;  %v972_v41 = vmul.f32 %v3559_v46, %v3709_v51  ;;  %v973_v54 = vmul.f32 %v3559_v46, %v3722_v63 }
  0x34   :  { %v582_v9 = vadd.f32 %v524_v1, %v433_v0  ;;  %v708_v5 = vsel %vm366_vm2, %v706_v55, %v707_v49  ;;  %v1120_v13 = vmul.f32 %v3579_v56, %v3709_v51  ;;  %v1121_v14 = vmul.f32 %v3579_v56, %v3722_v63 }
  0x35   :  { %v1097_v15 = vadd.f32 %v1037_v33, %v949_v7  ;;  %v856_v16 = vsel %vm515_vm3, %v854_v50, %v855_v8  ;;  %v1038_v58 = vrot.slane %v972_v41, 1  ;;  %v1039_v19 = vrot.slane %v973_v54, 1  ;;  %v3759_v8 = vld [vmem:[#allocation2 + $0x50] sm:$0xff] }
  0x36   :  { %v618_v20 = vadd.f32 %v602_v39, %v582_v9  ;;  %v1186_v21 = vrot.slane %v1120_v13, 2  ;;  %v1187_v28 = vrot.slane %v1121_v14, 2  ;;  %v269_v38 = vmul.f32 %v3527_v34, %v3676_v47 }
  0x37   :  { %v1245_v40 = vadd.f32 %v1185_v48, %v1097_v15  ;;  %v1040_v42 = vsel %vm366_vm2, %v1038_v58, %v1039_v19  ;;  %v308_v27 = vmul.f32 %v3530_v35, %v3676_v47  ;;  %v309_v26 = vmul.f32 %v3530_v35, %v3685_v61 }
  0x38   :  { %v766_v33 = vadd.f32 %v708_v5, %v618_v20  ;;  %v1188_v52 = vsel %vm515_vm3, %v1186_v21, %v1187_v28  ;;  %v457_v39 = vmul.f32 %v3533_v36, %v3676_v47  ;;  %v458_v53 = vmul.f32 %v3533_v36, %v3685_v61  ;;  %v3762_v5 = vld [vmem:[#allocation2 + $0x58] sm:$0x3] }
  0x39   :  { %3189 = vmatmul.mubr.msk.f32.vlgmr.msra.gmra.mxu0 %vm163_vm0, %v1245_v40  ;;  %v376_v48 = vrot.slane %v308_v27, 1  ;;  %v377_v55 = vrot.slane %v309_v26, 1  ;;  %v603_v32 = vmul.f32 %v3536_v37, %v3709_v51  ;;  %v642_v57 = vmul.f32 %v3550_v43, %v3709_v51 }
  0x3a   :  { %v914_v59 = vadd.f32 %v856_v16, %v766_v33  ;;  %v525_v60 = vrot.slane %v457_v39, 2  ;;  %v526_v0 = vrot.slane %v458_v53, 2  ;;  %v643_v1 = vmul.f32 %v3550_v43, %v3722_v63 }
  0x3b   :  { %v378_v47 = vsel %vm366_vm2, %v376_v48, %v377_v55  ;;  %v709_v49 = vrot.slane %v642_v57, 1  ;;  %v790_v61 = vmul.f32 %v3553_v44, %v3709_v51  ;;  %v791_v50 = vmul.f32 %v3553_v44, %v3722_v63 }
  0x3c   :  { %v950_v7 = vadd.f32 %v934_v62, %v914_v59  ;;  %v434_v41 = vadd.f32 %v378_v47, %v269_v38  ;;  %v527_v54 = vsel %vm515_vm3, %v525_v60, %v526_v0  ;;  %v710_v9 = vrot.slane %v643_v1, 1 }
  0x3d   :  { %v857_v13 = vrot.slane %v790_v61, 2  ;;  %v858_v14 = vrot.slane %v791_v50, 2  ;;  %v935_v15 = vmul.f32 %v3556_v45, %v3759_v8  ;;  %v974_v16 = vmul.f32 %v3559_v46, %v3759_v8 }
  0x3e   :  { %v1098_v58 = vadd.f32 %v1040_v42, %v950_v7  ;;  %v583_v19 = vadd.f32 %v527_v54, %v434_v41  ;;  %v711_v62 = vsel %vm366_vm2, %v709_v49, %v710_v9  ;;  %v975_v20 = vmul.f32 %v3559_v46, %v3762_v5 }
  0x3f   :  { %v859_v21 = vsel %vm515_vm3, %v857_v13, %v858_v14  ;;  %v1041_v28 = vrot.slane %v974_v16, 1  ;;  %v1122_v38 = vmul.f32 %v3579_v56, %v3759_v8  ;;  %v1123_v40 = vmul.f32 %v3579_v56, %v3762_v5  ;;  %v3800_v13 = vld [vmem:[#allocation2 + $0x60] sm:$0xff] }
  0x40   :  { %v1246_v27 = vadd.f32 %v1188_v52, %v1098_v58  ;;  %v619_v26 = vadd.f32 %v603_v32, %v583_v19  ;;  %v1042_v33 = vrot.slane %v975_v20, 1  ;;  %v270_v42 = vmul.f32 %v3527_v34, %v3709_v51  ;;  %v235_v19 = vld [vmem:[#allocation2 + $0x68] sm:$0x3] }
  0x41   :  { %v1189_v39 = vrot.slane %v1122_v38, 2  ;;  %v1190_v53 = vrot.slane %v1123_v40, 2  ;;  %v310_v48 = vmul.f32 %v3530_v35, %v3709_v51  ;;  %v311_v55 = vmul.f32 %v3530_v35, %v3722_v63 }
  0x42   :  { %3191 = vmatprep.mubr.msk.f32.mxu0 %vm163_vm0, %v1246_v27  ;;  %v767_v57 = vadd.f32 %v711_v62, %v619_v26  ;;  %v1043_v59 = vsel %vm366_vm2, %v1041_v28, %v1042_v33  ;;  %v459_v52 = vmul.f32 %v3533_v36, %v3709_v51  ;;  %v460_v32 = vmul.f32 %v3533_v36, %v3722_v63 }
  0x43   :  { %v1191_v60 = vsel %vm515_vm3, %v1189_v39, %v1190_v53  ;;  %v379_v0 = vrot.slane %v310_v48, 1  ;;  %v380_v1 = vrot.slane %v311_v55, 1  ;;  %v604_v47 = vmul.f32 %v3536_v37, %v3759_v8 }
  0x44   :  { %v915_v49 = vadd.f32 %v859_v21, %v767_v57  ;;  %v528_v61 = vrot.slane %v459_v52, 2  ;;  %v529_v50 = vrot.slane %v460_v32, 2  ;;  %v644_v7 = vmul.f32 %v3550_v43, %v3759_v8 }
  0x45   :  { %v381_v41 = vsel %vm366_vm2, %v379_v0, %v380_v1  ;;  %v645_v51 = vmul.f32 %v3550_v43, %v3762_v5  ;;  %v792_v63 = vmul.f32 %v3553_v44, %v3759_v8  ;;  %v793_v54 = vmul.f32 %v3553_v44, %v3762_v5 }
  0x46   :  { %v951_v9 = vadd.f32 %v935_v15, %v915_v49  ;;  %v435_v14 = vadd.f32 %v381_v41, %v270_v42  ;;  %v530_v16 = vsel %vm515_vm3, %v528_v61, %v529_v50  ;;  %v712_v58 = vrot.slane %v644_v7, 1 }
  0x47   :  { %v713_v62 = vrot.slane %v645_v51, 1  ;;  %v860_v20 = vrot.slane %v792_v63, 2  ;;  %v861_v21 = vrot.slane %v793_v54, 2  ;;  %v936_v28 = vmul.f32 %v3556_v45, %v3800_v13 }
  0x48   :  { %v1099_v38 = vadd.f32 %v1043_v59, %v951_v9  ;;  %v584_v40 = vadd.f32 %v530_v16, %v435_v14  ;;  %v976_v27 = vmul.f32 %v3559_v46, %v3800_v13  ;;  %v977_v15 = vmul.f32 %v3559_v46, %v235_v19 }
  0x49   :  { %v714_v26 = vsel %vm366_vm2, %v712_v58, %v713_v62  ;;  %v862_v33 = vsel %vm515_vm3, %v860_v20, %v861_v21  ;;  %v1124_v42 = vmul.f32 %v3579_v56, %v3800_v13  ;;  %v1125_v39 = vmul.f32 %v3579_v56, %v235_v19 }
  0x4a   :  { %v1247_v53 = vadd.f32 %v1191_v60, %v1099_v38  ;;  %v620_v48 = vadd.f32 %v604_v47, %v584_v40  ;;  %v1044_v55 = vrot.slane %v976_v27, 1  ;;  %v1045_v57 = vrot.slane %v977_v15, 1 }
  0x4b   :  { %v1192_v59 = vrot.slane %v1124_v42, 2  ;;  %v1193_v52 = vrot.slane %v1125_v39, 2  ;;  %v144_v32 = vmax.f32 %v80_v25, %v128_v29  ;;  %v271_v0 = vmul.f32 %v3527_v34, %v3759_v8 }
  0x4c   :  { %3192 = vmatmul.mubr.msk.f32.gmra.mxu0 %vm163_vm0, %v1247_v53  ;;  %v768_v1 = vadd.f32 %v714_v26, %v620_v48  ;;  %v1046_v60 = vsel %vm366_vm2, %v1044_v55, %v1045_v57  ;;  %v312_v47 = vmul.f32 %v3530_v35, %v3759_v8  ;;  %v313_v49 = vmul.f32 %v3530_v35, %v3762_v5 }
  0x4d   :  { %v1194_v4 = vsel %vm515_vm3, %v1192_v59, %v1193_v52  ;;  %212 = vst.msk [vmem:[#allocation2 + $0x71] sm:$0xff] %vm163_vm0, %v144_v32  ;;  %v461_v2 = vmul.f32 %v3533_v36, %v3759_v8  ;;  %v462_v3 = vmul.f32 %v3533_v36, %v3762_v5  ;;  %v605_v10 = vmul.f32 %v3536_v37, %v3800_v13 }
  0x4e   :  { %v916_v25 = vadd.f32 %v862_v33, %v768_v1  ;;  %v382_v29 = vrot.slane %v312_v47, 1  ;;  %v383_v61 = vrot.slane %v313_v49, 1  ;;  %v646_v50 = vmul.f32 %v3550_v43, %v3800_v13 }
  0x4f   :  { %v531_v7 = vrot.slane %v461_v2, 2  ;;  %v532_v41 = vrot.slane %v462_v3, 2  ;;  %v647_v51 = vmul.f32 %v3550_v43, %v235_v19  ;;  %v794_v63 = vmul.f32 %v3553_v44, %v3800_v13 }
  0x50   :  { %v952_v8 = vadd.f32 %v936_v28, %v916_v25  ;;  %v384_v54 = vsel %vm366_vm2, %v382_v29, %v383_v61  ;;  %v715_v5 = vrot.slane %v646_v50, 1  ;;  %v795_v9 = vmul.f32 %v3553_v44, %v235_v19 }
  0x51   :  { %v436_v14 = vadd.f32 %v384_v54, %v271_v0  ;;  %v533_v16 = vsel %vm515_vm3, %v531_v7, %v532_v41  ;;  %v716_v58 = vrot.slane %v647_v51, 1  ;;  %v863_v62 = vrot.slane %v794_v63, 2 }
  0x52   :  { %v1100_v20 = vadd.f32 %v1046_v60, %v952_v8  ;;  %v864_v21 = vrot.slane %v795_v9, 2  ;;  %v145_v38 = vmax.f32 %v81_v30, %v129_v31  ;;  %v272_v28 = vmul.f32 %v3527_v34, %v3800_v13 }
  0x53   :  { %v585_v40 = vadd.f32 %v533_v16, %v436_v14  ;;  %v717_v27 = vsel %vm366_vm2, %v715_v5, %v716_v58  ;;  %v314_v15 = vmul.f32 %v3530_v35, %v3800_v13  ;;  %v315_v26 = vmul.f32 %v3530_v35, %v235_v19 }
  0x54   :  { %v1248_v33 = vadd.f32 %v1194_v4, %v1100_v20  ;;  %v236_v42 = vld [vmem:[#allocation2 + $0x70] sm:$0xff]  ;;  %v3855_v39 = vld [vmem:[#allocation2 + $0x78] sm:$0x3]  ;;  %v865_v17 = vsel %vm515_vm3, %v863_v62, %v864_v21  ;;  %213 = vst.msk [vmem:[#allocation2 + $0x81] sm:$0xff] %vm163_vm0, %v145_v38  ;;  %v463_v11 = vmul.f32 %v3533_v36, %v3800_v13  ;;  %v464_v12 = vmul.f32 %v3533_v36, %v235_v19 }
  0x55   :  { %v621_v18 = vadd.f32 %v605_v10, %v585_v40  ;;  %v937_v30 = vmul.f32 %v3556_v45, %v236_v42  ;;  %v978_v31 = vmul.f32 %v3559_v46, %v236_v42  ;;  %v979_v53 = vmul.f32 %v3559_v46, %v3855_v39 }
  0x56   :  { %3194 = vmatprep.mubr.msk.f32.mxu0 %vm163_vm0, %v1248_v33  ;;  %v1126_v48 = vmul.f32 %v3579_v56, %v236_v42  ;;  %v1127_v55 = vmul.f32 %v3579_v56, %v3855_v39  ;;  %v385_v57 = vrot.slane %v314_v15, 1  ;;  %v386_v59 = vrot.slane %v315_v26, 1 }
  0x57   :  { %v769_v13 = vadd.f32 %v717_v27, %v621_v18  ;;  %v1047_v52 = vrot.slane %v978_v31, 1  ;;  %v1048_v19 = vrot.slane %v979_v53, 1  ;;  %v534_v32 = vrot.slane %v463_v11, 2 }
  0x58   :  { %v1195_v0 = vrot.slane %v1126_v48, 2  ;;  %v1196_v1 = vrot.slane %v1127_v55, 2  ;;  %v387_v60 = vsel %vm366_vm2, %v385_v57, %v386_v59  ;;  %v535_v47 = vrot.slane %v464_v12, 2  ;;  %v240_v57 = vld [vmem:[#allocation2 + $0x90] sm:$0xff] }
  0x59   :  { %v917_v49 = vadd.f32 %v865_v17, %v769_v13  ;;  %v1049_v4 = vsel %vm366_vm2, %v1047_v52, %v1048_v19  ;;  %v437_v2 = vadd.f32 %v387_v60, %v272_v28  ;;  %v606_v3 = vmul.f32 %v3536_v37, %v236_v42 }
  0x5a   :  { %v1197_v10 = vsel %vm515_vm3, %v1195_v0, %v1196_v1  ;;  %v536_v25 = vsel %vm515_vm3, %v534_v32, %v535_v47  ;;  %v648_v29 = vmul.f32 %v3550_v43, %v236_v42  ;;  %v649_v61 = vmul.f32 %v3550_v43, %v3855_v39 }
  0x5b   :  { %v953_v50 = vadd.f32 %v937_v30, %v917_v49  ;;  %v238_v7 = vld [vmem:[#allocation2 + $0x80] sm:$0xff]  ;;  %v586_v41 = vadd.f32 %v536_v25, %v437_v2  ;;  %v796_v51 = vmul.f32 %v3553_v44, %v236_v42  ;;  %v797_v63 = vmul.f32 %v3553_v44, %v3855_v39  ;;  %v239_v16 = vld [vmem:[#allocation2 + $0x88] sm:$0x3]  ;;  %v241_v2 = vld [vmem:[#allocation2 + $0x98] sm:$0x3] }
  0x5c   :  { %v718_v8 = vrot.slane %v648_v29, 1  ;;  %v719_v54 = vrot.slane %v649_v61, 1  ;;  %v938_v5 = vmul.f32 %v3556_v45, %v238_v7  ;;  %v980_v9 = vmul.f32 %v3559_v46, %v238_v7 }
  0x5d   :  { %v1101_v14 = vadd.f32 %v1049_v4, %v953_v50  ;;  %v622_v58 = vadd.f32 %v606_v3, %v586_v41  ;;  %v866_v62 = vrot.slane %v796_v51, 2  ;;  %v867_v20 = vrot.slane %v797_v63, 2  ;;  %v50_v41 = vld [vmem:[%s5399_s0 + $0x40] sm:$0xff] }
  0x5e   :  { %v720_v21 = vsel %vm366_vm2, %v718_v8, %v719_v54  ;;  %v981_v38 = vmul.f32 %v3559_v46, %v239_v16  ;;  %v1050_v28 = vrot.slane %v980_v9, 1  ;;  %v1128_v40 = vmul.f32 %v3579_v56, %v238_v7  ;;  %v67_v9 = vld [vmem:[%s5400_s1 + $0x48] sm:$0xff] }
  0x5f   :  { %v1249_v27 = vadd.f32 %v1197_v10, %v1101_v14  ;;  %v770_v15 = vadd.f32 %v720_v21, %v622_v58  ;;  %v868_v26 = vsel %vm515_vm3, %v866_v62, %v867_v20  ;;  %v1129_v33 = vmul.f32 %v3579_v56, %v239_v16  ;;  %v98_v14 = vld [vmem:[%s5401_s2 + $0x40] sm:$0xff]  ;;  %v99_v21 = vld [vmem:[%s5401_s2 + $0x48] sm:$0xff] }
  0x60   :  { %v1051_v17 = vrot.slane %v981_v38, 1  ;;  %v1198_v11 = vrot.slane %v1128_v40, 2  ;;  %v273_v12 = vmul.f32 %v3527_v34, %v236_v42  ;;  %v316_v18 = vmul.f32 %v3530_v35, %v236_v42  ;;  %v114_v38 = vld [vmem:[%s5402_s3 + $0x40] sm:$0xff] }
  0x61   :  { %3195 = vmatmul.mubr.msk.f32.gmra.mxu0 %vm163_vm0, %v1249_v27  ;;  %v918_v30 = vadd.f32 %v868_v26, %v770_v15  ;;  %v1199_v31 = vrot.slane %v1129_v33, 2  ;;  %v317_v53 = vmul.f32 %v3530_v35, %v3855_v39  ;;  %v465_v48 = vmul.f32 %v3533_v36, %v236_v42  ;;  %v242_v33 = vld [vmem:[#allocation2 + $0xa0] sm:$0xff] }
  0x62   :  { %v1052_v55 = vsel %vm366_vm2, %v1050_v28, %v1051_v17  ;;  %v388_v59 = vrot.slane %v316_v18, 1  ;;  %v466_v13 = vmul.f32 %v3533_v36, %v3855_v39  ;;  %v607_v52 = vmul.f32 %v3536_v37, %v238_v7  ;;  %v115_v28 = vld [vmem:[%s5402_s3 + $0x48] sm:$0xff] }
  0x63   :  { %v954_v19 = vadd.f32 %v938_v5, %v918_v30  ;;  %v1200_v32 = vsel %vm515_vm3, %v1198_v11, %v1199_v31  ;;  %v389_v0 = vrot.slane %v317_v53, 1  ;;  %v537_v1 = vrot.slane %v465_v48, 2  ;;  %v51_v5 = vld [vmem:[%s5399_s0 + $0x48] sm:$0xff]  ;;  %v52_v31 = vld [vmem:[%s5399_s0 + $0x50] sm:$0xff] }
  0x64   :  { %v538_v60 = vrot.slane %v466_v13, 2  ;;  %v650_v47 = vmul.f32 %v3550_v43, %v238_v7  ;;  %v651_v49 = vmul.f32 %v3550_v43, %v239_v16  ;;  %v798_v42 = vmul.f32 %v3553_v44, %v238_v7  ;;  %v66_v7 = vld [vmem:[%s5400_s1 + $0x40] sm:$0xff]  ;;  %v243_v17 = vld [vmem:[#allocation2 + $0xa8] sm:$0x3]  ;;  %v68_v53 = vld [vmem:[%s5400_s1 + $0x50] sm:$0xff] }
  0x65   :  { %v1102_v4 = vadd.f32 %v1052_v55, %v954_v19  ;;  %v390_v3 = vsel %vm366_vm2, %v388_v59, %v389_v0  ;;  %v799_v39 = vmul.f32 %v3553_v44, %v239_v16  ;;  %v3905_v10 = vmul.f32 %v3556_v45, %v240_v57  ;;  %v100_v48 = vld [vmem:[%s5401_s2 + $0x50] sm:$0xff]  ;;  %v53_v19 = vld [vmem:[%s5399_s0 + $0x58] sm:$0xff] }
  0x66   :  { %v438_v25 = vadd.f32 %v390_v3, %v273_v12  ;;  %v539_v29 = vsel %vm515_vm3, %v537_v1, %v538_v60  ;;  %v721_v61 = vrot.slane %v650_v47, 1  ;;  %v722_v50 = vrot.slane %v651_v49, 1  ;;  %v101_v49 = vld [vmem:[%s5401_s2 + $0x58] sm:$0xff] }
  0x67   :  { %v1250_v51 = vadd.f32 %v1200_v32, %v1102_v4  ;;  %v869_v63 = vrot.slane %v798_v42, 2  ;;  %v870_v8 = vrot.slane %v799_v39, 2  ;;  %v982_v54 = vmul.f32 %v3559_v46, %v240_v57  ;;  %v69_v32 = vld [vmem:[%s5400_s1 + $0x58] sm:$0xff]  ;;  %v54_v4 = vld [vmem:[%s5399_s0 + $0x60] sm:$0xff] }
  0x68   :  { %v587_v16 = vadd.f32 %v539_v29, %v438_v25  ;;  %v723_v58 = vsel %vm366_vm2, %v721_v61, %v722_v50  ;;  %v983_v62 = vmul.f32 %v3559_v46, %v241_v2  ;;  %v1130_v20 = vmul.f32 %v3579_v56, %v240_v57  ;;  %v117_v42 = vld [vmem:[%s5402_s3 + $0x58] sm:$0xff]  ;;  %v70_v29 = vld [vmem:[%s5400_s1 + $0x60] sm:$0xff] }
  0x69   :  { %3197 = vmatprep.mubr.msk.f32.mxu0 %vm163_vm0, %v1250_v51  ;;  %v871_v40 = vsel %vm515_vm3, %v869_v63, %v870_v8  ;;  %v1053_v27 = vrot.slane %v982_v54, 1  ;;  %v1131_v15 = vmul.f32 %v3579_v56, %v241_v2  ;;  %v82_v26 = vmax.f32 %v50_v41, %v66_v7  ;;  %v102_v61 = vld [vmem:[%s5401_s2 + $0x60] sm:$0xff]  ;;  %v55_v8 = vld [vmem:[%s5399_s0 + $0x68] sm:$0xff] }
  0x6a   :  { %v623_v11 = vadd.f32 %v607_v52, %v587_v16  ;;  %v1054_v12 = vrot.slane %v983_v62, 1  ;;  %v1201_v18 = vrot.slane %v1130_v20, 2  ;;  %v83_v30 = vmax.f32 %v51_v5, %v67_v9  ;;  %v116_v52 = vld [vmem:[%s5402_s3 + $0x50] sm:$0xff]  ;;  %v118_v50 = vld [vmem:[%s5402_s3 + $0x60] sm:$0xff]  ;;  %v71_v54 = vld [vmem:[%s5400_s1 + $0x68] sm:$0xff] }
  0x6b   :  { %v1202_v55 = vrot.slane %v1131_v15, 2  ;;  %v130_v57 = vmax.f32 %v98_v14, %v114_v38  ;;  %v131_v59 = vmax.f32 %v99_v21, %v115_v28  ;;  %v274_v13 = vmul.f32 %v3527_v34, %v242_v33  ;;  %v103_v5 = vld [vmem:[%s5401_s2 + $0x68] sm:$0xff]  ;;  %v56_v20 = vld [vmem:[%s5399_s0 + $0x70] sm:$0xff] }
  0x6c   :  { %v771_v0 = vadd.f32 %v723_v58, %v623_v11  ;;  %v1055_v1 = vsel %vm366_vm2, %v1053_v27, %v1054_v12  ;;  %v318_v60 = vmul.f32 %v3530_v35, %v242_v33  ;;  %v319_v47 = vmul.f32 %v3530_v35, %v243_v17  ;;  %v119_v62 = vld [vmem:[%s5402_s3 + $0x68] sm:$0xff]  ;;  %v72_v21 = vld [vmem:[%s5400_s1 + $0x70] sm:$0xff] }
  0x6d   :  { %v1203_v2 = vsel %vm515_vm3, %v1201_v18, %v1202_v55  ;;  %v146_v3 = vmax.f32 %v82_v26, %v130_v57  ;;  %v147_v39 = vmax.f32 %v83_v30, %v131_v59  ;;  %v467_v25 = vmul.f32 %v3533_v36, %v242_v33  ;;  %v104_v15 = vld [vmem:[%s5401_s2 + $0x70] sm:$0xff]  ;;  %v57_v33 = vld [vmem:[%s5399_s0 + $0x78] sm:$0xff] }
  0x6e   :  { %v919_v41 = vadd.f32 %v871_v40, %v771_v0  ;;  %v391_v7 = vrot.slane %v318_v60, 1  ;;  %v392_v51 = vrot.slane %v319_v47, 1  ;;  %v468_v63 = vmul.f32 %v3533_v36, %v243_v17  ;;  %v120_v26 = vld [vmem:[%s5402_s3 + $0x70] sm:$0xff]  ;;  %v73_v18 = vld [vmem:[%s5400_s1 + $0x78] sm:$0xff] }
  0x6f   :  { %214 = vst.msk [vmem:[#allocation2 + $0xb1] sm:$0xff] %vm163_vm0, %v146_v3  ;;  %215 = vst.msk [vmem:[#allocation2 + $0xc1] sm:$0xff] %vm163_vm0, %v147_v39  ;;  %v540_v9 = vrot.slane %v467_v25, 2  ;;  %v84_v14 = vmax.f32 %v52_v31, %v68_v53  ;;  %v132_v16 = vmax.f32 %v100_v48, %v116_v52  ;;  %v85_v58 = vmax.f32 %v53_v19, %v69_v32  ;;  %v105_v30 = vld [vmem:[%s5401_s2 + $0x78] sm:$0xff] }
  0x70   :  { %v955_v38 = vadd.f32 %v3905_v10, %v919_v41  ;;  %v393_v28 = vsel %vm366_vm2, %v391_v7, %v392_v51  ;;  %v541_v40 = vrot.slane %v468_v63, 2  ;;  %v133_v27 = vmax.f32 %v101_v49, %v117_v42  ;;  %v121_v31 = vld [vmem:[%s5402_s3 + $0x78] sm:$0xff] }
  0x71   :  { %v439_v17 = vadd.f32 %v393_v28, %v274_v13  ;;  %v148_v11 = vmax.f32 %v84_v14, %v132_v16  ;;  %v86_v12 = vmax.f32 %v54_v4, %v70_v29  ;;  %v134_v10 = vmax.f32 %v102_v61, %v118_v50 }
  0x72   :  { %v1103_v53 = vadd.f32 %v1055_v1, %v955_v38  ;;  %v542_v48 = vsel %vm515_vm3, %v540_v9, %v541_v40  ;;  %v149_v55 = vmax.f32 %v85_v58, %v133_v27  ;;  %v87_v57 = vmax.f32 %v55_v8, %v71_v54 }
  0x73   :  { %216 = vst.msk [vmem:[#allocation2 + $0xd1] sm:$0xff] %vm163_vm0, %v148_v11  ;;  %v150_v59 = vmax.f32 %v86_v12, %v134_v10  ;;  %v135_v13 = vmax.f32 %v103_v5, %v119_v62  ;;  %v88_v52 = vmax.f32 %v56_v20, %v72_v21  ;;  %v136_v32 = vmax.f32 %v104_v15, %v120_v26 }
  0x74   :  { %v1251_v19 = vadd.f32 %v1203_v2, %v1103_v53  ;;  %217 = vst.msk [vmem:[#allocation2 + $0xe1] sm:$0xff] %vm163_vm0, %v149_v55  ;;  %v89_v0 = vmax.f32 %v57_v33, %v73_v18  ;;  %v137_v60 = vmax.f32 %v105_v30, %v121_v31  ;;  %v588_v47 = vadd.f32 %v542_v48, %v439_v17 }
  0x75   :  { %218 = vst.msk [vmem:[#allocation2 + $0xf1] sm:$0xff] %vm163_vm0, %v150_v59  ;;  %v151_v49 = vmax.f32 %v87_v57, %v135_v13  ;;  %v152_v4 = vmax.f32 %v88_v52, %v136_v32  ;;  %vm1453_vm4 = vcmask 523264   ;;  %vm1627_vm5 = vcmask 517120  }
  0x76   :  { %3198 = vmatmul.mubr.msk.f32.gmra.mxu0 %vm163_vm0, %v1251_v19  ;;  %v244_v1 = vld [vmem:[#allocation2 + $0xb0] sm:$0xff]  ;;  %v245_v42 = vld [vmem:[#allocation2 + $0xb8] sm:$0x3]  ;;  %v153_v3 = vmax.f32 %v89_v0, %v137_v60  ;;  %v4027_v39 = vld [vmem:[#allocation2 + $0xc0] sm:$0xff]  ;;  %1626 = vst.msk [vmem:[#allocation3] sm:$0xff] %vm1453_vm4, %v3298_v6 }
  0x77   :  { %v4029_v25 = vld [vmem:[#allocation2 + $0xc8] sm:$0x3]  ;;  %v608_v2 = vmul.f32 %v3536_v37, %v244_v1  ;;  %v652_v29 = vmul.f32 %v3550_v43, %v244_v1  ;;  %v653_v61 = vmul.f32 %v3550_v43, %v245_v42  ;;  %v800_v50 = vmul.f32 %v3553_v44, %v244_v1  ;;  %219 = vst.msk [vmem:[#allocation2 + $0x101] sm:$0xff] %vm163_vm0, %v151_v49 }
  0x78   :  { %v801_v41 = vmul.f32 %v3553_v44, %v245_v42  ;;  %v984_v7 = vmul.f32 %v3559_v46, %v4027_v39  ;;  %v985_v51 = vmul.f32 %v3559_v46, %v4029_v25  ;;  %220 = vst.msk [vmem:[#allocation2 + $0x111] sm:$0xff] %vm163_vm0, %v152_v4  ;;  %221 = vst.msk [vmem:[#allocation2 + $0x121] sm:$0xff] %vm163_vm0, %v153_v3 }
  0x79   :  { %v624_v63 = vadd.f32 %v608_v2, %v588_v47  ;;  %v724_v8 = vrot.slane %v652_v29, 1  ;;  %v725_v54 = vrot.slane %v653_v61, 1  ;;  %v872_v5 = vrot.slane %v800_v50, 2  ;;  %1629 = vst.msk [vmem:[#allocation3 + $0x10] sm:$0xff] %vm1453_vm4, %v3298_v6  ;;  %1631 = vst.msk [vmem:[#allocation3 + $0x20] sm:$0xff] %vm1453_vm4, %v3298_v6 }
  0x7a   :  { %v873_v9 = vrot.slane %v801_v41, 2  ;;  %v1056_v14 = vrot.slane %v984_v7, 1  ;;  %v1057_v16 = vrot.slane %v985_v51, 1  ;;  %v1132_v58 = vmul.f32 %v3579_v56, %v4027_v39  ;;  %v4069_v49 = vld [vmem:[#allocation2 + $0xd0] sm:$0xff]  ;;  %1633 = vst.msk [vmem:[#allocation3 + $0x30] sm:$0xff] %vm1453_vm4, %v3298_v6  ;;  %1635 = vst.msk [vmem:[#allocation3 + $0x40] sm:$0xff] %vm1453_vm4, %v3298_v6 }
  0x7b   :  { %v726_v62 = vsel %vm366_vm2, %v724_v8, %v725_v54  ;;  %v940_v20 = vmul.f32 %v3556_v45, %v4027_v39  ;;  %v1133_v21 = vmul.f32 %v3579_v56, %v4029_v25  ;;  %v320_v38 = vmul.f32 %v3530_v35, %v244_v1  ;;  %1637 = vst.msk [vmem:[#allocation3 + $0x50] sm:$0xff] %vm1453_vm4, %v3298_v6 }
  0x7c   :  { %v772_v28 = vadd.f32 %v726_v62, %v624_v63  ;;  %v874_v40 = vsel %vm515_vm3, %v872_v5, %v873_v9  ;;  %v1204_v27 = vrot.slane %v1132_v58, 2  ;;  %v275_v15 = vmul.f32 %v3527_v34, %v244_v1  ;;  %1639 = vst.msk [vmem:[#allocation3 + $0x60] sm:$0xff] %vm1453_vm4, %v3298_v6  ;;  %1641 = vst.msk [vmem:[#allocation3 + $0x70] sm:$0xff] %vm1453_vm4, %v3298_v6 }
  0x7d   :  { %v1205_v26 = vrot.slane %v1133_v21, 2  ;;  %v321_v33 = vmul.f32 %v3530_v35, %v245_v42  ;;  %v394_v17 = vrot.slane %v320_v38, 1  ;;  %v469_v11 = vmul.f32 %v3533_v36, %v244_v1  ;;  %v4071_v1 = vld [vmem:[#allocation2 + $0xd8] sm:$0x3]  ;;  %1643 = vst.msk [vmem:[#allocation3 + $0x80] sm:$0xff] %vm1453_vm4, %v3298_v6  ;;  %1645 = vst.msk [vmem:[#allocation3 + $0x90] sm:$0xff] %vm1453_vm4, %v3298_v6 }
  0x7e   :  { %v920_v12 = vadd.f32 %v874_v40, %v772_v28  ;;  %v1058_v10 = vsel %vm366_vm2, %v1056_v14, %v1057_v16  ;;  %v470_v18 = vmul.f32 %v3533_v36, %v245_v42  ;;  %v654_v30 = vmul.f32 %v3550_v43, %v4027_v39  ;;  %1647 = vst.msk [vmem:[#allocation3 + $0xa0] sm:$0xff] %vm1453_vm4, %v3298_v6 }
  0x7f   :  { %v395_v31 = vrot.slane %v321_v33, 1  ;;  %v543_v53 = vrot.slane %v469_v11, 2  ;;  %v609_v48 = vmul.f32 %v3536_v37, %v4027_v39  ;;  %v655_v55 = vmul.f32 %v3550_v43, %v4029_v25  ;;  %1649 = vst.msk [vmem:[#allocation3 + $0xb0] sm:$0xff] %vm1453_vm4, %v3298_v6  ;;  %1651 = vst.msk [vmem:[#allocation3 + $0xc0] sm:$0xff] %vm1453_vm4, %v3298_v6 }
  0x80   :  { %v956_v57 = vadd.f32 %v940_v20, %v920_v12  ;;  %v1206_v59 = vsel %vm515_vm3, %v1204_v27, %v1205_v26  ;;  %v544_v13 = vrot.slane %v470_v18, 2  ;;  %v802_v52 = vmul.f32 %v3553_v44, %v4027_v39  ;;  %1653 = vst.msk [vmem:[#allocation3 + $0xd0] sm:$0xff] %vm1453_vm4, %v3298_v6  ;;  %1655 = vst.msk [vmem:[#allocation3 + $0xe0] sm:$0xff] %vm1453_vm4, %v3298_v6 }
  0x81   :  { %v396_v19 = vsel %vm366_vm2, %v394_v17, %v395_v31  ;;  %v727_v32 = vrot.slane %v654_v30, 1  ;;  %v728_v0 = vrot.slane %v655_v55, 1  ;;  %v803_v60 = vmul.f32 %v3553_v44, %v4029_v25  ;;  %1657 = vst.msk [vmem:[#allocation3 + $0xf0] sm:$0xff] %vm1453_vm4, %v3298_v6  ;;  %1659 = vst.msk [vmem:[#allocation3 + $0x100] sm:$0xff] %vm1453_vm4, %v3298_v6 }
  0x82   :  { %v1104_v47 = vadd.f32 %v1058_v10, %v956_v57  ;;  %v440_v42 = vadd.f32 %v396_v19, %v275_v15  ;;  %v545_v4 = vsel %vm515_vm3, %v543_v53, %v544_v13  ;;  %v875_v3 = vrot.slane %v802_v52, 2  ;;  %v4111_v57 = vld [vmem:[#allocation2 + $0xe0] sm:$0xff]  ;;  %1661 = vst.msk [vmem:[#allocation3 + $0x110] sm:$0xff] %vm1453_vm4, %v3298_v6  ;;  %1663 = vst.msk [vmem:[#allocation3 + $0x120] sm:$0xff] %vm1453_vm4, %v3298_v6 }
  0x83   :  { %v876_v2 = vrot.slane %v803_v60, 2  ;;  %v941_v29 = vmul.f32 %v3556_v45, %v4069_v49  ;;  %v986_v61 = vmul.f32 %v3559_v46, %v4069_v49  ;;  %v987_v50 = vmul.f32 %v3559_v46, %v4071_v1  ;;  %1665 = vst.msk [vmem:[#allocation3 + $0x130] sm:$0xff] %vm1453_vm4, %v3298_v6 }
  0x84   :  { %v1252_v41 = vadd.f32 %v1206_v59, %v1104_v47  ;;  %v589_v7 = vadd.f32 %v545_v4, %v440_v42  ;;  %v1134_v51 = vmul.f32 %v3579_v56, %v4069_v49  ;;  %v1135_v63 = vmul.f32 %v3579_v56, %v4071_v1  ;;  %v4113_v59 = vld [vmem:[#allocation2 + $0xe8] sm:$0x3]  ;;  %1662 = vst.msk [vmem:[#allocation3 + $0x118] sm:$0x3] %vm1627_vm5, %v3298_v6 }
  0x85   :  { %v729_v8 = vsel %vm366_vm2, %v727_v32, %v728_v0  ;;  %v877_v54 = vsel %vm515_vm3, %v875_v3, %v876_v2  ;;  %v1059_v5 = vrot.slane %v986_v61, 1  ;;  %v1060_v9 = vrot.slane %v987_v50, 1  ;;  %1628 = vst.msk [vmem:[#allocation3 + $0x8] sm:$0x3] %vm1627_vm5, %v3298_v6  ;;  %1630 = vst.msk [vmem:[#allocation3 + $0x18] sm:$0x3] %vm1627_vm5, %v3298_v6 }
  0x86   :  { %3200 = vmatprep.mubr.msk.f32.mxu0 %vm163_vm0, %v1252_v41  ;;  %v625_v14 = vadd.f32 %v609_v48, %v589_v7  ;;  %v1207_v16 = vrot.slane %v1134_v51, 2  ;;  %v1208_v58 = vrot.slane %v1135_v63, 2  ;;  %v322_v62 = vmul.f32 %v3530_v35, %v4027_v39  ;;  %1632 = vst.msk [vmem:[#allocation3 + $0x28] sm:$0x3] %vm1627_vm5, %v3298_v6  ;;  %1634 = vst.msk [vmem:[#allocation3 + $0x38] sm:$0x3] %vm1627_vm5, %v3298_v6 }
  0x87   :  { %v276_v20 = vmul.f32 %v3527_v34, %v4027_v39  ;;  %v323_v21 = vmul.f32 %v3530_v35, %v4029_v25  ;;  %v471_v38 = vmul.f32 %v3533_v36, %v4027_v39  ;;  %v472_v28 = vmul.f32 %v3533_v36, %v4029_v25  ;;  %1636 = vst.msk [vmem:[#allocation3 + $0x48] sm:$0x3] %vm1627_vm5, %v3298_v6 }
  0x88   :  { %v773_v40 = vadd.f32 %v729_v8, %v625_v14  ;;  %v1061_v27 = vsel %vm366_vm2, %v1059_v5, %v1060_v9  ;;  %v1209_v15 = vsel %vm515_vm3, %v1207_v16, %v1208_v58  ;;  %v397_v26 = vrot.slane %v322_v62, 1  ;;  %1638 = vst.msk [vmem:[#allocation3 + $0x58] sm:$0x3] %vm1627_vm5, %v3298_v6  ;;  %1640 = vst.msk [vmem:[#allocation3 + $0x68] sm:$0x3] %vm1627_vm5, %v3298_v6 }
  0x89   :  { %v398_v33 = vrot.slane %v323_v21, 1  ;;  %v546_v17 = vrot.slane %v471_v38, 2  ;;  %v547_v11 = vrot.slane %v472_v28, 2  ;;  %v656_v12 = vmul.f32 %v3550_v43, %v4069_v49  ;;  %1642 = vst.msk [vmem:[#allocation3 + $0x78] sm:$0x3] %vm1627_vm5, %v3298_v6 }
  0x8a   :  { %v921_v10 = vadd.f32 %v877_v54, %v773_v40  ;;  %v657_v18 = vmul.f32 %v3550_v43, %v4071_v1  ;;  %v804_v39 = vmul.f32 %v3553_v44, %v4069_v49  ;;  %v805_v25 = vmul.f32 %v3553_v44, %v4071_v1  ;;  %1644 = vst.msk [vmem:[#allocation3 + $0x88] sm:$0x3] %vm1627_vm5, %v3298_v6 }
  0x8b   :  { %v399_v30 = vsel %vm366_vm2, %v397_v26, %v398_v33  ;;  %v548_v31 = vsel %vm515_vm3, %v546_v17, %v547_v11  ;;  %v610_v53 = vmul.f32 %v3536_v37, %v4069_v49  ;;  %v730_v48 = vrot.slane %v656_v12, 1  ;;  %1646 = vst.msk [vmem:[#allocation3 + $0x98] sm:$0x3] %vm1627_vm5, %v3298_v6  ;;  %1648 = vst.msk [vmem:[#allocation3 + $0xa8] sm:$0x3] %vm1627_vm5, %v3298_v6 }
  0x8c   :  { %v957_v55 = vadd.f32 %v941_v29, %v921_v10  ;;  %v441_v13 = vadd.f32 %v399_v30, %v276_v20  ;;  %v731_v52 = vrot.slane %v657_v18, 1  ;;  %v878_v19 = vrot.slane %v804_v39, 2  ;;  %v4151_v10 = vld [vmem:[#allocation2 + $0xf0] sm:$0xff]  ;;  %v4153_v18 = vld [vmem:[#allocation2 + $0xf8] sm:$0x3] }
  0x8d   :  { %v879_v32 = vrot.slane %v805_v25, 2  ;;  %v988_v0 = vmul.f32 %v3559_v46, %v4111_v57  ;;  %v989_v60 = vmul.f32 %v3559_v46, %v4113_v59  ;;  %v1136_v47 = vmul.f32 %v3579_v56, %v4111_v57  ;;  %1650 = vst.msk [vmem:[#allocation3 + $0xb8] sm:$0x3] %vm1627_vm5, %v3298_v6  ;;  %1652 = vst.msk [vmem:[#allocation3 + $0xc8] sm:$0x3] %vm1627_vm5, %v3298_v6 }
  0x8e   :  { %v1105_v42 = vadd.f32 %v1061_v27, %v957_v55  ;;  %v590_v4 = vadd.f32 %v548_v31, %v441_v13  ;;  %v942_v3 = vmul.f32 %v3556_v45, %v4111_v57  ;;  %v1137_v2 = vmul.f32 %v3579_v56, %v4113_v59  ;;  %1654 = vst.msk [vmem:[#allocation3 + $0xd8] sm:$0x3] %vm1627_vm5, %v3298_v6 }
  0x8f   :  { %v732_v29 = vsel %vm366_vm2, %v730_v48, %v731_v52  ;;  %v1062_v61 = vrot.slane %v988_v0, 1  ;;  %v1063_v50 = vrot.slane %v989_v60, 1  ;;  %v1210_v41 = vrot.slane %v1136_v47, 2  ;;  %1656 = vst.msk [vmem:[#allocation3 + $0xe8] sm:$0x3] %vm1627_vm5, %v3298_v6 }
  0x90   :  { %v1253_v7 = vadd.f32 %v1209_v15, %v1105_v42  ;;  %v626_v51 = vadd.f32 %v610_v53, %v590_v4  ;;  %v880_v63 = vsel %vm515_vm3, %v878_v19, %v879_v32  ;;  %v1211_v8 = vrot.slane %v1137_v2, 2  ;;  %1658 = vst.msk [vmem:[#allocation3 + $0xf8] sm:$0x3] %vm1627_vm5, %v3298_v6  ;;  %1660 = vst.msk [vmem:[#allocation3 + $0x108] sm:$0x3] %vm1627_vm5, %v3298_v6 }
  0x91   :  { %v277_v54 = vmul.f32 %v3527_v34, %v4069_v49  ;;  %v324_v5 = vmul.f32 %v3530_v35, %v4069_v49  ;;  %v325_v9 = vmul.f32 %v3530_v35, %v4071_v1  ;;  %v473_v14 = vmul.f32 %v3533_v36, %v4069_v49  ;;  %1664 = vst.msk [vmem:[#allocation3 + $0x128] sm:$0x3] %vm1627_vm5, %v3298_v6 }
  0x92   :  { %3201 = vmatmul.mubr.msk.f32.gmra.mxu0 %vm163_vm0, %v1253_v7  ;;  %v774_v16 = vadd.f32 %v732_v29, %v626_v51  ;;  %v1064_v58 = vsel %vm366_vm2, %v1062_v61, %v1063_v50  ;;  %v1212_v62 = vsel %vm515_vm3, %v1210_v41, %v1211_v8  ;;  %v474_v20 = vmul.f32 %v3533_v36, %v4071_v1 }
  0x93   :  { %v400_v21 = vrot.slane %v324_v5, 1  ;;  %v401_v38 = vrot.slane %v325_v9, 1  ;;  %v549_v28 = vrot.slane %v473_v14, 2  ;;  %v658_v40 = vmul.f32 %v3550_v43, %v4111_v57  ;;  %1666 = vst.msk [vmem:[#allocation3 + $0x138] sm:$0x3] %vm1627_vm5, %v3298_v6  ;;  %v1620_v6 = vld [vmem:[%s5408_s9 + $0x20] sm:$0xff] }
  0x94   :  { %v922_v27 = vadd.f32 %v880_v63, %v774_v16  ;;  %v550_v15 = vrot.slane %v474_v20, 2  ;;  %v659_v49 = vmul.f32 %v3550_v43, %v4113_v59  ;;  %v806_v26 = vmul.f32 %v3553_v44, %v4111_v57 }
  0x95   :  { %v402_v33 = vsel %vm366_vm2, %v400_v21, %v401_v38  ;;  %v611_v17 = vmul.f32 %v3536_v37, %v4111_v57  ;;  %v733_v1 = vrot.slane %v658_v40, 1  ;;  %v807_v11 = vmul.f32 %v3553_v44, %v4113_v59 }
  0x96   :  { %v958_v12 = vadd.f32 %v942_v3, %v922_v27  ;;  %v442_v39 = vadd.f32 %v402_v33, %v277_v54  ;;  %v551_v25 = vsel %vm515_vm3, %v549_v28, %v550_v15  ;;  %v734_v30 = vrot.slane %v659_v49, 1  ;;  %v4191_v27 = vld [vmem:[#allocation2 + $0x100] sm:$0xff] }
  0x97   :  { %v881_v31 = vrot.slane %v806_v26, 2  ;;  %v882_v53 = vrot.slane %v807_v11, 2  ;;  %v990_v48 = vmul.f32 %v3559_v46, %v4151_v10  ;;  %v991_v55 = vmul.f32 %v3559_v46, %v4153_v18 }
  0x98   :  { %v1106_v13 = vadd.f32 %v1064_v58, %v958_v12  ;;  %v591_v52 = vadd.f32 %v551_v25, %v442_v39  ;;  %v943_v19 = vmul.f32 %v3556_v45, %v4151_v10  ;;  %v1138_v32 = vmul.f32 %v3579_v56, %v4151_v10 }
  0x99   :  { %v735_v0 = vsel %vm366_vm2, %v733_v1, %v734_v30  ;;  %v1065_v60 = vrot.slane %v990_v48, 1  ;;  %v1066_v47 = vrot.slane %v991_v55, 1  ;;  %v1139_v42 = vmul.f32 %v3579_v56, %v4153_v18 }
  0x9a   :  { %v1254_v4 = vadd.f32 %v1212_v62, %v1106_v13  ;;  %v627_v3 = vadd.f32 %v611_v17, %v591_v52  ;;  %v883_v2 = vsel %vm515_vm3, %v881_v31, %v882_v53  ;;  %v1213_v29 = vrot.slane %v1138_v32, 2  ;;  %v4195_v17 = vld [vmem:[#allocation2 + $0x108] sm:$0x3] }
  0x9b   :  { %v1067_v61 = vsel %vm366_vm2, %v1065_v60, %v1066_v47  ;;  %v278_v50 = vmul.f32 %v3527_v34, %v4111_v57  ;;  %v326_v41 = vmul.f32 %v3530_v35, %v4111_v57  ;;  %v327_v7 = vmul.f32 %v3530_v35, %v4113_v59 }
  0x9c   :  { %3203 = vmatprep.mubr.msk.f32.mxu0 %vm163_vm0, %v1254_v4  ;;  %v775_v51 = vadd.f32 %v735_v0, %v627_v3  ;;  %v1214_v63 = vrot.slane %v1139_v42, 2  ;;  %v475_v8 = vmul.f32 %v3533_v36, %v4111_v57  ;;  %v476_v54 = vmul.f32 %v3533_v36, %v4113_v59 }
  0x9d   :  { %v403_v5 = vrot.slane %v326_v41, 1  ;;  %v404_v9 = vrot.slane %v327_v7, 1  ;;  %v612_v14 = vmul.f32 %v3536_v37, %v4151_v10  ;;  %v660_v16 = vmul.f32 %v3550_v43, %v4151_v10 }
  0x9e   :  { %v923_v58 = vadd.f32 %v883_v2, %v775_v51  ;;  %v552_v62 = vrot.slane %v475_v8, 2  ;;  %v553_v20 = vrot.slane %v476_v54, 2  ;;  %v661_v21 = vmul.f32 %v3550_v43, %v4153_v18 }
  0x9f   :  { %v405_v38 = vsel %vm366_vm2, %v403_v5, %v404_v9  ;;  %v736_v57 = vrot.slane %v660_v16, 1  ;;  %v808_v59 = vmul.f32 %v3553_v44, %v4151_v10  ;;  %v809_v28 = vmul.f32 %v3553_v44, %v4153_v18 }
  0xa0   :  { %v959_v40 = vadd.f32 %v943_v19, %v923_v58  ;;  %v443_v15 = vadd.f32 %v405_v38, %v278_v50  ;;  %v554_v49 = vsel %vm515_vm3, %v552_v62, %v553_v20  ;;  %v737_v26 = vrot.slane %v661_v21, 1  ;;  %v4234_v38 = vld [vmem:[#allocation2 + $0x110] sm:$0xff] }
  0xa1   :  { %v1215_v33 = vsel %vm515_vm3, %v1213_v29, %v1214_v63  ;;  %v884_v1 = vrot.slane %v808_v59, 2  ;;  %v885_v11 = vrot.slane %v809_v28, 2  ;;  %v992_v12 = vmul.f32 %v3559_v46, %v4191_v27 }
  0xa2   :  { %v1107_v39 = vadd.f32 %v1067_v61, %v959_v40  ;;  %v592_v25 = vadd.f32 %v554_v49, %v443_v15  ;;  %v944_v30 = vmul.f32 %v3556_v45, %v4191_v27  ;;  %v993_v31 = vmul.f32 %v3559_v46, %v4195_v17 }
  0xa3   :  { %v738_v53 = vsel %vm366_vm2, %v736_v57, %v737_v26  ;;  %v1068_v48 = vrot.slane %v992_v12, 1  ;;  %v1140_v55 = vmul.f32 %v3579_v56, %v4191_v27  ;;  %v1141_v13 = vmul.f32 %v3579_v56, %v4195_v17  ;;  %v4236_v57 = vld [vmem:[#allocation2 + $0x118] sm:$0x3] }
  0xa4   :  { %v1255_v52 = vadd.f32 %v1215_v33, %v1107_v39  ;;  %v628_v19 = vadd.f32 %v612_v14, %v592_v25  ;;  %v886_v32 = vsel %vm515_vm3, %v884_v1, %v885_v11  ;;  %v1069_v0 = vrot.slane %v993_v31, 1 }
  0xa5   :  { %v1216_v60 = vrot.slane %v1140_v55, 2  ;;  %v279_v47 = vmul.f32 %v3527_v34, %v4151_v10  ;;  %v328_v42 = vmul.f32 %v3530_v35, %v4151_v10  ;;  %v329_v4 = vmul.f32 %v3530_v35, %v4153_v18 }
  0xa6   :  { %3204 = vmatmul.mubr.msk.f32.gmra.mxu0 %vm163_vm0, %v1255_v52  ;;  %v776_v3 = vadd.f32 %v738_v53, %v628_v19  ;;  %v1217_v2 = vrot.slane %v1141_v13, 2  ;;  %v477_v29 = vmul.f32 %v3533_v36, %v4151_v10  ;;  %v478_v61 = vmul.f32 %v3533_v36, %v4153_v18 }
  0xa7   :  { %v1070_v50 = vsel %vm366_vm2, %v1068_v48, %v1069_v0  ;;  %v406_v41 = vrot.slane %v328_v42, 1  ;;  %v407_v7 = vrot.slane %v329_v4, 1  ;;  %v613_v51 = vmul.f32 %v3536_v37, %v4191_v27 }
  0xa8   :  { %v924_v63 = vadd.f32 %v886_v32, %v776_v3  ;;  %v555_v8 = vrot.slane %v477_v29, 2  ;;  %v556_v54 = vrot.slane %v478_v61, 2  ;;  %v662_v5 = vmul.f32 %v3550_v43, %v4191_v27 }
  0xa9   :  { %v408_v9 = vsel %vm366_vm2, %v406_v41, %v407_v7  ;;  %v663_v10 = vmul.f32 %v3550_v43, %v4195_v17  ;;  %v810_v18 = vmul.f32 %v3553_v44, %v4191_v27  ;;  %v811_v14 = vmul.f32 %v3553_v44, %v4195_v17 }
  0xaa   :  { %v960_v16 = vadd.f32 %v944_v30, %v924_v63  ;;  %v444_v58 = vadd.f32 %v408_v9, %v279_v47  ;;  %v557_v62 = vsel %vm515_vm3, %v555_v8, %v556_v54  ;;  %v739_v20 = vrot.slane %v662_v5, 1  ;;  %v4274_v5 = vld [vmem:[#allocation2 + $0x130] sm:$0xff]  ;;  %v258_v9 = vld [vmem:[#allocation2 + $0x120] sm:$0xff] }
  0xab   :  { %v1218_v21 = vsel %vm515_vm3, %v1216_v60, %v1217_v2  ;;  %v740_v59 = vrot.slane %v663_v10, 1  ;;  %v887_v28 = vrot.slane %v810_v18, 2  ;;  %v888_v40 = vrot.slane %v811_v14, 2  ;;  %v259_v10 = vld [vmem:[#allocation2 + $0x128] sm:$0x3] }
  0xac   :  { %v1108_v15 = vadd.f32 %v1070_v50, %v960_v16  ;;  %v593_v49 = vadd.f32 %v557_v62, %v444_v58  ;;  %v994_v26 = vmul.f32 %v3559_v46, %v4234_v38  ;;  %v995_v33 = vmul.f32 %v3559_v46, %v4236_v57 }
  0xad   :  { %v741_v1 = vsel %vm366_vm2, %v739_v20, %v740_v59  ;;  %v945_v11 = vmul.f32 %v3556_v45, %v4234_v38  ;;  %v1142_v12 = vmul.f32 %v3579_v56, %v4234_v38  ;;  %v1143_v39 = vmul.f32 %v3579_v56, %v4236_v57 }
  0xae   :  { %v1256_v25 = vadd.f32 %v1218_v21, %v1108_v15  ;;  %v629_v30 = vadd.f32 %v613_v51, %v593_v49  ;;  %v1071_v31 = vrot.slane %v994_v26, 1  ;;  %v1072_v53 = vrot.slane %v995_v33, 1 }
  0xaf   :  { %v889_v48 = vsel %vm515_vm3, %v887_v28, %v888_v40  ;;  %v1219_v55 = vrot.slane %v1142_v12, 2  ;;  %v1220_v13 = vrot.slane %v1143_v39, 2  ;;  %v330_v52 = vmul.f32 %v3530_v35, %v4191_v27 }
  0xb0   :  { %3206 = vmatprep.mubr.msk.f32.mxu0 %vm163_vm0, %v1256_v25  ;;  %v777_v19 = vadd.f32 %v741_v1, %v629_v30  ;;  %v280_v32 = vmul.f32 %v3527_v34, %v4191_v27  ;;  %v331_v0 = vmul.f32 %v3530_v35, %v4195_v17  ;;  %v479_v60 = vmul.f32 %v3533_v36, %v4191_v27 }
  0xb1   :  { %v1073_v47 = vsel %vm366_vm2, %v1071_v31, %v1072_v53  ;;  %v1221_v42 = vsel %vm515_vm3, %v1219_v55, %v1220_v13  ;;  %v409_v4 = vrot.slane %v330_v52, 1  ;;  %v480_v3 = vmul.f32 %v3533_v36, %v4195_v17 }
  0xb2   :  { %v925_v2 = vadd.f32 %v889_v48, %v777_v19  ;;  %v410_v29 = vrot.slane %v331_v0, 1  ;;  %v558_v61 = vrot.slane %v479_v60, 2  ;;  %v664_v50 = vmul.f32 %v3550_v43, %v4234_v38 }
  0xb3   :  { %v559_v41 = vrot.slane %v480_v3, 2  ;;  %v665_v7 = vmul.f32 %v3550_v43, %v4236_v57  ;;  %v812_v27 = vmul.f32 %v3553_v44, %v4234_v38  ;;  %v813_v51 = vmul.f32 %v3553_v44, %v4236_v57  ;;  %v261_v3 = vld [vmem:[#allocation2 + $0x138] sm:$0x3] }
  0xb4   :  { %v961_v63 = vadd.f32 %v945_v11, %v925_v2  ;;  %v411_v8 = vsel %vm366_vm2, %v409_v4, %v410_v29  ;;  %v614_v17 = vmul.f32 %v3536_v37, %v4234_v38  ;;  %v742_v54 = vrot.slane %v664_v50, 1 }
  0xb5   :  { %v445_v18 = vadd.f32 %v411_v8, %v280_v32  ;;  %v560_v14 = vsel %vm515_vm3, %v558_v61, %v559_v41  ;;  %v743_v16 = vrot.slane %v665_v7, 1  ;;  %v890_v58 = vrot.slane %v812_v27, 2 }
  0xb6   :  { %v1109_v62 = vadd.f32 %v1073_v47, %v961_v63  ;;  %v891_v20 = vrot.slane %v813_v51, 2  ;;  %v996_v21 = vmul.f32 %v3559_v46, %v258_v9  ;;  %v997_v59 = vmul.f32 %v3559_v46, %v259_v10 }
  0xb7   :  { %v594_v28 = vadd.f32 %v560_v14, %v445_v18  ;;  %v1144_v40 = vmul.f32 %v3579_v56, %v258_v9  ;;  %v1145_v15 = vmul.f32 %v3579_v56, %v259_v10  ;;  %v4283_v49 = vmul.f32 %v3559_v46, %v4274_v5 }
  0xb8   :  { %v1257_v26 = vadd.f32 %v1221_v42, %v1109_v62  ;;  %v744_v33 = vsel %vm366_vm2, %v742_v54, %v743_v16  ;;  %v1074_v1 = vrot.slane %v996_v21, 1  ;;  %v1075_v11 = vrot.slane %v997_v59, 1 }
  0xb9   :  { %v630_v12 = vadd.f32 %v614_v17, %v594_v28  ;;  %v892_v39 = vsel %vm515_vm3, %v890_v58, %v891_v20  ;;  %v946_v25 = vmul.f32 %v3556_v45, %v258_v9  ;;  %v1222_v30 = vrot.slane %v1144_v40, 2 }
  0xba   :  { %3207 = vmatmul.mubr.msk.f32.gmra.mxu0 %vm163_vm0, %v1257_v26  ;;  %v1223_v31 = vrot.slane %v1145_v15, 2  ;;  %v332_v53 = vmul.f32 %v3530_v35, %v4234_v38  ;;  %v333_v48 = vmul.f32 %v3530_v35, %v4236_v57  ;;  %v481_v55 = vmul.f32 %v3533_v36, %v4234_v38  ;;  %v1619_v26 = vld [vmem:[%s5408_s9 + $0x18] sm:$0xff] }
  0xbb   :  { %v778_v13 = vadd.f32 %v744_v33, %v630_v12  ;;  %v1076_v52 = vsel %vm366_vm2, %v1074_v1, %v1075_v11  ;;  %v281_v19 = vmul.f32 %v3527_v34, %v4234_v38  ;;  %v482_v32 = vmul.f32 %v3533_v36, %v4236_v57  ;;  %v1618_v33 = vld [vmem:[%s5408_s9 + $0x10] sm:$0xff]  ;;  %v1617_v11 = vld [vmem:[%s5408_s9 + $0x8] sm:$0xff] }
  0xbc   :  { %v412_v0 = vrot.slane %v332_v53, 1  ;;  %v413_v60 = vrot.slane %v333_v48, 1  ;;  %v561_v47 = vrot.slane %v481_v55, 2  ;;  %v666_v42 = vmul.f32 %v3550_v43, %v258_v9 }
  0xbd   :  { %v926_v4 = vadd.f32 %v892_v39, %v778_v13  ;;  %v562_v35 = vrot.slane %v482_v32, 2  ;;  %v667_v2 = vmul.f32 %v3550_v43, %v259_v10  ;;  %v814_v29 = vmul.f32 %v3553_v44, %v258_v9 }
  0xbe   :  { %v414_v61 = vsel %vm366_vm2, %v412_v0, %v413_v60  ;;  %v615_v50 = vmul.f32 %v3536_v37, %v258_v9  ;;  %v745_v34 = vrot.slane %v666_v42, 1  ;;  %v815_v38 = vmul.f32 %v3553_v44, %v259_v10 }
  0xbf   :  { %v962_v36 = vadd.f32 %v946_v25, %v926_v4  ;;  %v446_v57 = vadd.f32 %v414_v61, %v281_v19  ;;  %v563_v41 = vsel %vm515_vm3, %v561_v47, %v562_v35  ;;  %v746_v7 = vrot.slane %v667_v2, 1 }
  0xc0   :  { %v1224_v27 = vsel %vm515_vm3, %v1222_v30, %v1223_v31  ;;  %v893_v51 = vrot.slane %v814_v29, 2  ;;  %v894_v63 = vrot.slane %v815_v38, 2  ;;  %v999_v43 = vmul.f32 %v3559_v46, %v261_v3  ;;  %v1616_v31 = vld [vmem:[%s5408_s9] sm:$0xff] }
  0xc1   :  { %v1110_v8 = vadd.f32 %v1076_v52, %v962_v36  ;;  %v595_v17 = vadd.f32 %v563_v41, %v446_v57  ;;  %v747_v54 = vsel %vm366_vm2, %v745_v34, %v746_v7  ;;  %v1146_v37 = vmul.f32 %v3579_v56, %v4274_v5 }
  0xc2   :  { %v1147_v44 = vmul.f32 %v3579_v56, %v261_v3  ;;  %v895_v46 = vsel %vm515_vm3, %v893_v51, %v894_v63  ;;  %v1077_v56 = vrot.slane %v4283_v49, 1  ;;  %v1078_v18 = vrot.slane %v999_v43, 1  ;;  %v1621_v49 = vld [vmem:[%s5408_s9 + $0x28] sm:$0xff] }
  0xc3   :  { %v1258_v9 = vadd.f32 %v1224_v27, %v1110_v8  ;;  %v631_v10 = vadd.f32 %v615_v50, %v595_v17  ;;  %v947_v16 = vmul.f32 %v3556_v45, %v4274_v5  ;;  %v1225_v58 = vrot.slane %v1146_v37, 2  ;;  %v1623_v45 = vld [vmem:[%s5408_s9 + $0x38] sm:$0xff]  ;;  %v1622_v5 = vld [vmem:[%s5408_s9 + $0x30] sm:$0xff] }
  0xc4   :  { %v1226_v62 = vrot.slane %v1147_v44, 2  ;;  %v1079_v21 = vsel %vm366_vm2, %v1077_v56, %v1078_v18  ;;  %3212 = vmatprep.subr.mxu0 %v1623_v45  ;;  %3252 = vmatprep.subr.mxu1 %v1623_v45 }
  0xc5   :  { %3209 = vmatprep.mubr.msk.f32.mxu0 %vm163_vm0, %v1258_v9  ;;  %v779_v14 = vadd.f32 %v747_v54, %v631_v10  ;;  %3213 = vmatpush3.msra.mxu0 %v1623_v45 }
  0xc6   :  { %v1227_v28 = vsel %vm515_vm3, %v1225_v58, %v1226_v62  ;;  %3260 = vmatpush3.msra.mxu1 %v1623_v45  ;;  %3214 = vmatprep.subr.mxu0 %v1622_v5 }
  0xc7   :  { %v927_v20 = vadd.f32 %v895_v46, %v779_v14  ;;  %3253 = vmatprep.subr.mxu1 %v1622_v5  ;;  %3215 = vmatpush3.msra.mxu0 %v1622_v5 }
  0xc8   :  { %3261 = vmatpush3.msra.mxu1 %v1622_v5  ;;  %3216 = vmatprep.subr.mxu0 %v1621_v49 }
  0xc9   :  { %v963_v59 = vadd.f32 %v947_v16, %v927_v20  ;;  %3254 = vmatprep.subr.mxu1 %v1621_v49  ;;  %3217 = vmatpush3.msra.mxu0 %v1621_v49 }
  0xca   :  { %3262 = vmatpush3.msra.mxu1 %v1621_v49  ;;  %3218 = vmatprep.subr.mxu0 %v1620_v6 }
  0xcb   :  { %v1111_v40 = vadd.f32 %v1079_v21, %v963_v59  ;;  %3255 = vmatprep.subr.mxu1 %v1620_v6  ;;  %3219 = vmatpush3.msra.mxu0 %v1620_v6 }
  0xcc   :  { %3263 = vmatpush3.msra.mxu1 %v1620_v6  ;;  %3220 = vmatprep.subr.mxu0 %v1619_v26 }
  0xcd   :  { %v1259_v15 = vadd.f32 %v1227_v28, %v1111_v40  ;;  %3256 = vmatprep.subr.mxu1 %v1619_v26  ;;  %3221 = vmatpush3.msra.mxu0 %v1619_v26 }
  0xce   :  { %3264 = vmatpush3.msra.mxu1 %v1619_v26  ;;  %3222 = vmatprep.subr.mxu0 %v1618_v33 }
  0xcf   :  { %3210 = vmatmul.mubr.msk.f32.gmra.mxu0 %vm163_vm0, %v1259_v15  ;;  %3257 = vmatprep.subr.mxu1 %v1618_v33 }
  0xd0   :  { %3223 = vmatpush3.msra.mxu0 %v1618_v33  ;;  %3265 = vmatpush3.msra.mxu1 %v1618_v33 }
  0xd1   :  { %3224 = vmatprep.subr.mxu0 %v1617_v11  ;;  %3258 = vmatprep.subr.mxu1 %v1617_v11 }
  0xd2   :  { %3225 = vmatpush3.msra.mxu0 %v1617_v11  ;;  %3266 = vmatpush3.msra.mxu1 %v1617_v11 }
  0xd3   :  { %3226 = vmatprep.subr.mxu0 %v1616_v31  ;;  %3259 = vmatprep.subr.mxu1 %v1616_v31 }
  0xd4   :  { %3227 = vmatpush3.msra.mxu0 %v1616_v31  ;;  %3267 = vmatpush3.msra.mxu1 %v1616_v31 }
  0xf9   :  { %v4419_v1 = vpop.f32.mrf.mxu0 }
  0xfa   :  { %v1493_v53 = vmul.f32 %v4419_v1, %v4419_v1  ;;  %v1455_v52 = vsel %vm1453_vm4, %v4419_v1, 0.0 }
  0xfb   :  { %v4424_v12 = vpop.f32.mrf.mxu0 }
  0xfc   :  { %v1492_v30 = vmul.f32 %v4424_v12, %v4424_v12  ;;  %v1454_v48 = vsel %vm1453_vm4, %v4424_v12, 0.0  ;;  %v1509_v60 = vsel %vm1453_vm4, %v1493_v53, 0.0 }
  0xfd   :  { %v1456_v0 = vadd.f32 %v1455_v52, %v1454_v48 }
  0xfe   :  { %v1508_v19 = vsel %vm1453_vm4, %v1492_v30, 0.0 }
  0xff   :  { %v1510_v42 = vadd.f32 %v1509_v60, %v1508_v19 }
 0x10c   :  { %v4426_v39 = vpop.f32.mrf.mxu0 }
 0x10d   :  { %v1495_v35 = vmul.f32 %v4426_v39, %v4426_v39  ;;  %v1459_v29 = vsel %vm1453_vm4, %v4426_v39, 0.0 }
 0x10e   :  { %v4428_v25 = vpop.f32.mrf.mxu0 }
 0x10f   :  { %v1494_v55 = vmul.f32 %v4428_v25, %v4428_v25  ;;  %v1457_v32 = vsel %vm1453_vm4, %v4428_v25, 0.0  ;;  %v1513_v38 = vsel %vm1453_vm4, %v1495_v35, 0.0 }
 0x110   :  { %v1458_v4 = vadd.f32 %v1457_v32, %v1456_v0 }
 0x111   :  { %v1511_v47 = vsel %vm1453_vm4, %v1494_v55, 0.0 }
 0x112   :  { %v1512_v2 = vadd.f32 %v1511_v47, %v1510_v42  ;;  %v1460_v50 = vadd.f32 %v1459_v29, %v1458_v4 }
 0x114   :  { %v1514_v57 = vadd.f32 %v1513_v38, %v1512_v2 }
 0x121   :  { %v4441_v13 = vpop.f32.mrf.mxu0 }
 0x122   :  { %v1497_v51 = vmul.f32 %v4441_v13, %v4441_v13  ;;  %v1463_v43 = vsel %vm1453_vm4, %v4441_v13, 0.0 }
 0x123   :  { %v4450_v3 = vpop.f32.mrf.mxu0 }
 0x124   :  { %v1496_v61 = vmul.f32 %v4450_v3, %v4450_v3  ;;  %v1461_v36 = vsel %vm1453_vm4, %v4450_v3, 0.0  ;;  %v1517_v37 = vsel %vm1453_vm4, %v1497_v51, 0.0 }
 0x125   :  { %v1462_v7 = vadd.f32 %v1461_v36, %v1460_v50 }
 0x126   :  { %v1515_v41 = vsel %vm1453_vm4, %v1496_v61, 0.0 }
 0x127   :  { %v1516_v63 = vadd.f32 %v1515_v41, %v1514_v57  ;;  %v1464_v17 = vadd.f32 %v1463_v43, %v1462_v7 }
 0x129   :  { %v1518_v9 = vadd.f32 %v1517_v37, %v1516_v63 }
 0x136   :  { %v4458_v34 = vpop.f32.mrf.mxu0 }
 0x137   :  { %v1499_v18 = vmul.f32 %v4458_v34, %v4458_v34  ;;  %v1467_v16 = vsel %vm1453_vm4, %v4458_v34, 0.0 }
 0x138   :  { %v4464_v27 = vpop.f32.mrf.mxu0 }
 0x139   :  { %v1498_v8 = vmul.f32 %v4464_v27, %v4464_v27  ;;  %v1465_v44 = vsel %vm1453_vm4, %v4464_v27, 0.0  ;;  %v1521_v21 = vsel %vm1453_vm4, %v1499_v18, 0.0 }
 0x13a   :  { %v1466_v46 = vadd.f32 %v1465_v44, %v1464_v17 }
 0x13b   :  { %v1519_v10 = vsel %vm1453_vm4, %v1498_v8, 0.0 }
 0x13c   :  { %v1520_v14 = vadd.f32 %v1519_v10, %v1518_v9  ;;  %v1468_v62 = vadd.f32 %v1467_v16, %v1466_v46 }
 0x13e   :  { %v1522_v28 = vadd.f32 %v1521_v21, %v1520_v14 }
 0x152   :  { %v4472_v54 = vpop.f32.mrf.mxu0 }
 0x153   :  { %v1501_v5 = vmul.f32 %v4472_v54, %v4472_v54  ;;  %v1471_v6 = vsel %vm1453_vm4, %v4472_v54, 0.0 }
 0x154   :  { %v4478_v56 = vpop.f32.mrf.mxu0 }
 0x155   :  { %v1500_v58 = vmul.f32 %v4478_v56, %v4478_v56  ;;  %v1469_v59 = vsel %vm1453_vm4, %v4478_v56, 0.0  ;;  %v1525_v30 = vsel %vm1453_vm4, %v1501_v5, 0.0 }
 0x156   :  { %v1470_v15 = vadd.f32 %v1469_v59, %v1468_v62 }
 0x157   :  { %v1523_v40 = vsel %vm1453_vm4, %v1500_v58, 0.0 }
 0x158   :  { %v1524_v49 = vadd.f32 %v1523_v40, %v1522_v28  ;;  %v1472_v33 = vadd.f32 %v1471_v6, %v1470_v15 }
 0x15a   :  { %v1526_v53 = vadd.f32 %v1525_v30, %v1524_v49 }
 0x166   :  { %v4486_v20 = vpop.f32.mrf.mxu0 }
 0x167   :  { %v1503_v19 = vmul.f32 %v4486_v20, %v4486_v20  ;;  %v1475_v0 = vsel %vm1453_vm4, %v4486_v20, 0.0 }
 0x168   :  { %v4492_v45 = vpop.f32.mrf.mxu0 }
 0x169   :  { %v1502_v26 = vmul.f32 %v4492_v45, %v4492_v45  ;;  %v1473_v31 = vsel %vm1453_vm4, %v4492_v45, 0.0  ;;  %v1529_v42 = vsel %vm1453_vm4, %v1503_v19, 0.0  ;;  %v1684_v19 = vld [vmem:[#allocation3] sm:$0xff] }
 0x16a   :  { %v1474_v55 = vadd.f32 %v1473_v31, %v1472_v33 }
 0x16b   :  { %v1527_v48 = vsel %vm1453_vm4, %v1502_v26, 0.0 }
 0x16c   :  { %v1528_v32 = vadd.f32 %v1527_v48, %v1526_v53  ;;  %v1476_v47 = vadd.f32 %v1475_v0, %v1474_v55  ;;  %v1613_v53 = vld [vmem:[%s5407_s8] sm:$0x7] }
 0x16d   :  { %v4541_v55 = vrot.slane %v1613_v53, %v3503_v23  ;;  %v1704_v0 = vld [vmem:[#allocation3 + $0xa0] sm:$0xff] }
 0x16e   :  { %v1530_v35 = vadd.f32 %v1529_v42, %v1528_v32  ;;  %v1685_v32 = vld [vmem:[#allocation3 + $0x8] sm:$0x3] }
 0x16f   :  { %v1764_v42 = vmul.f32 %v4541_v55, %v1684_v19 }
 0x17a   :  { %v4500_v11 = vpop.f32.mrf.mxu0 }
 0x17b   :  { %v1505_v61 = vmul.f32 %v4500_v11, %v4500_v11  ;;  %v1479_v38 = vsel %vm1453_vm4, %v4500_v11, 0.0 }
 0x17c   :  { %v4506_v52 = vpop.f32.mrf.mxu0 }
 0x17d   :  { %v1504_v60 = vmul.f32 %v4506_v52, %v4506_v52  ;;  %v1477_v4 = vsel %vm1453_vm4, %v4506_v52, 0.0  ;;  %v1533_v41 = vsel %vm1453_vm4, %v1505_v61, 0.0 }
 0x17e   :  { %v1478_v29 = vadd.f32 %v1477_v4, %v1476_v47  ;;  %v4544_v47 = vrot.slane %v1613_v53, %v3505_v24  ;;  %v1765_v4 = vmul.f32 %v4541_v55, %v1685_v32 }
 0x17f   :  { %v1531_v2 = vsel %vm1453_vm4, %v1504_v60, 0.0  ;;  %v1705_v60 = vld [vmem:[#allocation3 + $0xa8] sm:$0x3] }
 0x180   :  { %v1532_v50 = vadd.f32 %v1531_v2, %v1530_v35  ;;  %v1480_v57 = vadd.f32 %v1479_v38, %v1478_v29  ;;  %v1780_v35 = vmul.f32 %v4541_v55, %v1704_v0  ;;  %v1781_v2 = vmul.f32 %v4541_v55, %v1705_v60 }
 0x181   :  { %v4551_v29 = vrot.slane %v1613_v53, %v3501_v22  ;;  %v1912_v61 = vmul.f32 %v4544_v47, %v1684_v19  ;;  %v1828_v38 = vrot.slane %v1764_v42, 1 }
 0x182   :  { %v1534_v51 = vadd.f32 %v1533_v41, %v1532_v50  ;;  %v1913_v50 = vmul.f32 %v4544_v47, %v1685_v32  ;;  %v1852_v41 = vrot.slane %v1780_v35, 1 }
 0x18f   :  { %v4522_v36 = vpop.f32.mrf.mxu0 }
 0x190   :  { %v1507_v63 = vmul.f32 %v4522_v36, %v4522_v36  ;;  %v1483_v37 = vsel %vm1453_vm4, %v4522_v36, 0.0 }
 0x191   :  { %v4525_v7 = vpop.f32.mrf.mxu0 }
 0x192   :  { %v1481_v43 = vsel %vm1453_vm4, %v4525_v7, 0.0  ;;  %v1506_v8 = vmul.f32 %v4525_v7, %v4525_v7  ;;  %v1537_v46 = vsel %vm1453_vm4, %v1507_v63, 0.0  ;;  %v161_v63 = vld [vmem:[%s5405_s6] sm:$0x1] }
 0x193   :  { %v1482_v17 = vadd.f32 %v1481_v43, %v1480_v57  ;;  %v1829_v57 = vrot.slane %v1765_v4, 1  ;;  %v4561_v43 = vld [vmem:[%s5407_s8 + $0x4] sm:$0x7] }
 0x194   :  { %v1535_v44 = vsel %vm1453_vm4, %v1506_v8, 0.0  ;;  %v4566_v8 = vld [vmem:[%s5407_s8 + $0x8] sm:$0x7] }
 0x195   :  { %v1484_v9 = vadd.f32 %v1483_v37, %v1482_v17  ;;  %v1536_v10 = vadd.f32 %v1535_v44, %v1534_v51  ;;  %v1853_v51 = vrot.slane %v1781_v2, 1  ;;  %v1728_v17 = vmul.f32 %v4551_v29, %v1684_v19 }
 0x196   :  { %v1976_v37 = vrot.slane %v1912_v61, 2  ;;  %v1977_v44 = vrot.slane %v1913_v50, 2 }
 0x197   :  { %v1485_v18 = vrot.slane %v1484_v9, 4  ;;  %v1538_v14 = vadd.f32 %v1537_v46, %v1536_v10  ;;  %v1830_v10 = vsel %vm366_vm2, %v1828_v38, %v1829_v57  ;;  %v1736_v46 = vmul.f32 %v4551_v29, %v1704_v0 }
 0x199   :  { %v1486_v16 = vadd.f32 %v1485_v18, %v1484_v9  ;;  %v1539_v58 = vrot.slane %v1538_v14, 4  ;;  %v4570_v9 = vmul.f32 %v4544_v47, %v1704_v0  ;;  %v4575_v18 = vmul.f32 %v4544_v47, %v1705_v60 }
 0x19b   :  { %v1487_v62 = vrot.slane %v1486_v16, 2  ;;  %v1540_v21 = vadd.f32 %v1539_v58, %v1538_v14  ;;  %v2001_v53 = vrot.slane %v4575_v18, 2 }
 0x19d   :  { %v1488_v59 = vadd.f32 %v1487_v62, %v1486_v16  ;;  %v1541_v28 = vrot.slane %v1540_v21, 2  ;;  %v1854_v16 = vsel %vm366_vm2, %v1852_v41, %v1853_v51  ;;  %v4580_v62 = vrot.slane %v4561_v43, %v3501_v22 }
 0x19f   :  { %v1489_v40 = vrot.slane %v1488_v59, 1  ;;  %v1542_v15 = vadd.f32 %v1541_v28, %v1540_v21  ;;  %v4584_v21 = vrot.slane %v4566_v8, %v3503_v23  ;;  %v1703_v28 = vld [vmem:[#allocation3 + $0x98] sm:$0x3] }
 0x1a1   :  { %v1490_v5 = vadd.f32 %v1489_v40, %v1488_v59  ;;  %v1543_v49 = vrot.slane %v1542_v15, 1  ;;  %v4586_v59 = vld [vmem:[#allocation3 + $0x90] sm:$0xff]  ;;  %v162_v40 = vld [vmem:[%s5406_s7] sm:$0x1]  ;;  %v4610_v19 = vmul.f32 %v4584_v21, %v1703_v28 }
 0x1a3   :  { %v1491_v6 = vmul.f32 0.0078125, %v1490_v5  ;;  %v1544_v26 = vadd.f32 %v1543_v49, %v1542_v15  ;;  %v4591_v15 = vadd.f32 %v1830_v10, %v1728_v17  ;;  %v4594_v5 = vsel %vm515_vm3, %v1976_v37, %v1977_v44 }
 0x1a4   :  { %v4598_v49 = vrot.slane %v4566_v8, %v3505_v24 }
 0x1a5   :  { %v1545_v33 = vmul.f32 0.0078125, %v1544_v26  ;;  %v1546_v30 = vmul.f32 %v1491_v6, %v1491_v6  ;;  %v2000_v26 = vrot.slane %v4570_v9, 2  ;;  %v2040_v9 = vadd.f32 %v4594_v5, %v4591_v15 }
 0x1a6   :  { %v4614_v32 = vmul.f32 %v4598_v49, %v4586_v59  ;;  %v4617_v0 = vmul.f32 %v4598_v49, %v1703_v28 }
 0x1a7   :  { %v1547_v31 = vsub.f32 %v1545_v33, %v1546_v30 }
 0x1a9   :  { %v1548_v48 = vadd.f32 1e-05, %v1547_v31  ;;  %v4602_v31 = vadd.f32 %v1854_v16, %v1736_v46 }
 0x1ab   :  { %3272 = vrsqrt.f32 %v1548_v48  ;;  %v4607_v48 = vmul.f32 %v4584_v21, %v4586_v59 }
 0x1b8   :  { %v3273_v14 = vpop.eup %3272 }
 0x1b9   :  { %v1550_v58 = vmul.f32 %v3273_v14, %v161_v63 }
 0x1bb   :  { %v1551_v33 = vmul.f32 %v1550_v58, %v1491_v6  ;;  %v1557_v30 = vrot.slane %v1550_v58, %v3501_v22 }
 0x1bd   :  { %v1552_v6 = vsub.f32 %v162_v40, %v1551_v33  ;;  %v1573_v60 = vmul.f32 %v1557_v30, %v4525_v7  ;;  %v1559_v42 = vmul.f32 %v1557_v30, %v4424_v12  ;;  %v1560_v4 = vmul.f32 %v4419_v1, %v1557_v30 }
 0x1be   :  { %v1561_v35 = vmul.f32 %v1557_v30, %v4428_v25  ;;  %v1562_v2 = vmul.f32 %v4426_v39, %v1557_v30  ;;  %v1563_v61 = vmul.f32 %v1557_v30, %v4450_v3  ;;  %v1564_v50 = vmul.f32 %v4441_v13, %v1557_v30 }
 0x1bf   :  { %v1579_v38 = vrot.slane %v1552_v6, %v3501_v22  ;;  %v1565_v57 = vmul.f32 %v1557_v30, %v4464_v27  ;;  %v1566_v41 = vmul.f32 %v4458_v34, %v1557_v30  ;;  %v1567_v7 = vmul.f32 %v1557_v30, %v4478_v56 }
 0x1c0   :  { %v1568_v12 = vmul.f32 %v4472_v54, %v1557_v30  ;;  %v1569_v1 = vmul.f32 %v1557_v30, %v4492_v45  ;;  %v1570_v25 = vmul.f32 %v4486_v20, %v1557_v30  ;;  %v1571_v39 = vmul.f32 %v1557_v30, %v4506_v52 }
 0x1c1   :  { %v1595_v51 = vadd.f32 %v1579_v38, %v1573_v60  ;;  %v1581_v3 = vadd.f32 %v1579_v38, %v1559_v42  ;;  %v1582_v63 = vadd.f32 %v1579_v38, %v1560_v4  ;;  %v1583_v13 = vadd.f32 %v1579_v38, %v1561_v35 }
 0x1c2   :  { %v1584_v17 = vadd.f32 %v1579_v38, %v1562_v2  ;;  %v1585_v37 = vadd.f32 %v1579_v38, %v1563_v61  ;;  %v1586_v44 = vadd.f32 %v1579_v38, %v1564_v50  ;;  %v1587_v27 = vadd.f32 %v1579_v38, %v1565_v57 }
 0x1c3   :  { %v1611_v10 = vmax.f32 %v1595_v51, 0.0  ;;  %v1597_v34 = vmax.f32 %v1581_v3, 0.0  ;;  %v1598_v46 = vmax.f32 %v1582_v63, 0.0  ;;  %v1599_v56 = vmax.f32 %v1583_v13, 0.0 }
 0x1c4   :  { %v1600_v14 = vmax.f32 %v1584_v17, 0.0  ;;  %v1601_v54 = vmax.f32 %v1585_v37, 0.0  ;;  %v1602_v16 = vmax.f32 %v1586_v44, 0.0  ;;  %v1603_v45 = vmax.f32 %v1587_v27, 0.0 }
 0x1c5   :  { %1682 = vst.msk [vmem:[#allocation3 + $0x111] sm:$0xff] %vm1453_vm4, %v1611_v10  ;;  %1668 = vst.msk [vmem:[#allocation3 + $0x11] sm:$0xff] %vm1453_vm4, %v1597_v34  ;;  %v1588_v20 = vadd.f32 %v1579_v38, %v1566_v41  ;;  %v1589_v52 = vadd.f32 %v1579_v38, %v1567_v7  ;;  %v1590_v58 = vadd.f32 %v1579_v38, %v1568_v12  ;;  %v2513_v12 = vrot.slane %v4607_v48, 1 }
 0x1c6   :  { %1669 = vst.msk [vmem:[#allocation3 + $0x21] sm:$0xff] %vm1453_vm4, %v1598_v46  ;;  %1670 = vst.msk [vmem:[#allocation3 + $0x31] sm:$0xff] %vm1453_vm4, %v1599_v56  ;;  %v1591_v28 = vadd.f32 %v1579_v38, %v1569_v1  ;;  %v1592_v40 = vadd.f32 %v1579_v38, %v1570_v25  ;;  %v1593_v33 = vadd.f32 %v1579_v38, %v1571_v39 }
 0x1c7   :  { %1671 = vst.msk [vmem:[#allocation3 + $0x41] sm:$0xff] %vm1453_vm4, %v1600_v14  ;;  %1672 = vst.msk [vmem:[#allocation3 + $0x51] sm:$0xff] %vm1453_vm4, %v1601_v54  ;;  %v1572_v6 = vmul.f32 %v4500_v11, %v1557_v30  ;;  %v1574_v60 = vmul.f32 %v4522_v36, %v1557_v30  ;;  %v1604_v42 = vmax.f32 %v1588_v20, 0.0  ;;  %v1605_v4 = vmax.f32 %v1589_v52, 0.0 }
 0x1c8   :  { %1673 = vst.msk [vmem:[#allocation3 + $0x61] sm:$0xff] %vm1453_vm4, %v1602_v16  ;;  %1674 = vst.msk [vmem:[#allocation3 + $0x71] sm:$0xff] %vm1453_vm4, %v1603_v45  ;;  %v1606_v35 = vmax.f32 %v1590_v58, 0.0  ;;  %v1607_v2 = vmax.f32 %v1591_v28, 0.0  ;;  %v1608_v61 = vmax.f32 %v1592_v40, 0.0  ;;  %v1609_v50 = vmax.f32 %v1593_v33, 0.0 }
 0x1c9   :  { %v1594_v57 = vadd.f32 %v1579_v38, %v1572_v6  ;;  %v1596_v41 = vadd.f32 %v1579_v38, %v1574_v60  ;;  %v4646_v7 = vrot.slane %v4561_v43, %v3503_v23  ;;  %1675 = vst.msk [vmem:[#allocation3 + $0x81] sm:$0xff] %vm1453_vm4, %v1604_v42  ;;  %v2514_v11 = vrot.slane %v4610_v19, 1  ;;  %1676 = vst.msk [vmem:[#allocation3 + $0xb1] sm:$0xff] %vm1453_vm4, %v1605_v4 }
 0x1ca   :  { %1677 = vst.msk [vmem:[#allocation3 + $0xc1] sm:$0xff] %vm1453_vm4, %v1606_v35  ;;  %v2002_v36 = vsel %vm515_vm3, %v2000_v26, %v2001_v53  ;;  %1678 = vst.msk [vmem:[#allocation3 + $0xd1] sm:$0xff] %vm1453_vm4, %v1607_v2  ;;  %v4661_v23 = vrot.slane %v4561_v43, %v3505_v24  ;;  %v4665_v30 = vrot.slane %v4566_v8, %v3501_v22  ;;  %v2661_v26 = vrot.slane %v4614_v32, 2 }
 0x1cb   :  { %1679 = vst.msk [vmem:[#allocation3 + $0xe1] sm:$0xff] %vm1453_vm4, %v1608_v61  ;;  %1680 = vst.msk [vmem:[#allocation3 + $0xf1] sm:$0xff] %vm1453_vm4, %v1609_v50  ;;  %v1610_v48 = vmax.f32 %v1594_v57, 0.0  ;;  %v1612_v18 = vmax.f32 %v1596_v41, 0.0  ;;  %v2662_v53 = vrot.slane %v4617_v0, 2  ;;  %v4680_v38 = vadd.f32 %v2002_v36, %v4602_v31 }
 0x1cc   :  { %v1686_v19 = vld [vmem:[#allocation3 + $0x10] sm:$0xff]  ;;  %v1687_v24 = vld [vmem:[#allocation3 + $0x18] sm:$0x3]  ;;  %v4677_v8 = vmul.f32 %v4665_v30, %v4586_v59  ;;  %v4688_v0 = vsel %vm366_vm2, %v2513_v12, %v2514_v11 }
 0x1cd   :  { %v4673_v43 = vld [vmem:[#allocation3 + $0x20] sm:$0xff]  ;;  %1681 = vst.msk [vmem:[#allocation3 + $0x101] sm:$0xff] %vm1453_vm4, %v1610_v48  ;;  %1683 = vst.msk [vmem:[#allocation3 + $0x121] sm:$0xff] %vm1453_vm4, %v1612_v18  ;;  %v1767_v15 = vmul.f32 %v4541_v55, %v1687_v24  ;;  %v2060_v5 = vmul.f32 %v4580_v62, %v1686_v19  ;;  %v2096_v32 = vmul.f32 %v4646_v7, %v1686_v19  ;;  %v4690_v1 = vld [vmem:[#allocation3 + $0x28] sm:$0x3] }
 0x1ce   :  { %v1915_v59 = vmul.f32 %v4544_v47, %v1687_v24  ;;  %v2097_v31 = vmul.f32 %v4646_v7, %v1687_v24  ;;  %v2244_v25 = vmul.f32 %v4661_v23, %v1686_v19  ;;  %v2245_v39 = vmul.f32 %v4661_v23, %v1687_v24  ;;  %v4715_v4 = vld [vmem:[#allocation3 + $0x30] sm:$0xff]  ;;  %v4725_v36 = vld [vmem:[#allocation3 + $0x38] sm:$0x3] }
 0x1cf   :  { %v2076_v51 = vadd.f32 %v2060_v5, %v2040_v9  ;;  %v2160_v3 = vrot.slane %v2096_v32, 1  ;;  %v2392_v63 = vmul.f32 %v4665_v30, %v4673_v43  ;;  %v4699_v13 = vsel %vm515_vm3, %v2661_v26, %v2662_v53 }
 0x1d0   :  { %v2161_v17 = vrot.slane %v2097_v31, 1  ;;  %v2308_v37 = vrot.slane %v2244_v25, 2  ;;  %v2309_v44 = vrot.slane %v2245_v39, 2  ;;  %v2428_v27 = vmul.f32 %v4584_v21, %v4673_v43 }
 0x1d1   :  { %v1832_v10 = vrot.slane %v1767_v15, 1  ;;  %v2429_v34 = vmul.f32 %v4584_v21, %v4690_v1  ;;  %v2576_v46 = vmul.f32 %v4598_v49, %v4673_v43  ;;  %v2577_v56 = vmul.f32 %v4598_v49, %v4690_v1 }
 0x1d2   :  { %v1980_v14 = vrot.slane %v1915_v59, 2  ;;  %v2162_v54 = vsel %vm366_vm2, %v2160_v3, %v2161_v17  ;;  %v2310_v16 = vsel %vm515_vm3, %v2308_v37, %v2309_v44  ;;  %v1766_v45 = vmul.f32 %v4541_v55, %v1686_v19  ;;  %v4743_v44 = vld [vmem:[#allocation3 + $0x48] sm:$0x3] }
 0x1d3   :  { %v2224_v20 = vadd.f32 %v2162_v54, %v2076_v51  ;;  %v2492_v52 = vrot.slane %v2428_v27, 1  ;;  %v2493_v58 = vrot.slane %v2429_v34, 1  ;;  %v2640_v28 = vrot.slane %v2576_v46, 2 }
 0x1d4   :  { %v2641_v40 = vrot.slane %v2577_v56, 2  ;;  %v1831_v33 = vrot.slane %v1766_v45, 1  ;;  %v1914_v6 = vmul.f32 %v4544_v47, %v1686_v19  ;;  %v2098_v60 = vmul.f32 %v4646_v7, %v4673_v43 }
 0x1d5   :  { %v2372_v42 = vadd.f32 %v2310_v16, %v2224_v20  ;;  %v1729_v35 = vmul.f32 %v4551_v29, %v1686_v19  ;;  %v2061_v2 = vmul.f32 %v4580_v62, %v4673_v43  ;;  %v2099_v61 = vmul.f32 %v4646_v7, %v4690_v1 }
 0x1d6   :  { %v1833_v50 = vsel %vm366_vm2, %v1831_v33, %v1832_v10  ;;  %v1979_v57 = vrot.slane %v1914_v6, 2  ;;  %v2163_v41 = vrot.slane %v2098_v60, 1  ;;  %v2246_v12 = vmul.f32 %v4661_v23, %v4673_v43 }
 0x1d7   :  { %v2408_v11 = vadd.f32 %v2392_v63, %v2372_v42  ;;  %v1893_v48 = vadd.f32 %v1833_v50, %v1729_v35  ;;  %v2164_v18 = vrot.slane %v2099_v61, 1  ;;  %v2247_v9 = vmul.f32 %v4661_v23, %v4690_v1  ;;  %v4767_v61 = vld [vmem:[#allocation3 + $0x40] sm:$0xff] }
 0x1d8   :  { %v2494_v26 = vsel %vm366_vm2, %v2492_v52, %v2493_v58  ;;  %v2642_v53 = vsel %vm515_vm3, %v2640_v28, %v2641_v40  ;;  %v1981_v19 = vsel %vm515_vm3, %v1979_v57, %v1980_v14  ;;  %v2430_v24 = vmul.f32 %v4584_v21, %v4715_v4 }
 0x1d9   :  { %v2556_v15 = vadd.f32 %v2494_v26, %v2408_v11  ;;  %v2041_v5 = vadd.f32 %v1981_v19, %v1893_v48  ;;  %v2311_v32 = vrot.slane %v2246_v12, 2  ;;  %v2312_v59 = vrot.slane %v2247_v9, 2 }
 0x1da   :  { %v2393_v31 = vmul.f32 %v4665_v30, %v4715_v4  ;;  %v2431_v25 = vmul.f32 %v4584_v21, %v4725_v36  ;;  %v2578_v39 = vmul.f32 %v4598_v49, %v4715_v4  ;;  %v2579_v51 = vmul.f32 %v4598_v49, %v4725_v36 }
 0x1db   :  { %v2704_v3 = vadd.f32 %v2642_v53, %v2556_v15  ;;  %v2077_v63 = vadd.f32 %v2061_v2, %v2041_v5  ;;  %v2165_v17 = vsel %vm366_vm2, %v2163_v41, %v2164_v18  ;;  %v2495_v37 = vrot.slane %v2430_v24, 1 }
 0x1dc   :  { %v2496_v27 = vrot.slane %v2431_v25, 1  ;;  %v2643_v10 = vrot.slane %v2578_v39, 2  ;;  %v2644_v34 = vrot.slane %v2579_v51, 2  ;;  %v1768_v46 = vmul.f32 %v4541_v55, %v4673_v43 }
 0x1dd   :  { %3228 = vmatprep.mubr.msk.f32.mxu0 %vm1453_vm4, %v2704_v3  ;;  %v2225_v56 = vadd.f32 %v2165_v17, %v2077_v63  ;;  %v2313_v14 = vsel %vm515_vm3, %v2311_v32, %v2312_v59  ;;  %v1769_v54 = vmul.f32 %v4541_v55, %v4690_v1  ;;  %v1916_v16 = vmul.f32 %v4544_v47, %v4673_v43 }
 0x1de   :  { %v1730_v45 = vmul.f32 %v4551_v29, %v4673_v43  ;;  %v4757_v20 = vmul.f32 %v4541_v55, %v4743_v44  ;;  %v1834_v52 = vrot.slane %v1768_v46, 1  ;;  %v1917_v58 = vmul.f32 %v4544_v47, %v4690_v1 }
 0x1df   :  { %v2373_v28 = vadd.f32 %v2313_v14, %v2225_v56  ;;  %v2497_v40 = vsel %vm366_vm2, %v2495_v37, %v2496_v27  ;;  %v1835_v33 = vrot.slane %v1769_v54, 1  ;;  %v1982_v6 = vrot.slane %v1916_v16, 2 }
 0x1e0   :  { %v2645_v60 = vsel %vm515_vm3, %v2643_v10, %v2644_v34  ;;  %v1983_v42 = vrot.slane %v1917_v58, 2  ;;  %v2100_v35 = vmul.f32 %v4646_v7, %v4715_v4  ;;  %v2101_v43 = vmul.f32 %v4646_v7, %v4725_v36 }
 0x1e1   :  { %v2409_v2 = vadd.f32 %v2393_v31, %v2373_v28  ;;  %v1836_v50 = vsel %vm366_vm2, %v1834_v52, %v1835_v33  ;;  %v2248_v1 = vmul.f32 %v4661_v23, %v4715_v4  ;;  %v2249_v57 = vmul.f32 %v4661_v23, %v4725_v36 }
 0x1e2   :  { %v1841_v41 = vrot.slane %v4757_v20, 1  ;;  %v1894_v12 = vadd.f32 %v1836_v50, %v1730_v45  ;;  %v2166_v11 = vrot.slane %v2100_v35, 1  ;;  %v2167_v48 = vrot.slane %v2101_v43, 1 }
 0x1e3   :  { %v2557_v18 = vadd.f32 %v2497_v40, %v2409_v2  ;;  %v1984_v9 = vsel %vm515_vm3, %v1982_v6, %v1983_v42  ;;  %v2314_v26 = vrot.slane %v2248_v1, 2  ;;  %v2315_v53 = vrot.slane %v2249_v57, 2  ;;  %v4804_v6 = vld [vmem:[#allocation3 + $0x50] sm:$0xff] }
 0x1e4   :  { %v2042_v19 = vadd.f32 %v1984_v9, %v1894_v12  ;;  %v2062_v24 = vmul.f32 %v4580_v62, %v4715_v4  ;;  %v2432_v15 = vmul.f32 %v4584_v21, %v4767_v61  ;;  %v2433_v5 = vmul.f32 %v4584_v21, %v4743_v44 }
 0x1e5   :  { %v2705_v32 = vadd.f32 %v2645_v60, %v2557_v18  ;;  %v2394_v59 = vmul.f32 %v4665_v30, %v4767_v61  ;;  %v2580_v31 = vmul.f32 %v4598_v49, %v4767_v61  ;;  %v2581_v25 = vmul.f32 %v4598_v49, %v4743_v44  ;;  %v4806_v60 = vld [vmem:[#allocation3 + $0x58] sm:$0x3] }
 0x1e6   :  { %v2078_v39 = vadd.f32 %v2062_v24, %v2042_v19  ;;  %v2168_v51 = vsel %vm366_vm2, %v2166_v11, %v2167_v48  ;;  %v2498_v3 = vrot.slane %v2432_v15, 1  ;;  %v2499_v63 = vrot.slane %v2433_v5, 1 }
 0x1e7   :  { %3229 = vmatmul.mubr.msk.f32.vlgmr.msra.gmra.mxu0 %vm1453_vm4, %v2705_v32  ;;  %v2316_v17 = vsel %vm515_vm3, %v2314_v26, %v2315_v53  ;;  %v1731_v37 = vmul.f32 %v4551_v29, %v4715_v4  ;;  %v1770_v27 = vmul.f32 %v4541_v55, %v4715_v4  ;;  %v1771_v10 = vmul.f32 %v4541_v55, %v4725_v36 }
 0x1e8   :  { %v2226_v34 = vadd.f32 %v2168_v51, %v2078_v39  ;;  %v2646_v46 = vrot.slane %v2580_v31, 2  ;;  %v1918_v56 = vmul.f32 %v4544_v47, %v4715_v4  ;;  %v1919_v14 = vmul.f32 %v4544_v47, %v4725_v36 }
 0x1e9   :  { %v2500_v54 = vsel %vm366_vm2, %v2498_v3, %v2499_v63  ;;  %v2647_v16 = vrot.slane %v2581_v25, 2  ;;  %v1837_v45 = vrot.slane %v1770_v27, 1  ;;  %v1838_v52 = vrot.slane %v1771_v10, 1 }
 0x1ea   :  { %v2374_v58 = vadd.f32 %v2316_v17, %v2226_v34  ;;  %v1985_v28 = vrot.slane %v1918_v56, 2  ;;  %v1986_v40 = vrot.slane %v1919_v14, 2  ;;  %v2102_v33 = vmul.f32 %v4646_v7, %v4767_v61 }
 0x1eb   :  { %v1839_v4 = vsel %vm366_vm2, %v1837_v45, %v1838_v52  ;;  %v2103_v36 = vmul.f32 %v4646_v7, %v4743_v44  ;;  %v2250_v42 = vmul.f32 %v4661_v23, %v4767_v61  ;;  %v2251_v35 = vmul.f32 %v4661_v23, %v4743_v44 }
 0x1ec   :  { %v2410_v43 = vadd.f32 %v2394_v59, %v2374_v58  ;;  %v1895_v2 = vadd.f32 %v1839_v4, %v1731_v37  ;;  %v1987_v50 = vsel %vm515_vm3, %v1985_v28, %v1986_v40  ;;  %v2063_v1 = vmul.f32 %v4580_v62, %v4767_v61 }
 0x1ed   :  { %v2169_v57 = vrot.slane %v2102_v33, 1  ;;  %v2170_v12 = vrot.slane %v2103_v36, 1  ;;  %v2317_v11 = vrot.slane %v2250_v42, 2  ;;  %v2318_v48 = vrot.slane %v2251_v35, 2 }
 0x1ee   :  { %v2558_v18 = vadd.f32 %v2500_v54, %v2410_v43  ;;  %v2043_v9 = vadd.f32 %v1987_v50, %v1895_v2  ;;  %v2434_v26 = vmul.f32 %v4584_v21, %v4804_v6  ;;  %v2435_v53 = vmul.f32 %v4584_v21, %v4806_v60 }
 0x1ef   :  { %v2648_v19 = vsel %vm515_vm3, %v2646_v46, %v2647_v16  ;;  %v2395_v24 = vmul.f32 %v4665_v30, %v4804_v6  ;;  %v2582_v15 = vmul.f32 %v4598_v49, %v4804_v6  ;;  %v2583_v5 = vmul.f32 %v4598_v49, %v4806_v60  ;;  %v4843_v16 = vld [vmem:[#allocation3 + $0x60] sm:$0xff] }
 0x1f0   :  { %v2706_v32 = vadd.f32 %v2648_v19, %v2558_v18  ;;  %v2079_v59 = vadd.f32 %v2063_v1, %v2043_v9  ;;  %v2501_v31 = vrot.slane %v2434_v26, 1  ;;  %v2502_v25 = vrot.slane %v2435_v53, 1 }
 0x1f1   :  { %v2171_v39 = vsel %vm366_vm2, %v2169_v57, %v2170_v12  ;;  %v2649_v51 = vrot.slane %v2582_v15, 2  ;;  %v2650_v3 = vrot.slane %v2583_v5, 2  ;;  %v1772_v63 = vmul.f32 %v4541_v55, %v4767_v61 }
 0x1f2   :  { %3231 = vmatprep.mubr.msk.f32.mxu1 %vm1453_vm4, %v2706_v32  ;;  %v2227_v17 = vadd.f32 %v2171_v39, %v2079_v59  ;;  %v2319_v37 = vsel %vm515_vm3, %v2317_v11, %v2318_v48  ;;  %v1920_v27 = vmul.f32 %v4544_v47, %v4767_v61  ;;  %v1921_v10 = vmul.f32 %v4544_v47, %v4743_v44  ;;  %v4848_v44 = vld [vmem:[#allocation3 + $0x68] sm:$0x3] }
 0x1f3   :  { %v2503_v34 = vsel %vm366_vm2, %v2501_v31, %v2502_v25  ;;  %v1732_v46 = vmul.f32 %v4551_v29, %v4767_v61  ;;  %v1840_v56 = vrot.slane %v1772_v63, 1  ;;  %v2104_v14 = vmul.f32 %v4646_v7, %v4804_v6 }
 0x1f4   :  { %v2375_v54 = vadd.f32 %v2319_v37, %v2227_v17  ;;  %v1988_v45 = vrot.slane %v1920_v27, 2  ;;  %v1989_v52 = vrot.slane %v1921_v10, 2  ;;  %v2105_v58 = vmul.f32 %v4646_v7, %v4806_v60 }
 0x1f5   :  { %v2651_v28 = vsel %vm515_vm3, %v2649_v51, %v2650_v3  ;;  %v1842_v61 = vsel %vm366_vm2, %v1840_v56, %v1841_v41  ;;  %v2252_v40 = vmul.f32 %v4661_v23, %v4804_v6  ;;  %v2253_v33 = vmul.f32 %v4661_v23, %v4806_v60  ;;  %v4886_v56 = vld [vmem:[#allocation3 + $0x70] sm:$0xff] }
 0x1f6   :  { %v2411_v4 = vadd.f32 %v2395_v24, %v2375_v54  ;;  %v1896_v36 = vadd.f32 %v1842_v61, %v1732_v46  ;;  %v2172_v42 = vrot.slane %v2104_v14, 1  ;;  %v2173_v35 = vrot.slane %v2105_v58, 1  ;;  %v4888_v14 = vld [vmem:[#allocation3 + $0x78] sm:$0x3] }
 0x1f7   :  { %v1990_v43 = vsel %vm515_vm3, %v1988_v45, %v1989_v52  ;;  %v2320_v2 = vrot.slane %v2252_v40, 2  ;;  %v2321_v50 = vrot.slane %v2253_v33, 2  ;;  %v2436_v1 = vmul.f32 %v4584_v21, %v4843_v16 }
 0x1f8   :  { %v2559_v20 = vadd.f32 %v2503_v34, %v2411_v4  ;;  %v2044_v57 = vadd.f32 %v1990_v43, %v1896_v36  ;;  %v2064_v41 = vmul.f32 %v4580_v62, %v4804_v6  ;;  %v2437_v12 = vmul.f32 %v4584_v21, %v4848_v44 }
 0x1f9   :  { %v2396_v11 = vmul.f32 %v4665_v30, %v4843_v16  ;;  %v2504_v48 = vrot.slane %v2436_v1, 1  ;;  %v2584_v18 = vmul.f32 %v4598_v49, %v4843_v16  ;;  %v2585_v9 = vmul.f32 %v4598_v49, %v4848_v44 }
 0x1fa   :  { %v2707_v26 = vadd.f32 %v2651_v28, %v2559_v20  ;;  %v2080_v53 = vadd.f32 %v2064_v41, %v2044_v57  ;;  %v2174_v19 = vsel %vm366_vm2, %v2172_v42, %v2173_v35  ;;  %v2505_v24 = vrot.slane %v2437_v12, 1 }
 0x1fb   :  { %v2322_v15 = vsel %vm515_vm3, %v2320_v2, %v2321_v50  ;;  %v1733_v5 = vmul.f32 %v4551_v29, %v4804_v6  ;;  %v1774_v32 = vmul.f32 %v4541_v55, %v4804_v6  ;;  %v1775_v59 = vmul.f32 %v4541_v55, %v4806_v60 }
 0x1fc   :  { %3232 = vmatmul.mubr.msk.f32.vlgmr.msra.gmra.mxu1 %vm1453_vm4, %v2707_v26  ;;  %v2228_v31 = vadd.f32 %v2174_v19, %v2080_v53  ;;  %v2652_v25 = vrot.slane %v2584_v18, 2  ;;  %v1922_v39 = vmul.f32 %v4544_v47, %v4804_v6  ;;  %v1923_v51 = vmul.f32 %v4544_v47, %v4806_v60 }
 0x1fd   :  { %v2506_v3 = vsel %vm366_vm2, %v2504_v48, %v2505_v24  ;;  %v2653_v63 = vrot.slane %v2585_v9, 2  ;;  %v1843_v17 = vrot.slane %v1774_v32, 1  ;;  %v1844_v37 = vrot.slane %v1775_v59, 1 }
 0x1fe   :  { %v2376_v27 = vadd.f32 %v2322_v15, %v2228_v31  ;;  %v1991_v10 = vrot.slane %v1922_v39, 2  ;;  %v1992_v34 = vrot.slane %v1923_v51, 2  ;;  %v2106_v46 = vmul.f32 %v4646_v7, %v4843_v16 }
 0x1ff   :  { %v1845_v6 = vsel %vm366_vm2, %v1843_v17, %v1844_v37  ;;  %v2107_v60 = vmul.f32 %v4646_v7, %v4848_v44  ;;  %v2254_v54 = vmul.f32 %v4661_v23, %v4843_v16  ;;  %v2255_v45 = vmul.f32 %v4661_v23, %v4848_v44  ;;  %v1700_v17 = vld [vmem:[#allocation3 + $0x80] sm:$0xff]  ;;  %v1701_v37 = vld [vmem:[#allocation3 + $0x88] sm:$0x3] }
 0x200   :  { %v2412_v52 = vadd.f32 %v2396_v11, %v2376_v27  ;;  %v1897_v58 = vadd.f32 %v1845_v6, %v1733_v5  ;;  %v1993_v28 = vsel %vm515_vm3, %v1991_v10, %v1992_v34  ;;  %v2065_v61 = vmul.f32 %v4580_v62, %v4843_v16 }
 0x201   :  { %v2175_v40 = vrot.slane %v2106_v46, 1  ;;  %v2176_v33 = vrot.slane %v2107_v60, 1  ;;  %v2323_v4 = vrot.slane %v2254_v54, 2  ;;  %v2324_v36 = vrot.slane %v2255_v45, 2 }
 0x202   :  { %v2560_v42 = vadd.f32 %v2506_v3, %v2412_v52  ;;  %v2045_v35 = vadd.f32 %v1993_v28, %v1897_v58  ;;  %v2438_v43 = vmul.f32 %v4584_v21, %v4886_v56  ;;  %v2439_v2 = vmul.f32 %v4584_v21, %v4888_v14 }
 0x203   :  { %v2654_v50 = vsel %vm515_vm3, %v2652_v25, %v2653_v63  ;;  %v2397_v1 = vmul.f32 %v4665_v30, %v4886_v56  ;;  %v2586_v20 = vmul.f32 %v4598_v49, %v4886_v56  ;;  %v2587_v57 = vmul.f32 %v4598_v49, %v4888_v14 }
 0x204   :  { %v2708_v41 = vadd.f32 %v2654_v50, %v2560_v42  ;;  %v2081_v12 = vadd.f32 %v2065_v61, %v2045_v35  ;;  %v2507_v11 = vrot.slane %v2438_v43, 1  ;;  %v2508_v48 = vrot.slane %v2439_v2, 1 }
 0x205   :  { %v2177_v18 = vsel %vm366_vm2, %v2175_v40, %v2176_v33  ;;  %v2325_v9 = vsel %vm515_vm3, %v2323_v4, %v2324_v36  ;;  %v2655_v26 = vrot.slane %v2586_v20, 2  ;;  %v1776_v53 = vmul.f32 %v4541_v55, %v4843_v16 }
 0x206   :  { %3234 = vmatprep.mubr.msk.f32.mxu1 %vm1453_vm4, %v2708_v41  ;;  %v2229_v19 = vadd.f32 %v2177_v18, %v2081_v12  ;;  %v2656_v24 = vrot.slane %v2587_v57, 2  ;;  %v1777_v15 = vmul.f32 %v4541_v55, %v4848_v44  ;;  %v1924_v5 = vmul.f32 %v4544_v47, %v4843_v16 }
 0x207   :  { %v2509_v32 = vsel %vm366_vm2, %v2507_v11, %v2508_v48  ;;  %v1734_v59 = vmul.f32 %v4551_v29, %v4843_v16  ;;  %v1846_v31 = vrot.slane %v1776_v53, 1  ;;  %v1925_v25 = vmul.f32 %v4544_v47, %v4848_v44 }
 0x208   :  { %v2377_v39 = vadd.f32 %v2325_v9, %v2229_v19  ;;  %v1847_v51 = vrot.slane %v1777_v15, 1  ;;  %v1994_v3 = vrot.slane %v1924_v5, 2  ;;  %v2108_v63 = vmul.f32 %v4646_v7, %v4886_v56  ;;  %v1706_v15 = vld [vmem:[#allocation3 + $0xb0] sm:$0xff] }
 0x209   :  { %v1995_v27 = vrot.slane %v1925_v25, 2  ;;  %v2109_v10 = vmul.f32 %v4646_v7, %v4888_v14  ;;  %v2256_v34 = vmul.f32 %v4661_v23, %v4886_v56  ;;  %v2257_v16 = vmul.f32 %v4661_v23, %v4888_v14 }
 0x20a   :  { %v2413_v46 = vadd.f32 %v2397_v1, %v2377_v39  ;;  %v2657_v44 = vsel %vm515_vm3, %v2655_v26, %v2656_v24  ;;  %v1848_v6 = vsel %vm366_vm2, %v1846_v31, %v1847_v51  ;;  %v2178_v60 = vrot.slane %v2108_v63, 1 }
 0x20b   :  { %v1898_v54 = vadd.f32 %v1848_v6, %v1734_v59  ;;  %v1996_v45 = vsel %vm515_vm3, %v1994_v3, %v1995_v27  ;;  %v2179_v52 = vrot.slane %v2109_v10, 1  ;;  %v2326_v58 = vrot.slane %v2256_v34, 2  ;;  %v1707_v10 = vld [vmem:[#allocation3 + $0xb8] sm:$0x3] }
 0x20c   :  { %v2561_v28 = vadd.f32 %v2509_v32, %v2413_v46  ;;  %v2327_v61 = vrot.slane %v2257_v16, 2  ;;  %v2440_v40 = vmul.f32 %v4584_v21, %v1700_v17  ;;  %v2441_v33 = vmul.f32 %v4584_v21, %v1701_v37 }
 0x20d   :  { %v2046_v4 = vadd.f32 %v1996_v45, %v1898_v54  ;;  %v2066_v36 = vmul.f32 %v4580_v62, %v4886_v56  ;;  %v2588_v42 = vmul.f32 %v4598_v49, %v1700_v17  ;;  %v2589_v35 = vmul.f32 %v4598_v49, %v1701_v37 }
 0x20e   :  { %v2709_v43 = vadd.f32 %v2657_v44, %v2561_v28  ;;  %v2398_v2 = vmul.f32 %v4665_v30, %v1700_v17  ;;  %v2510_v50 = vrot.slane %v2440_v40, 1  ;;  %v2511_v1 = vrot.slane %v2441_v33, 1 }
 0x20f   :  { %v2082_v20 = vadd.f32 %v2066_v36, %v2046_v4  ;;  %v2180_v57 = vsel %vm366_vm2, %v2178_v60, %v2179_v52  ;;  %v2328_v41 = vsel %vm515_vm3, %v2326_v58, %v2327_v61  ;;  %v2658_v12 = vrot.slane %v2588_v42, 2  ;;  %v4967_v61 = vld [vmem:[#allocation3 + $0xc0] sm:$0xff] }
 0x210   :  { %3235 = vmatmul.mubr.msk.f32.gmra.mxu1 %vm1453_vm4, %v2709_v43  ;;  %v2659_v11 = vrot.slane %v2589_v35, 2  ;;  %v1778_v48 = vmul.f32 %v4541_v55, %v4886_v56  ;;  %v1779_v18 = vmul.f32 %v4541_v55, %v4888_v14  ;;  %v1926_v9 = vmul.f32 %v4544_v47, %v4886_v56 }
 0x211   :  { %v2230_v26 = vadd.f32 %v2180_v57, %v2082_v20  ;;  %v2512_v53 = vsel %vm366_vm2, %v2510_v50, %v2511_v1  ;;  %v1735_v19 = vmul.f32 %v4551_v29, %v4886_v56  ;;  %v1927_v24 = vmul.f32 %v4544_v47, %v4888_v14 }
 0x212   :  { %v1849_v5 = vrot.slane %v1778_v48, 1  ;;  %v1850_v32 = vrot.slane %v1779_v18, 1  ;;  %v1997_v59 = vrot.slane %v1926_v9, 2  ;;  %v2110_v31 = vmul.f32 %v4646_v7, %v1700_v17 }
 0x213   :  { %v2378_v25 = vadd.f32 %v2328_v41, %v2230_v26  ;;  %v1998_v39 = vrot.slane %v1927_v24, 2  ;;  %v2111_v51 = vmul.f32 %v4646_v7, %v1701_v37  ;;  %v2258_v3 = vmul.f32 %v4661_v23, %v1700_v17 }
 0x214   :  { %v2660_v63 = vsel %vm515_vm3, %v2658_v12, %v2659_v11  ;;  %v1851_v27 = vsel %vm366_vm2, %v1849_v5, %v1850_v32  ;;  %v2259_v56 = vmul.f32 %v4661_v23, %v1701_v37  ;;  %v2068_v14 = vmul.f32 %v4580_v62, %v1706_v15  ;;  %v4969_v37 = vld [vmem:[#allocation3 + $0xc8] sm:$0x3] }
 0x215   :  { %v2414_v34 = vadd.f32 %v2398_v2, %v2378_v25  ;;  %v1899_v16 = vadd.f32 %v1851_v27, %v1735_v19  ;;  %v2181_v46 = vrot.slane %v2110_v31, 1  ;;  %v2182_v44 = vrot.slane %v2111_v51, 1 }
 0x216   :  { %v1999_v6 = vsel %vm515_vm3, %v1997_v59, %v1998_v39  ;;  %v2067_v60 = vmul.f32 %v4580_v62, %v1700_v17  ;;  %v2329_v54 = vrot.slane %v2258_v3, 2  ;;  %v2112_v45 = vmul.f32 %v4646_v7, %v1706_v15 }
 0x217   :  { %v2562_v52 = vadd.f32 %v2512_v53, %v2414_v34  ;;  %v2047_v58 = vadd.f32 %v1999_v6, %v1899_v16  ;;  %v2330_v28 = vrot.slane %v2259_v56, 2  ;;  %v2113_v40 = vmul.f32 %v4646_v7, %v1707_v10 }
 0x218   :  { %v2084_v33 = vadd.f32 %v2068_v14, %v4680_v38  ;;  %v2184_v4 = vrot.slane %v2112_v45, 1  ;;  %v2260_v36 = vmul.f32 %v4661_v23, %v1706_v15  ;;  %v2261_v42 = vmul.f32 %v4661_v23, %v1707_v10 }
 0x219   :  { %v2710_v17 = vadd.f32 %v2660_v63, %v2562_v52  ;;  %v2083_v35 = vadd.f32 %v2067_v60, %v2047_v58  ;;  %v2183_v43 = vsel %vm366_vm2, %v2181_v46, %v2182_v44  ;;  %v2185_v2 = vrot.slane %v2113_v40, 1 }
 0x21a   :  { %v2332_v50 = vrot.slane %v2260_v36, 2  ;;  %v2333_v1 = vrot.slane %v2261_v42, 2  ;;  %v2444_v20 = vmul.f32 %v4584_v21, %v4967_v61  ;;  %v2445_v57 = vmul.f32 %v4584_v21, %v4969_v37 }
 0x21b   :  { %3237 = vmatprep.mubr.msk.f32.mxu1 %vm1453_vm4, %v2710_v17  ;;  %v2231_v38 = vadd.f32 %v2183_v43, %v2083_v35  ;;  %v2186_v41 = vsel %vm366_vm2, %v2184_v4, %v2185_v2  ;;  %v2592_v12 = vmul.f32 %v4598_v49, %v4967_v61  ;;  %v2593_v11 = vmul.f32 %v4598_v49, %v4969_v37 }
 0x21c   :  { %v2331_v48 = vsel %vm515_vm3, %v2329_v54, %v2330_v28  ;;  %v2232_v18 = vadd.f32 %v2186_v41, %v2084_v33  ;;  %v2516_v9 = vrot.slane %v2444_v20, 1  ;;  %v2517_v26 = vrot.slane %v2445_v57, 1  ;;  %v5002_v54 = vld [vmem:[#allocation3 + $0xd8] sm:$0x3] }
 0x21d   :  { %v2379_v53 = vadd.f32 %v2331_v48, %v2231_v38  ;;  %v2334_v19 = vsel %vm515_vm3, %v2332_v50, %v2333_v1  ;;  %v2400_v24 = vmul.f32 %v4665_v30, %v4967_v61  ;;  %v2664_v5 = vrot.slane %v2592_v12, 2 }
 0x21e   :  { %v2380_v32 = vadd.f32 %v2334_v19, %v2232_v18  ;;  %v2665_v59 = vrot.slane %v2593_v11, 2  ;;  %v1782_v31 = vmul.f32 %v4541_v55, %v1706_v15  ;;  %v1783_v25 = vmul.f32 %v4541_v55, %v1707_v10 }
 0x21f   :  { %v2415_v39 = vadd.f32 %v4677_v8, %v2379_v53  ;;  %v1737_v51 = vmul.f32 %v4551_v29, %v1706_v15  ;;  %v1930_v3 = vmul.f32 %v4544_v47, %v1706_v15  ;;  %v1931_v63 = vmul.f32 %v4544_v47, %v1707_v10  ;;  %v5000_v8 = vld [vmem:[#allocation3 + $0xd0] sm:$0xff] }
 0x220   :  { %v2416_v27 = vadd.f32 %v2400_v24, %v2380_v32  ;;  %v2518_v56 = vsel %vm366_vm2, %v2516_v9, %v2517_v26  ;;  %v1855_v14 = vrot.slane %v1782_v31, 1  ;;  %v1856_v34 = vrot.slane %v1783_v25, 1 }
 0x221   :  { %v2563_v16 = vadd.f32 %v4688_v0, %v2415_v39  ;;  %v2003_v46 = vrot.slane %v1930_v3, 2  ;;  %v2004_v44 = vrot.slane %v1931_v63, 2  ;;  %v2114_v6 = vmul.f32 %v4646_v7, %v4967_v61  ;;  %v5043_v3 = vld [vmem:[#allocation3 + $0xe0] sm:$0xff]  ;;  %v5045_v63 = vld [vmem:[#allocation3 + $0xe8] sm:$0x3] }
 0x222   :  { %v2564_v60 = vadd.f32 %v2518_v56, %v2416_v27  ;;  %v1857_v15 = vsel %vm366_vm2, %v1855_v14, %v1856_v34  ;;  %v2115_v10 = vmul.f32 %v4646_v7, %v4969_v37  ;;  %v2262_v45 = vmul.f32 %v4661_v23, %v4967_v61 }
 0x223   :  { %v2711_v0 = vadd.f32 %v4699_v13, %v2563_v16  ;;  %v2666_v52 = vsel %vm515_vm3, %v2664_v5, %v2665_v59  ;;  %v1901_v58 = vadd.f32 %v1857_v15, %v1737_v51  ;;  %v2005_v28 = vsel %vm515_vm3, %v2003_v46, %v2004_v44 }
 0x224   :  { %v2712_v40 = vadd.f32 %v2666_v52, %v2564_v60  ;;  %v2187_v33 = vrot.slane %v2114_v6, 1  ;;  %v2188_v4 = vrot.slane %v2115_v10, 1  ;;  %v2263_v36 = vmul.f32 %v4661_v23, %v4969_v37 }
 0x225   :  { %3238 = vmatmul.mubr.msk.f32.gmra.mxu1 %vm1453_vm4, %v2711_v0  ;;  %v2049_v42 = vadd.f32 %v2005_v28, %v1901_v58  ;;  %v2069_v17 = vmul.f32 %v4580_v62, %v4967_v61  ;;  %v2446_v13 = vmul.f32 %v4584_v21, %v5000_v8  ;;  %v2447_v35 = vmul.f32 %v4584_v21, %v5002_v54 }
 0x226   :  { %3240 = vmatprep.mubr.msk.f32.mxu1 %vm1453_vm4, %v2712_v40  ;;  %v2335_v43 = vrot.slane %v2262_v45, 2  ;;  %v2336_v2 = vrot.slane %v2263_v36, 2  ;;  %v2594_v50 = vmul.f32 %v4598_v49, %v5000_v8  ;;  %v2595_v1 = vmul.f32 %v4598_v49, %v5002_v54 }
 0x227   :  { %v2085_v20 = vadd.f32 %v2069_v17, %v2049_v42  ;;  %v2401_v57 = vmul.f32 %v4665_v30, %v5000_v8  ;;  %v2519_v38 = vrot.slane %v2446_v13, 1  ;;  %v2520_v41 = vrot.slane %v2447_v35, 1 }
 0x228   :  { %v2189_v12 = vsel %vm366_vm2, %v2187_v33, %v2188_v4  ;;  %v2667_v11 = vrot.slane %v2594_v50, 2  ;;  %v1738_v48 = vmul.f32 %v4551_v29, %v4967_v61  ;;  %v1784_v18 = vmul.f32 %v4541_v55, %v4967_v61 }
 0x229   :  { %v2233_v9 = vadd.f32 %v2189_v12, %v2085_v20  ;;  %v2668_v26 = vrot.slane %v2595_v1, 2  ;;  %v1785_v53 = vmul.f32 %v4541_v55, %v4969_v37  ;;  %v1932_v19 = vmul.f32 %v4544_v47, %v4967_v61 }
 0x22a   :  { %v2337_v24 = vsel %vm515_vm3, %v2335_v43, %v2336_v2  ;;  %v2521_v5 = vsel %vm366_vm2, %v2519_v38, %v2520_v41  ;;  %v1858_v32 = vrot.slane %v1784_v18, 1  ;;  %v1933_v59 = vmul.f32 %v4544_v47, %v4969_v37 }
 0x22b   :  { %v2381_v31 = vadd.f32 %v2337_v24, %v2233_v9  ;;  %v1859_v25 = vrot.slane %v1785_v53, 1  ;;  %v2006_v39 = vrot.slane %v1932_v19, 2  ;;  %v2116_v51 = vmul.f32 %v4646_v7, %v5000_v8  ;;  %v5084_v19 = vld [vmem:[#allocation3 + $0xf0] sm:$0xff]  ;;  %v5086_v24 = vld [vmem:[#allocation3 + $0xf8] sm:$0x3] }
 0x22c   :  { %v2007_v27 = vrot.slane %v1933_v59, 2  ;;  %v2117_v61 = vmul.f32 %v4646_v7, %v5002_v54  ;;  %v2264_v56 = vmul.f32 %v4661_v23, %v5000_v8  ;;  %v2265_v37 = vmul.f32 %v4661_v23, %v5002_v54 }
 0x22d   :  { %v2417_v14 = vadd.f32 %v2401_v57, %v2381_v31  ;;  %v2669_v34 = vsel %vm515_vm3, %v2667_v11, %v2668_v26  ;;  %v1860_v16 = vsel %vm366_vm2, %v1858_v32, %v1859_v25  ;;  %v2190_v46 = vrot.slane %v2116_v51, 1 }
 0x22e   :  { %v1902_v44 = vadd.f32 %v1860_v16, %v1738_v48  ;;  %v2008_v6 = vsel %vm515_vm3, %v2006_v39, %v2007_v27  ;;  %v2191_v60 = vrot.slane %v2117_v61, 1  ;;  %v2338_v15 = vrot.slane %v2264_v56, 2 }
 0x22f   :  { %v2565_v10 = vadd.f32 %v2521_v5, %v2417_v14  ;;  %v2339_v45 = vrot.slane %v2265_v37, 2  ;;  %v2448_v0 = vmul.f32 %v4584_v21, %v5043_v3  ;;  %v2449_v52 = vmul.f32 %v4584_v21, %v5045_v63 }
 0x230   :  { %v2050_v58 = vadd.f32 %v2008_v6, %v1902_v44  ;;  %v2070_v28 = vmul.f32 %v4580_v62, %v5000_v8  ;;  %v2596_v40 = vmul.f32 %v4598_v49, %v5043_v3  ;;  %v2597_v33 = vmul.f32 %v4598_v49, %v5045_v63 }
 0x231   :  { %v2713_v4 = vadd.f32 %v2669_v34, %v2565_v10  ;;  %v2402_v36 = vmul.f32 %v4665_v30, %v5043_v3  ;;  %v2522_v42 = vrot.slane %v2448_v0, 1  ;;  %v2523_v17 = vrot.slane %v2449_v52, 1 }
 0x232   :  { %v2086_v13 = vadd.f32 %v2070_v28, %v2050_v58  ;;  %v2192_v35 = vsel %vm366_vm2, %v2190_v46, %v2191_v60  ;;  %v2340_v43 = vsel %vm515_vm3, %v2338_v15, %v2339_v45  ;;  %v2670_v2 = vrot.slane %v2596_v40, 2 }
 0x233   :  { %3241 = vmatmul.mubr.msk.f32.gmra.mxu1 %vm1453_vm4, %v2713_v4  ;;  %v2671_v50 = vrot.slane %v2597_v33, 2  ;;  %v1786_v1 = vmul.f32 %v4541_v55, %v5000_v8  ;;  %v1787_v20 = vmul.f32 %v4541_v55, %v5002_v54  ;;  %v1934_v57 = vmul.f32 %v4544_v47, %v5000_v8 }
 0x234   :  { %v2234_v38 = vadd.f32 %v2192_v35, %v2086_v13  ;;  %v2524_v41 = vsel %vm366_vm2, %v2522_v42, %v2523_v17  ;;  %v1739_v12 = vmul.f32 %v4551_v29, %v5000_v8  ;;  %v1935_v11 = vmul.f32 %v4544_v47, %v5002_v54 }
 0x235   :  { %v1861_v48 = vrot.slane %v1786_v1, 1  ;;  %v1862_v18 = vrot.slane %v1787_v20, 1  ;;  %v2009_v9 = vrot.slane %v1934_v57, 2  ;;  %v2118_v26 = vmul.f32 %v4646_v7, %v5043_v3  ;;  %v5125_v57 = vld [vmem:[#allocation3 + $0x100] sm:$0xff] }
 0x236   :  { %v2382_v53 = vadd.f32 %v2340_v43, %v2234_v38  ;;  %v2010_v5 = vrot.slane %v1935_v11, 2  ;;  %v2119_v32 = vmul.f32 %v4646_v7, %v5045_v63  ;;  %v2266_v8 = vmul.f32 %v4661_v23, %v5043_v3  ;;  %v5129_v11 = vld [vmem:[#allocation3 + $0x108] sm:$0x3] }
 0x237   :  { %v2672_v54 = vsel %vm515_vm3, %v2670_v2, %v2671_v50  ;;  %v1863_v59 = vsel %vm366_vm2, %v1861_v48, %v1862_v18  ;;  %v2193_v31 = vrot.slane %v2118_v26, 1  ;;  %v2267_v25 = vmul.f32 %v4661_v23, %v5045_v63 }
 0x238   :  { %v2418_v39 = vadd.f32 %v2402_v36, %v2382_v53  ;;  %v1903_v51 = vadd.f32 %v1863_v59, %v1739_v12  ;;  %v2011_v27 = vsel %vm515_vm3, %v2009_v9, %v2010_v5  ;;  %v2194_v61 = vrot.slane %v2119_v32, 1 }
 0x239   :  { %v2341_v56 = vrot.slane %v2266_v8, 2  ;;  %v2342_v37 = vrot.slane %v2267_v25, 2  ;;  %v2450_v14 = vmul.f32 %v4584_v21, %v5084_v19  ;;  %v2451_v34 = vmul.f32 %v4584_v21, %v5086_v24 }
 0x23a   :  { %v2566_v16 = vadd.f32 %v2524_v41, %v2418_v39  ;;  %v2051_v46 = vadd.f32 %v2011_v27, %v1903_v51  ;;  %v2071_v44 = vmul.f32 %v4580_v62, %v5043_v3  ;;  %v2598_v6 = vmul.f32 %v4598_v49, %v5084_v19 }
 0x23b   :  { %v2403_v60 = vmul.f32 %v4665_v30, %v5084_v19  ;;  %v2525_v15 = vrot.slane %v2450_v14, 1  ;;  %v2526_v10 = vrot.slane %v2451_v34, 1  ;;  %v2599_v45 = vmul.f32 %v4598_v49, %v5086_v24 }
 0x23c   :  { %v2714_v0 = vadd.f32 %v2672_v54, %v2566_v16  ;;  %v2087_v52 = vadd.f32 %v2071_v44, %v2051_v46  ;;  %v2195_v58 = vsel %vm366_vm2, %v2193_v31, %v2194_v61  ;;  %v2343_v28 = vsel %vm515_vm3, %v2341_v56, %v2342_v37 }
 0x23d   :  { %v2673_v40 = vrot.slane %v2598_v6, 2  ;;  %v1740_v33 = vmul.f32 %v4551_v29, %v5043_v3  ;;  %v1788_v4 = vmul.f32 %v4541_v55, %v5043_v3  ;;  %v1789_v36 = vmul.f32 %v4541_v55, %v5045_v63 }
 0x23e   :  { %3243 = vmatprep.mubr.msk.f32.mxu1 %vm1453_vm4, %v2714_v0  ;;  %v2235_v42 = vadd.f32 %v2195_v58, %v2087_v52  ;;  %v2527_v17 = vsel %vm366_vm2, %v2525_v15, %v2526_v10  ;;  %v1936_v13 = vmul.f32 %v4544_v47, %v5043_v3  ;;  %v1937_v35 = vmul.f32 %v4544_v47, %v5045_v63 }
 0x23f   :  { %v2674_v43 = vrot.slane %v2599_v45, 2  ;;  %v1864_v2 = vrot.slane %v1788_v4, 1  ;;  %v1865_v50 = vrot.slane %v1789_v36, 1  ;;  %v2120_v1 = vmul.f32 %v4646_v7, %v5084_v19 }
 0x240   :  { %v2383_v20 = vadd.f32 %v2343_v28, %v2235_v42  ;;  %v2012_v38 = vrot.slane %v1936_v13, 2  ;;  %v2013_v41 = vrot.slane %v1937_v35, 2  ;;  %v2121_v12 = vmul.f32 %v4646_v7, %v5086_v24  ;;  %v5166_v13 = vld [vmem:[#allocation3 + $0x110] sm:$0xff]  ;;  %v5168_v35 = vld [vmem:[#allocation3 + $0x118] sm:$0x3] }
 0x241   :  { %v1866_v3 = vsel %vm366_vm2, %v1864_v2, %v1865_v50  ;;  %v2072_v63 = vmul.f32 %v4580_v62, %v5084_v19  ;;  %v2268_v48 = vmul.f32 %v4661_v23, %v5084_v19  ;;  %v2269_v18 = vmul.f32 %v4661_v23, %v5086_v24 }
 0x242   :  { %v2419_v9 = vadd.f32 %v2403_v60, %v2383_v20  ;;  %v1904_v26 = vadd.f32 %v1866_v3, %v1740_v33  ;;  %v2196_v53 = vrot.slane %v2120_v1, 1  ;;  %v2197_v5 = vrot.slane %v2121_v12, 1 }
 0x243   :  { %v2014_v32 = vsel %vm515_vm3, %v2012_v38, %v2013_v41  ;;  %v2344_v8 = vrot.slane %v2268_v48, 2  ;;  %v2345_v54 = vrot.slane %v2269_v18, 2  ;;  %v2452_v59 = vmul.f32 %v4584_v21, %v5125_v57 }
 0x244   :  { %v2567_v31 = vadd.f32 %v2527_v17, %v2419_v9  ;;  %v2675_v25 = vsel %vm515_vm3, %v2673_v40, %v2674_v43  ;;  %v2052_v39 = vadd.f32 %v2014_v32, %v1904_v26  ;;  %v2453_v51 = vmul.f32 %v4584_v21, %v5129_v11 }
 0x245   :  { %v2404_v27 = vmul.f32 %v4665_v30, %v5125_v57  ;;  %v2528_v61 = vrot.slane %v2452_v59, 1  ;;  %v2600_v56 = vmul.f32 %v4598_v49, %v5125_v57  ;;  %v2601_v37 = vmul.f32 %v4598_v49, %v5129_v11 }
 0x246   :  { %v2715_v14 = vadd.f32 %v2675_v25, %v2567_v31  ;;  %v2088_v34 = vadd.f32 %v2072_v63, %v2052_v39  ;;  %v2198_v16 = vsel %vm366_vm2, %v2196_v53, %v2197_v5  ;;  %v2529_v46 = vrot.slane %v2453_v51, 1 }
 0x247   :  { %v2346_v44 = vsel %vm515_vm3, %v2344_v8, %v2345_v54  ;;  %v1741_v6 = vmul.f32 %v4551_v29, %v5084_v19  ;;  %v1790_v60 = vmul.f32 %v4541_v55, %v5084_v19  ;;  %v1791_v15 = vmul.f32 %v4541_v55, %v5086_v24 }
 0x248   :  { %3244 = vmatmul.mubr.msk.f32.gmra.mxu1 %vm1453_vm4, %v2715_v14  ;;  %v2236_v10 = vadd.f32 %v2198_v16, %v2088_v34  ;;  %v2676_v45 = vrot.slane %v2600_v56, 2  ;;  %v1938_v0 = vmul.f32 %v4544_v47, %v5084_v19  ;;  %v1939_v52 = vmul.f32 %v4544_v47, %v5086_v24 }
 0x249   :  { %v2530_v58 = vsel %vm366_vm2, %v2528_v61, %v2529_v46  ;;  %v2677_v28 = vrot.slane %v2601_v37, 2  ;;  %v1867_v40 = vrot.slane %v1790_v60, 1  ;;  %v1868_v33 = vrot.slane %v1791_v15, 1 }
 0x24a   :  { %v2384_v4 = vadd.f32 %v2346_v44, %v2236_v10  ;;  %v2015_v36 = vrot.slane %v1938_v0, 2  ;;  %v2016_v42 = vrot.slane %v1939_v52, 2  ;;  %v2122_v17 = vmul.f32 %v4646_v7, %v5125_v57  ;;  %v1720_v0 = vld [vmem:[#allocation3 + $0x120] sm:$0xff]  ;;  %v1721_v52 = vld [vmem:[#allocation3 + $0x128] sm:$0x3] }
 0x24b   :  { %v1869_v19 = vsel %vm366_vm2, %v1867_v40, %v1868_v33  ;;  %v2123_v24 = vmul.f32 %v4646_v7, %v5129_v11  ;;  %v2270_v43 = vmul.f32 %v4661_v23, %v5125_v57  ;;  %v2271_v2 = vmul.f32 %v4661_v23, %v5129_v11 }
 0x24c   :  { %v2420_v50 = vadd.f32 %v2404_v27, %v2384_v4  ;;  %v1905_v1 = vadd.f32 %v1869_v19, %v1741_v6  ;;  %v2017_v20 = vsel %vm515_vm3, %v2015_v36, %v2016_v42  ;;  %v2073_v38 = vmul.f32 %v4580_v62, %v5125_v57 }
 0x24d   :  { %v2199_v41 = vrot.slane %v2122_v17, 1  ;;  %v2200_v12 = vrot.slane %v2123_v24, 1  ;;  %v2347_v3 = vrot.slane %v2270_v43, 2  ;;  %v2348_v63 = vrot.slane %v2271_v2, 2 }
 0x24e   :  { %v2568_v48 = vadd.f32 %v2530_v58, %v2420_v50  ;;  %v2053_v18 = vadd.f32 %v2017_v20, %v1905_v1  ;;  %v2454_v9 = vmul.f32 %v4584_v21, %v5166_v13  ;;  %v2455_v26 = vmul.f32 %v4584_v21, %v5168_v35 }
 0x24f   :  { %v2678_v53 = vsel %vm515_vm3, %v2676_v45, %v2677_v28  ;;  %v2405_v5 = vmul.f32 %v4665_v30, %v5166_v13  ;;  %v2602_v32 = vmul.f32 %v4598_v49, %v5166_v13  ;;  %v2603_v8 = vmul.f32 %v4598_v49, %v5168_v35 }
 0x250   :  { %v2716_v54 = vadd.f32 %v2678_v53, %v2568_v48  ;;  %v2089_v59 = vadd.f32 %v2073_v38, %v2053_v18  ;;  %v2531_v31 = vrot.slane %v2454_v9, 1  ;;  %v2532_v25 = vrot.slane %v2455_v26, 1 }
 0x251   :  { %v2201_v39 = vsel %vm366_vm2, %v2199_v41, %v2200_v12  ;;  %v2349_v51 = vsel %vm515_vm3, %v2347_v3, %v2348_v63  ;;  %v2679_v27 = vrot.slane %v2602_v32, 2  ;;  %v1792_v61 = vmul.f32 %v4541_v55, %v5125_v57 }
 0x252   :  { %3246 = vmatprep.mubr.msk.f32.mxu1 %vm1453_vm4, %v2716_v54  ;;  %v2237_v56 = vadd.f32 %v2201_v39, %v2089_v59  ;;  %v2680_v37 = vrot.slane %v2603_v8, 2  ;;  %v1793_v14 = vmul.f32 %v4541_v55, %v5129_v11  ;;  %v1940_v34 = vmul.f32 %v4544_v47, %v5125_v57 }
 0x253   :  { %v2533_v16 = vsel %vm366_vm2, %v2531_v31, %v2532_v25  ;;  %v1742_v46 = vmul.f32 %v4551_v29, %v5125_v57  ;;  %v1870_v44 = vrot.slane %v1792_v61, 1  ;;  %v1941_v6 = vmul.f32 %v4544_v47, %v5129_v11 }
 0x254   :  { %v2385_v60 = vadd.f32 %v2349_v51, %v2237_v56  ;;  %v1871_v15 = vrot.slane %v1793_v14, 1  ;;  %v2018_v10 = vrot.slane %v1940_v34, 2  ;;  %v2124_v45 = vmul.f32 %v4646_v7, %v5166_v13  ;;  %v1723_v14 = vld [vmem:[#allocation3 + $0x138] sm:$0x3] }
 0x255   :  { %v2019_v58 = vrot.slane %v1941_v6, 2  ;;  %v2125_v28 = vmul.f32 %v4646_v7, %v5168_v35  ;;  %v2272_v40 = vmul.f32 %v4661_v23, %v5166_v13  ;;  %v2273_v57 = vmul.f32 %v4661_v23, %v5168_v35 }
 0x256   :  { %v2421_v33 = vadd.f32 %v2405_v5, %v2385_v60  ;;  %v2681_v11 = vsel %vm515_vm3, %v2679_v27, %v2680_v37  ;;  %v1872_v4 = vsel %vm366_vm2, %v1870_v44, %v1871_v15  ;;  %v2202_v36 = vrot.slane %v2124_v45, 1  ;;  %v1722_v37 = vld [vmem:[#allocation3 + $0x130] sm:$0xff] }
 0x257   :  { %v1906_v42 = vadd.f32 %v1872_v4, %v1742_v46  ;;  %v2020_v17 = vsel %vm515_vm3, %v2018_v10, %v2019_v58  ;;  %v2203_v19 = vrot.slane %v2125_v28, 1  ;;  %v2350_v24 = vrot.slane %v2272_v40, 2 }
 0x258   :  { %v2569_v43 = vadd.f32 %v2533_v16, %v2421_v33  ;;  %v2351_v2 = vrot.slane %v2273_v57, 2  ;;  %v2456_v50 = vmul.f32 %v4584_v21, %v1720_v0  ;;  %v2457_v1 = vmul.f32 %v4584_v21, %v1721_v52 }
 0x259   :  { %v2054_v20 = vadd.f32 %v2020_v17, %v1906_v42  ;;  %v2074_v38 = vmul.f32 %v4580_v62, %v5166_v13  ;;  %v2604_v41 = vmul.f32 %v4598_v49, %v1720_v0  ;;  %v2605_v12 = vmul.f32 %v4598_v49, %v1721_v52 }
 0x25a   :  { %v2717_v3 = vadd.f32 %v2681_v11, %v2569_v43  ;;  %v2406_v63 = vmul.f32 %v4665_v30, %v1720_v0  ;;  %v2204_v18 = vsel %vm366_vm2, %v2202_v36, %v2203_v19  ;;  %v2352_v9 = vsel %vm515_vm3, %v2350_v24, %v2351_v2 }
 0x25b   :  { %v2090_v48 = vadd.f32 %v2074_v38, %v2054_v20  ;;  %v2534_v26 = vrot.slane %v2456_v50, 1  ;;  %v2535_v53 = vrot.slane %v2457_v1, 1  ;;  %v1794_v5 = vmul.f32 %v4541_v55, %v5166_v13 }
 0x25c   :  { %3247 = vmatmul.mubr.msk.f32.gmra.mxu1 %vm1453_vm4, %v2717_v3  ;;  %v1795_v32 = vmul.f32 %v4541_v55, %v5168_v35  ;;  %v1942_v8 = vmul.f32 %v4544_v47, %v5166_v13  ;;  %v2682_v59 = vrot.slane %v2604_v41, 2  ;;  %v2683_v31 = vrot.slane %v2605_v12, 2 }
 0x25d   :  { %v2238_v54 = vadd.f32 %v2204_v18, %v2090_v48  ;;  %v1943_v25 = vmul.f32 %v4544_v47, %v5168_v35  ;;  %v1873_v39 = vrot.slane %v1794_v5, 1  ;;  %v2126_v61 = vmul.f32 %v4646_v7, %v1720_v0 }
 0x25e   :  { %v1874_v51 = vrot.slane %v1795_v32, 1  ;;  %v2021_v27 = vrot.slane %v1942_v8, 2  ;;  %v1743_v55 = vmul.f32 %v4551_v29, %v5166_v13  ;;  %v2127_v16 = vmul.f32 %v4646_v7, %v1721_v52 }
 0x25f   :  { %v2386_v56 = vadd.f32 %v2352_v9, %v2238_v54  ;;  %v2022_v34 = vrot.slane %v1943_v25, 2  ;;  %v2274_v44 = vmul.f32 %v4661_v23, %v1720_v0  ;;  %v2275_v47 = vmul.f32 %v4661_v23, %v1721_v52 }
 0x260   :  { %v1875_v46 = vsel %vm366_vm2, %v1873_v39, %v1874_v51  ;;  %v2536_v6 = vsel %vm366_vm2, %v2534_v26, %v2535_v53  ;;  %v2205_v15 = vrot.slane %v2126_v61, 1  ;;  %v2206_v45 = vrot.slane %v2127_v16, 1 }
 0x261   :  { %v2422_v35 = vadd.f32 %v2406_v63, %v2386_v56  ;;  %v1907_v60 = vadd.f32 %v1875_v46, %v1743_v55  ;;  %v2023_v10 = vsel %vm515_vm3, %v2021_v27, %v2022_v34  ;;  %v2458_v58 = vmul.f32 %v4584_v21, %v1722_v37 }
 0x262   :  { %v2459_v29 = vmul.f32 %v4584_v21, %v1723_v14  ;;  %v2684_v7 = vsel %vm515_vm3, %v2682_v59, %v2683_v31  ;;  %v2075_v40 = vmul.f32 %v4580_v62, %v1720_v0  ;;  %v2353_v57 = vrot.slane %v2274_v44, 2 }
 0x263   :  { %v2570_v13 = vadd.f32 %v2536_v6, %v2422_v35  ;;  %v2055_v28 = vadd.f32 %v2023_v10, %v1907_v60  ;;  %v2354_v23 = vrot.slane %v2275_v47, 2  ;;  %v2606_v52 = vmul.f32 %v4598_v49, %v1722_v37 }
 0x264   :  { %v2607_v33 = vmul.f32 %v4598_v49, %v1723_v14  ;;  %v2207_v36 = vsel %vm366_vm2, %v2205_v15, %v2206_v45  ;;  %v2537_v42 = vrot.slane %v2458_v58, 1  ;;  %v2538_v17 = vrot.slane %v2459_v29, 1 }
 0x265   :  { %v2718_v11 = vadd.f32 %v2684_v7, %v2570_v13  ;;  %v2091_v4 = vadd.f32 %v2075_v40, %v2055_v28  ;;  %v2407_v19 = vmul.f32 %v4665_v30, %v1722_v37  ;;  %v2355_v24 = vsel %vm515_vm3, %v2353_v57, %v2354_v23 }
 0x266   :  { %v2685_v62 = vrot.slane %v2606_v52, 2  ;;  %v2686_v0 = vrot.slane %v2607_v33, 2  ;;  %v2539_v2 = vsel %vm366_vm2, %v2537_v42, %v2538_v17 }
 0x267   :  { %3249 = vmatprep.mubr.msk.f32.mxu1 %vm1453_vm4, %v2718_v11  ;;  %v2239_v21 = vadd.f32 %v2207_v36, %v2091_v4 }
 0x268   :  { %v2687_v49 = vsel %vm515_vm3, %v2685_v62, %v2686_v0 }
 0x269   :  { %v2387_v43 = vadd.f32 %v2355_v24, %v2239_v21 }
 0x26b   :  { %v2423_v50 = vadd.f32 %v2407_v19, %v2387_v43 }
 0x26d   :  { %v2571_v1 = vadd.f32 %v2539_v2, %v2423_v50 }
 0x26f   :  { %v2719_v20 = vadd.f32 %v2687_v49, %v2571_v1 }
 0x271   :  { %3250 = vmatmul.mubr.msk.f32.gmra.mxu1 %vm1453_vm4, %v2719_v20 }
 0x2a7   :  { %v5256_v38 = vpop.f32.mrf.mxu0 }
 0x2a8   :  { %v2952_v63 = vmul.f32 %v5256_v38, %v5256_v38  ;;  %v2914_v18 = vsel %vm1453_vm4, %v5256_v38, 0.0 }
 0x2a9   :  { %v5260_v12 = vpop.f32.mrf.mxu0 }
 0x2aa   :  { %v2951_v30 = vmul.f32 %v5260_v12, %v5260_v12  ;;  %v2913_v48 = vsel %vm1453_vm4, %v5260_v12, 0.0  ;;  %v2968_v32 = vsel %vm1453_vm4, %v2952_v63, 0.0 }
 0x2ab   :  { %v2915_v53 = vadd.f32 %v2914_v18, %v2913_v48 }
 0x2ac   :  { %v2967_v9 = vsel %vm1453_vm4, %v2951_v30, 0.0 }
 0x2ad   :  { %v2969_v54 = vadd.f32 %v2968_v32, %v2967_v9 }
 0x2bc   :  { %v5258_v41 = vpop.f32.mrf.mxu1 }
 0x2bd   :  { %v2954_v39 = vmul.f32 %v5258_v41, %v5258_v41  ;;  %v2918_v27 = vsel %vm1453_vm4, %v5258_v41, 0.0 }
 0x2be   :  { %v5264_v3 = vpop.f32.mrf.mxu1 }
 0x2bf   :  { %v2953_v26 = vmul.f32 %v5264_v3, %v5264_v3  ;;  %v2916_v8 = vsel %vm1453_vm4, %v5264_v3, 0.0  ;;  %v2972_v14 = vsel %vm1453_vm4, %v2954_v39, 0.0 }
 0x2c0   :  { %v2917_v31 = vadd.f32 %v2916_v8, %v2915_v53 }
 0x2c1   :  { %v2970_v59 = vsel %vm1453_vm4, %v2953_v26, 0.0 }
 0x2c2   :  { %v2971_v51 = vadd.f32 %v2970_v59, %v2969_v54  ;;  %v2919_v56 = vadd.f32 %v2918_v27, %v2917_v31 }
 0x2c4   :  { %v2973_v34 = vadd.f32 %v2972_v14, %v2971_v51 }
 0x2d0   :  { %v5275_v5 = vpop.f32.mrf.mxu1 }
 0x2d1   :  { %v2956_v47 = vmul.f32 %v5275_v5, %v5275_v5  ;;  %v2922_v6 = vsel %vm1453_vm4, %v5275_v5, 0.0 }
 0x2d2   :  { %v5281_v25 = vpop.f32.mrf.mxu1 }
 0x2d3   :  { %v2955_v61 = vmul.f32 %v5281_v25, %v5281_v25  ;;  %v2920_v55 = vsel %vm1453_vm4, %v5281_v25, 0.0  ;;  %v2976_v45 = vsel %vm1453_vm4, %v2956_v47, 0.0 }
 0x2d4   :  { %v2921_v46 = vadd.f32 %v2920_v55, %v2919_v56 }
 0x2d5   :  { %v2974_v16 = vsel %vm1453_vm4, %v2955_v61, 0.0 }
 0x2d6   :  { %v2975_v35 = vadd.f32 %v2974_v16, %v2973_v34  ;;  %v2923_v15 = vadd.f32 %v2922_v6, %v2921_v46 }
 0x2d8   :  { %v2977_v29 = vadd.f32 %v2976_v45, %v2975_v35 }
 0x2e5   :  { %v5289_v37 = vpop.f32.mrf.mxu1 }
 0x2e6   :  { %v2958_v40 = vmul.f32 %v5289_v37, %v5289_v37  ;;  %v2926_v23 = vsel %vm1453_vm4, %v5289_v37, 0.0 }
 0x2e7   :  { %v5295_v44 = vpop.f32.mrf.mxu1 }
 0x2e8   :  { %v2957_v60 = vmul.f32 %v5295_v44, %v5295_v44  ;;  %v2924_v58 = vsel %vm1453_vm4, %v5295_v44, 0.0  ;;  %v2980_v4 = vsel %vm1453_vm4, %v2958_v40, 0.0 }
 0x2e9   :  { %v2925_v7 = vadd.f32 %v2924_v58, %v2923_v15 }
 0x2ea   :  { %v2978_v13 = vsel %vm1453_vm4, %v2957_v60, 0.0 }
 0x2eb   :  { %v2979_v57 = vadd.f32 %v2978_v13, %v2977_v29  ;;  %v2927_v33 = vadd.f32 %v2926_v23, %v2925_v7 }
 0x2ed   :  { %v2981_v42 = vadd.f32 %v2980_v4, %v2979_v57 }
 0x2f3   :  { %v5303_v10 = vpop.f32.mrf.mxu1 }
 0x2f4   :  { %v2960_v24 = vmul.f32 %v5303_v10, %v5303_v10  ;;  %v2930_v0 = vsel %vm1453_vm4, %v5303_v10, 0.0 }
 0x2f5   :  { %v5309_v28 = vpop.f32.mrf.mxu1 }
 0x2f6   :  { %v2959_v52 = vmul.f32 %v5309_v28, %v5309_v28  ;;  %v2928_v36 = vsel %vm1453_vm4, %v5309_v28, 0.0  ;;  %v2984_v49 = vsel %vm1453_vm4, %v2960_v24, 0.0 }
 0x2f7   :  { %v2929_v21 = vadd.f32 %v2928_v36, %v2927_v33 }
 0x2f8   :  { %v2982_v17 = vsel %vm1453_vm4, %v2959_v52, 0.0 }
 0x2f9   :  { %v2983_v62 = vadd.f32 %v2982_v17, %v2981_v42  ;;  %v2931_v2 = vadd.f32 %v2930_v0, %v2929_v21 }
 0x2fb   :  { %v2985_v20 = vadd.f32 %v2984_v49, %v2983_v62 }
 0x308   :  { %v5317_v11 = vpop.f32.mrf.mxu1 }
 0x309   :  { %v2962_v18 = vmul.f32 %v5317_v11, %v5317_v11  ;;  %v2934_v26 = vsel %vm1453_vm4, %v5317_v11, 0.0 }
 0x30a   :  { %v5323_v19 = vpop.f32.mrf.mxu1 }
 0x30b   :  { %v2961_v43 = vmul.f32 %v5323_v19, %v5323_v19  ;;  %v2932_v1 = vsel %vm1453_vm4, %v5323_v19, 0.0  ;;  %v2988_v8 = vsel %vm1453_vm4, %v2962_v18, 0.0 }
 0x30c   :  { %v2933_v63 = vadd.f32 %v2932_v1, %v2931_v2  ;;  %v1624_v1 = vld [vmem:[%s5409_s10] sm:$0x1]  ;;  %s3299_s10 = smov [#allocation4]  }
 0x30d   :  { %v2986_v30 = vsel %vm1453_vm4, %v2961_v43, 0.0 }
 0x30e   :  { %v2987_v9 = vadd.f32 %v2986_v30, %v2985_v20  ;;  %v2935_v32 = vadd.f32 %v2934_v26, %v2933_v63  ;;  %v1625_v63 = vld [vmem:[%s5410_s11] sm:$0x1]  ;;  %s3093_s11 = sshll.u32 %s3299_s10, 4  ;;  %s3094_s11 = int_to_ptr.vmem [resolvable:$true] %s3093_s11 }
 0x30f   :  { %s3276_s2 = scalar_lea.vmem %s3094_s11, 2048  ;;  %p3281_p1 = scmp.lt.s32.totalorder %s3094_s11, %s3094_s11 }
 0x310   :  { %v2989_v59 = vadd.f32 %v2988_v8, %v2987_v9  ;;  %p3277_p0 = scmp.ne.s32.totalorder %s3094_s11, %s3276_s2  ;;  %p3282_p2 = scmp.lt.s32.totalorder %s3276_s2, %s3276_s2 }
 0x312   :  { %p3283_p3 = por %p3282_p2, %p3281_p1 }
 0x314   :  { %p3284_p4 = pnand %p3283_p3, %p3277_p0 }
 0x31c   :  { %v5331_v50 = vpop.f32.mrf.mxu1 }
 0x31d   :  { %v2964_v51 = vmul.f32 %v5331_v50, %v5331_v50  ;;  %v2938_v61 = vsel %vm1453_vm4, %v5331_v50, 0.0 }
 0x31e   :  { %v5337_v48 = vpop.f32.mrf.mxu1 }
 0x31f   :  { %v2963_v53 = vmul.f32 %v5337_v48, %v5337_v48  ;;  %v2936_v54 = vsel %vm1453_vm4, %v5337_v48, 0.0  ;;  %v2992_v55 = vsel %vm1453_vm4, %v2964_v51, 0.0 }
 0x320   :  { %v2937_v39 = vadd.f32 %v2936_v54, %v2935_v32 }
 0x321   :  { %v2990_v31 = vsel %vm1453_vm4, %v2963_v53, 0.0 }
 0x322   :  { %v2991_v27 = vadd.f32 %v2990_v31, %v2989_v59  ;;  %v2939_v14 = vadd.f32 %v2938_v61, %v2937_v39 }
 0x324   :  { %v2993_v16 = vadd.f32 %v2992_v55, %v2991_v27 }
 0x331   :  { %v3251_v56 = vpop.f32.mrf.mxu1 }
 0x332   :  { %v2966_v46 = vmul.f32 %v3251_v56, %v3251_v56  ;;  %v2942_v60 = vsel %vm1453_vm4, %v3251_v56, 0.0 }
 0x333   :  { %v2904_v34 = vpop.f32.mrf.mxu1 }
 0x334   :  { %v2940_v47 = vsel %vm1453_vm4, %v2904_v34, 0.0  ;;  %v2965_v35 = vmul.f32 %v2904_v34, %v2904_v34  ;;  %v2996_v29 = vsel %vm1453_vm4, %v2966_v46, 0.0 }
 0x335   :  { %v2941_v6 = vadd.f32 %v2940_v47, %v2939_v14 }
 0x336   :  { %v2994_v15 = vsel %vm1453_vm4, %v2965_v35, 0.0 }
 0x337   :  { %v2943_v45 = vadd.f32 %v2942_v60, %v2941_v6  ;;  %v2995_v58 = vadd.f32 %v2994_v15, %v2993_v16 }
 0x339   :  { %v2944_v13 = vrot.slane %v2943_v45, 4  ;;  %v2997_v7 = vadd.f32 %v2996_v29, %v2995_v58 }
 0x33b   :  { %v2945_v40 = vadd.f32 %v2944_v13, %v2943_v45  ;;  %v2998_v57 = vrot.slane %v2997_v7, 4 }
 0x33d   :  { %v2946_v23 = vrot.slane %v2945_v40, 2  ;;  %v2999_v52 = vadd.f32 %v2998_v57, %v2997_v7 }
 0x33f   :  { %v2947_v33 = vadd.f32 %v2946_v23, %v2945_v40  ;;  %v3000_v4 = vrot.slane %v2999_v52, 2 }
 0x341   :  { %v2948_v36 = vrot.slane %v2947_v33, 1  ;;  %v3001_v42 = vadd.f32 %v3000_v4, %v2999_v52 }
 0x343   :  { %v2949_v17 = vadd.f32 %v2948_v36, %v2947_v33  ;;  %v3002_v21 = vrot.slane %v3001_v42, 1 }
 0x345   :  { %v2950_v24 = vmul.f32 0.0078125, %v2949_v17  ;;  %v3003_v62 = vadd.f32 %v3002_v21, %v3001_v42 }
 0x347   :  { %v3004_v0 = vmul.f32 0.0078125, %v3003_v62  ;;  %v3005_v43 = vmul.f32 %v2950_v24, %v2950_v24 }
 0x349   :  { %v3006_v2 = vsub.f32 %v3004_v0, %v3005_v43 }
 0x34b   :  { %v3007_v49 = vadd.f32 1e-05, %v3006_v2 }
 0x34d   :  { %3274 = vrsqrt.f32 %v3007_v49 }
 0x35a   :  { %v3275_v20 = vpop.eup %3274 }
 0x35b   :  { %v3009_v30 = vmul.f32 %v3275_v20, %v1624_v1 }
 0x35d   :  { %v3010_v18 = vmul.f32 %v3009_v30, %v2950_v24  ;;  %v3016_v9 = vrot.slane %v3009_v30, %v3501_v22 }
 0x35f   :  { %v3011_v26 = vsub.f32 %v1625_v63, %v3010_v18  ;;  %v3032_v53 = vmul.f32 %v3016_v9, %v2904_v34  ;;  %v3018_v32 = vmul.f32 %v3016_v9, %v5260_v12  ;;  %v3019_v8 = vmul.f32 %v5256_v38, %v3016_v9 }
 0x360   :  { %v3020_v54 = vmul.f32 %v3016_v9, %v5264_v3  ;;  %v3021_v59 = vmul.f32 %v5258_v41, %v3016_v9  ;;  %v3022_v31 = vmul.f32 %v3016_v9, %v5281_v25  ;;  %v3023_v39 = vmul.f32 %v5275_v5, %v3016_v9 }
 0x361   :  { %v3038_v51 = vrot.slane %v3011_v26, %v3501_v22  ;;  %v3024_v27 = vmul.f32 %v3016_v9, %v5295_v44  ;;  %v3025_v61 = vmul.f32 %v5289_v37, %v3016_v9  ;;  %v3026_v14 = vmul.f32 %v3016_v9, %v5309_v28 }
 0x362   :  { %v3027_v12 = vmul.f32 %v5303_v10, %v3016_v9  ;;  %v3028_v38 = vmul.f32 %v3016_v9, %v5323_v19  ;;  %v3029_v3 = vmul.f32 %v5317_v11, %v3016_v9  ;;  %v3030_v41 = vmul.f32 %v3016_v9, %v5337_v48 }
 0x363   :  { %v3054_v55 = vadd.f32 %v3038_v51, %v3032_v53  ;;  %v3031_v25 = vmul.f32 %v5331_v50, %v3016_v9  ;;  %v3033_v5 = vmul.f32 %v3251_v56, %v3016_v9  ;;  %v3040_v34 = vadd.f32 %v3038_v51, %v3018_v32 }
 0x364   :  { %v3041_v22 = vadd.f32 %v3038_v51, %v3019_v8  ;;  %v3042_v16 = vadd.f32 %v3038_v51, %v3020_v54  ;;  %v3043_v44 = vadd.f32 %v3038_v51, %v3021_v59  ;;  %v3044_v46 = vadd.f32 %v3038_v51, %v3022_v31 }
 0x365   :  { %v3070_v37 = vmax.f32 %v3054_v55, 0.0  ;;  %v3045_v47 = vadd.f32 %v3038_v51, %v3023_v39  ;;  %v3046_v28 = vadd.f32 %v3038_v51, %v3024_v27  ;;  %v3047_v35 = vadd.f32 %v3038_v51, %v3025_v61 }
 0x366   :  { %v3048_v10 = vadd.f32 %v3038_v51, %v3026_v14  ;;  %v3049_v6 = vadd.f32 %v3038_v51, %v3027_v12  ;;  %v3050_v19 = vadd.f32 %v3038_v51, %v3028_v38  ;;  %v3051_v60 = vadd.f32 %v3038_v51, %v3029_v3 }
 0x367   :  { %3086 = vst.msk [vmem:[#allocation4 + $0x70] sm:$0xff] %vm1453_vm4, %v3070_v37  ;;  %v3052_v11 = vadd.f32 %v3038_v51, %v3030_v41  ;;  %v3053_v48 = vadd.f32 %v3038_v51, %v3031_v25  ;;  %v3055_v15 = vadd.f32 %v3038_v51, %v3033_v5  ;;  %v3056_v50 = vmax.f32 %v3040_v34, 0.0 }
 0x368   :  { %v3057_v56 = vmax.f32 %v3041_v22, 0.0  ;;  %v3058_v45 = vmax.f32 %v3042_v16, 0.0  ;;  %v3059_v58 = vmax.f32 %v3043_v44, 0.0  ;;  %v3060_v29 = vmax.f32 %v3044_v46, 0.0 }
 0x369   :  { %v3061_v13 = vmax.f32 %v3045_v47, 0.0  ;;  %v3062_v7 = vmax.f32 %v3046_v28, 0.0  ;;  %v3063_v40 = vmax.f32 %v3047_v35, 0.0  ;;  %v3064_v57 = vmax.f32 %v3048_v10, 0.0  ;;  %3072 = vst.msk [vmem:[#allocation4] sm:$0xff] %vm1453_vm4, %v3056_v50 }
 0x36a   :  { %v3065_v23 = vmax.f32 %v3049_v6, 0.0  ;;  %v3066_v52 = vmax.f32 %v3050_v19, 0.0  ;;  %v3067_v33 = vmax.f32 %v3051_v60, 0.0  ;;  %v3068_v4 = vmax.f32 %v3052_v11, 0.0  ;;  %3073 = vst.msk [vmem:[#allocation4 + $0x8] sm:$0xff] %vm1453_vm4, %v3057_v56  ;;  %3074 = vst.msk [vmem:[#allocation4 + $0x10] sm:$0xff] %vm1453_vm4, %v3058_v45 }
 0x36b   :  { %3075 = vst.msk [vmem:[#allocation4 + $0x18] sm:$0xff] %vm1453_vm4, %v3059_v58  ;;  %3076 = vst.msk [vmem:[#allocation4 + $0x20] sm:$0xff] %vm1453_vm4, %v3060_v29  ;;  %v3069_v36 = vmax.f32 %v3053_v48, 0.0  ;;  %v3071_v42 = vmax.f32 %v3055_v15, 0.0 }
 0x36c   :  { %3077 = vst.msk [vmem:[#allocation4 + $0x28] sm:$0xff] %vm1453_vm4, %v3061_v13  ;;  %3078 = vst.msk [vmem:[#allocation4 + $0x30] sm:$0xff] %vm1453_vm4, %v3062_v7 }
 0x36d   :  { %3079 = vst.msk [vmem:[#allocation4 + $0x38] sm:$0xff] %vm1453_vm4, %v3063_v40  ;;  %3080 = vst.msk [vmem:[#allocation4 + $0x40] sm:$0xff] %vm1453_vm4, %v3064_v57 }
 0x36e   :  { %3081 = vst.msk [vmem:[#allocation4 + $0x48] sm:$0xff] %vm1453_vm4, %v3065_v23  ;;  %3082 = vst.msk [vmem:[#allocation4 + $0x50] sm:$0xff] %vm1453_vm4, %v3066_v52 }
 0x36f   :  { %3083 = vst.msk [vmem:[#allocation4 + $0x58] sm:$0xff] %vm1453_vm4, %v3067_v33  ;;  %3084 = vst.msk [vmem:[#allocation4 + $0x60] sm:$0xff] %vm1453_vm4, %v3068_v4 }
 0x370   :  { %3085 = vst.msk [vmem:[#allocation4 + $0x68] sm:$0xff] %vm1453_vm4, %v3069_v36  ;;  %3087 = vst.msk [vmem:[#allocation4 + $0x78] sm:$0xff] %vm1453_vm4, %v3071_v42 }
 0x371   :  { %3287 = shalt.err (!%p3284_p4)
}
 0x372   :  { %s3300_s3 = smov 128   ;;  %s3301_s24 = smov 8  }
 0x373   :  { %3099 = dma.vmem_to_hbm [thread:$0]  %s3094_s11, 2048, %s5411_s12, [#allocation5], %s3300_s3, %s3300_s3, %s3301_s24  }
 0x374   :  { %3296 = dma.done.wait [#allocation5], 2048  }
 0x375   :  { %3297 = vsyncadd [#allocation5], 4294965248 }
 0x376   :  { %3103 = vsyncpa [#allocation5], 1 }

</bundles_post_ra>
